<compile_context>
chip_gen: v7x
topology: tpu7x:2x2x1
jax: 0.10.0
libtpu: 0.0.40
codegen_flags: <defaults>
</compile_context>

<pallas_src>
import jax
import jax.numpy as jnp
from jax.experimental import pallas as pl
from jax.experimental.pallas import tpu as pltpu

INPUT_SIZE = 64
HIDDEN = 128
NUM_CLASSES = 40


def _lstm_kernel(x_ref, w1_ref, b1_ref, u1_ref, w2u2_ref, b2_ref, wf_ref, bf_ref,
                 out_ref, g1_ref):
    """Single grid step. x_ref is (T*Bp, D) time-major, batch already padded to Bp."""
    TB, D = x_ref.shape
    Bp = out_ref.shape[0]
    T = TB // Bp
    H = u1_ref.shape[0]

    # (1) Hoisted input projection: x@W1 + b1 for all T timesteps in one matmul.
    g1_ref[...] = (jnp.dot(x_ref[...], w1_ref[...],
                           preferred_element_type=jnp.float32) + b1_ref[...])

    def act(gates, c):
        # gate column order (i, f, o | g): one contiguous sigmoid slab + one tanh slab
        s = jax.nn.sigmoid(gates[:, :3 * H])
        i = s[:, 0 * H:1 * H]
        f = s[:, 1 * H:2 * H]
        o = s[:, 2 * H:3 * H]
        g = jnp.tanh(gates[:, 3 * H:4 * H])
        c_new = f * c + i * g
        h_new = o * jnp.tanh(c_new)
        return h_new, c_new

    def step(t, carry):
        h1, c1, h2, c2 = carry
        row = pl.multiple_of(t * Bp, Bp)  # sublane-aligned dynamic offset into g1
        # layer 0: precomputed x-part + recurrent h1 @ U1
        g_l0 = g1_ref[pl.ds(row, Bp), :] + jnp.dot(
            h1, u1_ref[...], preferred_element_type=jnp.float32)
        h1, c1 = act(g_l0, c1)
        # layer 1: fused [h1_new | h2_prev] @ [W_ih1 ; W_hh1]  (single K=2H=256 dot)
        h12 = jnp.concatenate([h1, h2], axis=-1)
        g_l1 = jnp.dot(h12, w2u2_ref[...],
                       preferred_element_type=jnp.float32) + b2_ref[...]
        h2, c2 = act(g_l1, c2)
        return (h1, c1, h2, c2)

    zeros = jnp.zeros((Bp, H), jnp.float32)
    unroll = True if T <= 32 else 8
    _, _, h2, _ = jax.lax.fori_loop(0, T, step, (zeros, zeros, zeros, zeros),
                                    unroll=unroll)

    # Classifier on the last timestep's layer-1 hidden state (lane-padded to 128).
    out_ref[...] = (jnp.dot(h2, wf_ref[...], preferred_element_type=jnp.float32)
                    + bf_ref[...]).astype(out_ref.dtype)


@jax.jit
def lstm_forward(x, kparams):
    """x: (B, T, 64) f32 -> (B, 40) f32."""
    B, T, D = x.shape
    w1, b1, u1, w2u2, b2, wf, bf = kparams
    H = u1.shape[0]
    Cp = wf.shape[1]            # lane-padded class dim (multiple of 128)
    C = NUM_CLASSES             # real class dim
    Bp = max(8, ((B + 7) // 8) * 8)  # pad batch to a sublane multiple

    x_tm = jnp.transpose(x, (1, 0, 2))                      # (T, B, D) time-major
    if Bp != B:
        x_tm = jnp.pad(x_tm, ((0, 0), (0, Bp - B), (0, 0)))
    x2d = x_tm.reshape(T * Bp, D)                           # (T*Bp, D)

    grid_spec = pltpu.PrefetchScalarGridSpec(
        num_scalar_prefetch=0,
        grid=(1,),
        in_specs=[
            pl.BlockSpec((T * Bp, D), lambda i: (0, 0)),      # x (all timesteps)
            pl.BlockSpec((D, 4 * H), lambda i: (0, 0)),       # W_ih layer0  (in, 4H)
            pl.BlockSpec((1, 4 * H), lambda i: (0, 0)),       # bias layer0 (ih+hh)
            pl.BlockSpec((H, 4 * H), lambda i: (0, 0)),       # W_hh layer0
            pl.BlockSpec((2 * H, 4 * H), lambda i: (0, 0)),   # fused [W_ih1 ; W_hh1]
            pl.BlockSpec((1, 4 * H), lambda i: (0, 0)),       # bias layer1 (ih+hh)
            pl.BlockSpec((H, Cp), lambda i: (0, 0)),          # fc weight (H, Cp)
            pl.BlockSpec((1, Cp), lambda i: (0, 0)),          # fc bias
        ],
        out_specs=pl.BlockSpec((Bp, Cp), lambda i: (0, 0)),
        scratch_shapes=[
            pltpu.VMEM((T * Bp, 4 * H), jnp.float32),  # precomputed x-gates, layer 0
        ],
    )

    out = pl.pallas_call(
        _lstm_kernel,
        out_shape=jax.ShapeDtypeStruct((Bp, Cp), jnp.float32),
        grid_spec=grid_spec,
        compiler_params=pltpu.CompilerParams(
            dimension_semantics=("arbitrary",)),  # recurrence is sequential
    )(x2d, w1, b1, u1, w2u2, b2, wf, bf)
    return out[:B, :C]


def init_params(key):
    """PyTorch-style params: U(-1/sqrt(H), 1/sqrt(H)), gate row order (i, f, g, o)."""
    H, D, C = HIDDEN, INPUT_SIZE, NUM_CLASSES
    k = 1.0 / jnp.sqrt(jnp.float32(H))
    ks = jax.random.split(key, 12)
    u = lambda kk, shape: jax.random.uniform(kk, shape, jnp.float32, -k, k)

    w_ih0 = u(ks[0], (4 * H, D))
    w_hh0 = u(ks[1], (4 * H, H))
    b_ih0 = u(ks[2], (4 * H,))
    b_hh0 = u(ks[3], (4 * H,))
    w_ih1 = u(ks[4], (4 * H, H))
    w_hh1 = u(ks[5], (4 * H, H))
    b_ih1 = u(ks[6], (4 * H,))
    b_hh1 = u(ks[7], (4 * H,))
    w_fc = jax.random.uniform(ks[8], (C, H), jnp.float32, -k, k)
    b_fc = jax.random.uniform(ks[9], (C,), jnp.float32, -k, k)
    return (w_ih0, w_hh0, b_ih0, b_hh0, w_ih1, w_hh1, b_ih1, b_hh1, w_fc, b_fc)


def _reorder_gates(w):
    """Rows/entries (i, f, g, o) -> kernel order (i, f, o, g) along axis 0."""
    H = w.shape[0] // 4
    return jnp.concatenate([w[:2 * H], w[3 * H:4 * H], w[2 * H:3 * H]], axis=0)


def prepare_kernel_params(p):
    """Pre-transpose to (in, out), reorder gate columns, sum biases, fuse W2|U2,
    and zero-pad the classifier to a 128-lane-dense output."""
    (w_ih0, w_hh0, b_ih0, b_hh0, w_ih1, w_hh1, b_ih1, b_hh1, w_fc, b_fc) = p
    H = HIDDEN
    C = w_fc.shape[0]
    Cp = ((C + 127) // 128) * 128
    w1 = _reorder_gates(w_ih0).T                               # (D, 4H)
    u1 = _reorder_gates(w_hh0).T                               # (H, 4H)
    b1 = _reorder_gates(b_ih0 + b_hh0).reshape(1, 4 * H)
    w2u2 = jnp.concatenate([_reorder_gates(w_ih1).T,
                            _reorder_gates(w_hh1).T], axis=0)  # (2H, 4H)
    b2 = _reorder_gates(b_ih1 + b_hh1).reshape(1, 4 * H)
    wf = jnp.pad(w_fc.T, ((0, 0), (0, Cp - C)))                # (H, Cp) lane-padded
    bf = jnp.pad(b_fc.reshape(1, -1), ((0, 0), (0, Cp - C)))   # (1, Cp)
    return (w1, b1, u1, w2u2, b2, wf, bf)


def reference_forward(x, p):
    """Pure-JAX reference with exact torch nn.LSTM + Linear semantics."""
    (w_ih0, w_hh0, b_ih0, b_hh0, w_ih1, w_hh1, b_ih1, b_hh1, w_fc, b_fc) = p
    B, T, D = x.shape
    H = HIDDEN

    def cell(x_t, h, c, w_ih, w_hh, b_ih, b_hh):
        g = x_t @ w_ih.T + h @ w_hh.T + b_ih + b_hh
        i = jax.nn.sigmoid(g[:, 0 * H:1 * H])
        f = jax.nn.sigmoid(g[:, 1 * H:2 * H])
        gg = jnp.tanh(g[:, 2 * H:3 * H])
        o = jax.nn.sigmoid(g[:, 3 * H:4 * H])
        c_new = f * c + i * gg
        h_new = o * jnp.tanh(c_new)
        return h_new, c_new

    h1 = c1 = h2 = c2 = jnp.zeros((B, H), jnp.float32)
    for t in range(T):
        x_t = x[:, t, :]
        h1, c1 = cell(x_t, h1, c1, w_ih0, w_hh0, b_ih0, b_hh0)
        h2, c2 = cell(h1, h2, c2, w_ih1, w_hh1, b_ih1, b_hh1)
    return h2 @ w_fc.T + b_fc


if __name__ == "__main__":
    key = jax.random.PRNGKey(0)
    k_param, k_x = jax.random.split(key)
    torch_params = init_params(k_param)
    kparams = prepare_kernel_params(torch_params)

    B, T = 2, 8
    x = jax.random.normal(k_x, (B, T, INPUT_SIZE), jnp.float32)

    out = jax.block_until_ready(lstm_forward(x, kparams))
    ref = reference_forward(x, torch_params)

    assert out.shape == (B, NUM_CLASSES)
    assert jnp.allclose(out, ref, rtol=1e-4, atol=1e-4), "mismatch vs reference"
    print("KERNEL_OK")
</pallas_src>

<mosaic_0001>
module attributes {stable_mosaic.version = 11 : i64} {
  func.func @_lstm_kernel(%arg0: i32, %arg1: memref<64x64xf32, #tpu.memory_space<vmem>>, %arg2: memref<64x512xf32, #tpu.memory_space<vmem>>, %arg3: memref<1x512xf32, #tpu.memory_space<vmem>>, %arg4: memref<128x512xf32, #tpu.memory_space<vmem>>, %arg5: memref<256x512xf32, #tpu.memory_space<vmem>>, %arg6: memref<1x512xf32, #tpu.memory_space<vmem>>, %arg7: memref<128x128xf32, #tpu.memory_space<vmem>>, %arg8: memref<1x128xf32, #tpu.memory_space<vmem>>, %arg9: memref<8x128xf32, #tpu.memory_space<vmem>>, %arg10: memref<64x512xf32, #tpu.memory_space<vmem>>) attributes {dimension_semantics = [#tpu.dimension_semantics<arbitrary>], iteration_bounds = array<i64: 1>, scalar_prefetch = 0 : i64, scratch_operands = 1 : i64, tpu.core_type = #tpu.core_type<tc>, window_params = [{pipeline_mode = #tpu.pipeline_mode<synchronous>, transform_indices = @transform_0, window_bounds = array<i64: 64, 64>}, {pipeline_mode = #tpu.pipeline_mode<synchronous>, transform_indices = @transform_1, window_bounds = array<i64: 64, 512>}, {pipeline_mode = #tpu.pipeline_mode<synchronous>, transform_indices = @transform_2, window_bounds = array<i64: 1, 512>}, {pipeline_mode = #tpu.pipeline_mode<synchronous>, transform_indices = @transform_3, window_bounds = array<i64: 128, 512>}, {pipeline_mode = #tpu.pipeline_mode<synchronous>, transform_indices = @transform_4, window_bounds = array<i64: 256, 512>}, {pipeline_mode = #tpu.pipeline_mode<synchronous>, transform_indices = @transform_5, window_bounds = array<i64: 1, 512>}, {pipeline_mode = #tpu.pipeline_mode<synchronous>, transform_indices = @transform_6, window_bounds = array<i64: 128, 128>}, {pipeline_mode = #tpu.pipeline_mode<synchronous>, transform_indices = @transform_7, window_bounds = array<i64: 1, 128>}, {pipeline_mode = #tpu.pipeline_mode<synchronous>, transform_indices = @transform_8, window_bounds = array<i64: 8, 128>}]} {
    %c0 = arith.constant 0 : index
    %c0_0 = arith.constant 0 : index
    %0 = vector.load %arg1[%c0, %c0_0] : memref<64x64xf32, #tpu.memory_space<vmem>>, vector<64x64xf32>
    %c0_1 = arith.constant 0 : index
    %c0_2 = arith.constant 0 : index
    %1 = vector.load %arg2[%c0_1, %c0_2] : memref<64x512xf32, #tpu.memory_space<vmem>>, vector<64x512xf32>
    %cst = arith.constant dense<0.000000e+00> : vector<64x512xf32>
    %2 = tpu.matmul %0, %1, %cst {dimension_numbers = #tpu.dot_dimension_numbers<[1], [0], [0], [1], [0, 0, 1, 1], [], []>} : vector<64x64xf32>, vector<64x512xf32>, vector<64x512xf32> -> vector<64x512xf32>
    %c0_3 = arith.constant 0 : index
    %c0_4 = arith.constant 0 : index
    %3 = vector.load %arg3[%c0_3, %c0_4] : memref<1x512xf32, #tpu.memory_space<vmem>>, vector<1x512xf32>
    %4 = vector.broadcast %3 : vector<1x512xf32> to vector<64x512xf32>
    %5 = arith.addf %2, %4 : vector<64x512xf32>
    %c0_5 = arith.constant 0 : index
    %c0_6 = arith.constant 0 : index
    %6 = vector.load %arg10[%c0_5, %c0_6] : memref<64x512xf32, #tpu.memory_space<vmem>>, vector<64x512xf32>
    tpu.vector_store %arg10[%c0_5, %c0_6], %5 {strides = array<i32>} : memref<64x512xf32, #tpu.memory_space<vmem>>, vector<64x512xf32>,
    %cst_7 = arith.constant 0.000000e+00 : f32
    %7 = vector.broadcast %cst_7 : f32 to vector<8x128xf32>
    %c0_i32 = arith.constant 0 : i32
    %c8_i32 = arith.constant 8 : i32
    %8 = arith.muli %c0_i32, %c8_i32 : i32
    %9 = tpu.assume_multiple %8, 8 : i32
    %10 = arith.index_cast %9 : i32 to index
    %c0_8 = arith.constant 0 : index
    %11 = vector.load %arg10[%10, %c0_8] : memref<64x512xf32, #tpu.memory_space<vmem>>, vector<8x512xf32>
    %c0_9 = arith.constant 0 : index
    %c0_10 = arith.constant 0 : index
    %12 = vector.load %arg4[%c0_9, %c0_10] : memref<128x512xf32, #tpu.memory_space<vmem>>, vector<128x512xf32>
    %cst_11 = arith.constant dense<0.000000e+00> : vector<8x512xf32>
    %13 = tpu.matmul %7, %12, %cst_11 {dimension_numbers = #tpu.dot_dimension_numbers<[1], [0], [0], [1], [0, 0, 1, 1], [], []>} : vector<8x128xf32>, vector<128x512xf32>, vector<8x512xf32> -> vector<8x512xf32>
    %14 = arith.addf %11, %13 : vector<8x512xf32>
    %15 = vector.extract_strided_slice %14 {offsets = [0, 0], sizes = [8, 384], strides = [1, 1]} : vector<8x512xf32> to vector<8x384xf32>
    %16 = arith.negf %15 : vector<8x384xf32>
    %17 = math.exp %16 : vector<8x384xf32>
    %cst_12 = arith.constant 1.000000e+00 : f32
    %18 = vector.broadcast %cst_12 : f32 to vector<8x384xf32>
    %19 = arith.addf %18, %17 : vector<8x384xf32>
    %20 = arith.divf %18, %19 : vector<8x384xf32>
    %21 = vector.extract_strided_slice %20 {offsets = [0, 0], sizes = [8, 128], strides = [1, 1]} : vector<8x384xf32> to vector<8x128xf32>
    %22 = vector.extract_strided_slice %20 {offsets = [0, 128], sizes = [8, 128], strides = [1, 1]} : vector<8x384xf32> to vector<8x128xf32>
    %23 = vector.extract_strided_slice %20 {offsets = [0, 256], sizes = [8, 128], strides = [1, 1]} : vector<8x384xf32> to vector<8x128xf32>
    %24 = vector.extract_strided_slice %14 {offsets = [0, 384], sizes = [8, 128], strides = [1, 1]} : vector<8x512xf32> to vector<8x128xf32>
    %25 = math.tanh %24 : vector<8x128xf32>
    %26 = arith.mulf %22, %7 : vector<8x128xf32>
    %27 = arith.mulf %21, %25 : vector<8x128xf32>
    %28 = arith.addf %26, %27 : vector<8x128xf32>
    %29 = math.tanh %28 : vector<8x128xf32>
    %30 = arith.mulf %23, %29 : vector<8x128xf32>
    %31 = tpu.concatenate %30, %7 in 1 : vector<8x128xf32>, vector<8x128xf32> -> vector<8x256xf32>
    %c0_13 = arith.constant 0 : index
    %c0_14 = arith.constant 0 : index
    %32 = vector.load %arg5[%c0_13, %c0_14] : memref<256x512xf32, #tpu.memory_space<vmem>>, vector<256x512xf32>
    %cst_15 = arith.constant dense<0.000000e+00> : vector<8x512xf32>
    %33 = tpu.matmul %31, %32, %cst_15 {dimension_numbers = #tpu.dot_dimension_numbers<[1], [0], [0], [1], [0, 0, 1, 1], [], []>} : vector<8x256xf32>, vector<256x512xf32>, vector<8x512xf32> -> vector<8x512xf32>
    %c0_16 = arith.constant 0 : index
    %c0_17 = arith.constant 0 : index
    %34 = vector.load %arg6[%c0_16, %c0_17] : memref<1x512xf32, #tpu.memory_space<vmem>>, vector<1x512xf32>
    %35 = vector.broadcast %34 : vector<1x512xf32> to vector<8x512xf32>
    %36 = arith.addf %33, %35 : vector<8x512xf32>
    %37 = vector.extract_strided_slice %36 {offsets = [0, 0], sizes = [8, 384], strides = [1, 1]} : vector<8x512xf32> to vector<8x384xf32>
    %38 = arith.negf %37 : vector<8x384xf32>
    %39 = math.exp %38 : vector<8x384xf32>
    %cst_18 = arith.constant 1.000000e+00 : f32
    %40 = vector.broadcast %cst_18 : f32 to vector<8x384xf32>
    %41 = arith.addf %40, %39 : vector<8x384xf32>
    %42 = arith.divf %40, %41 : vector<8x384xf32>
    %43 = vector.extract_strided_slice %42 {offsets = [0, 0], sizes = [8, 128], strides = [1, 1]} : vector<8x384xf32> to vector<8x128xf32>
    %44 = vector.extract_strided_slice %42 {offsets = [0, 128], sizes = [8, 128], strides = [1, 1]} : vector<8x384xf32> to vector<8x128xf32>
    %45 = vector.extract_strided_slice %42 {offsets = [0, 256], sizes = [8, 128], strides = [1, 1]} : vector<8x384xf32> to vector<8x128xf32>
    %46 = vector.extract_strided_slice %36 {offsets = [0, 384], sizes = [8, 128], strides = [1, 1]} : vector<8x512xf32> to vector<8x128xf32>
    %47 = math.tanh %46 : vector<8x128xf32>
    %48 = arith.mulf %44, %7 : vector<8x128xf32>
    %49 = arith.mulf %43, %47 : vector<8x128xf32>
    %50 = arith.addf %48, %49 : vector<8x128xf32>
    %51 = math.tanh %50 : vector<8x128xf32>
    %52 = arith.mulf %45, %51 : vector<8x128xf32>
    %c1_i32 = arith.constant 1 : i32
    %c8_i32_19 = arith.constant 8 : i32
    %53 = arith.muli %c1_i32, %c8_i32_19 : i32
    %54 = tpu.assume_multiple %53, 8 : i32
    %55 = arith.index_cast %54 : i32 to index
    %c0_20 = arith.constant 0 : index
    %56 = vector.load %arg10[%55, %c0_20] : memref<64x512xf32, #tpu.memory_space<vmem>>, vector<8x512xf32>
    %c0_21 = arith.constant 0 : index
    %c0_22 = arith.constant 0 : index
    %57 = vector.load %arg4[%c0_21, %c0_22] : memref<128x512xf32, #tpu.memory_space<vmem>>, vector<128x512xf32>
    %cst_23 = arith.constant dense<0.000000e+00> : vector<8x512xf32>
    %58 = tpu.matmul %30, %57, %cst_23 {dimension_numbers = #tpu.dot_dimension_numbers<[1], [0], [0], [1], [0, 0, 1, 1], [], []>} : vector<8x128xf32>, vector<128x512xf32>, vector<8x512xf32> -> vector<8x512xf32>
    %59 = arith.addf %56, %58 : vector<8x512xf32>
    %60 = vector.extract_strided_slice %59 {offsets = [0, 0], sizes = [8, 384], strides = [1, 1]} : vector<8x512xf32> to vector<8x384xf32>
    %61 = arith.negf %60 : vector<8x384xf32>
    %62 = math.exp %61 : vector<8x384xf32>
    %cst_24 = arith.constant 1.000000e+00 : f32
    %63 = vector.broadcast %cst_24 : f32 to vector<8x384xf32>
    %64 = arith.addf %63, %62 : vector<8x384xf32>
    %65 = arith.divf %63, %64 : vector<8x384xf32>
    %66 = vector.extract_strided_slice %65 {offsets = [0, 0], sizes = [8, 128], strides = [1, 1]} : vector<8x384xf32> to vector<8x128xf32>
    %67 = vector.extract_strided_slice %65 {offsets = [0, 128], sizes = [8, 128], strides = [1, 1]} : vector<8x384xf32> to vector<8x128xf32>
    %68 = vector.extract_strided_slice %65 {offsets = [0, 256], sizes = [8, 128], strides = [1, 1]} : vector<8x384xf32> to vector<8x128xf32>
    %69 = vector.extract_strided_slice %59 {offsets = [0, 384], sizes = [8, 128], strides = [1, 1]} : vector<8x512xf32> to vector<8x128xf32>
    %70 = math.tanh %69 : vector<8x128xf32>
    %71 = arith.mulf %67, %28 : vector<8x128xf32>
    %72 = arith.mulf %66, %70 : vector<8x128xf32>
    %73 = arith.addf %71, %72 : vector<8x128xf32>
    %74 = math.tanh %73 : vector<8x128xf32>
    %75 = arith.mulf %68, %74 : vector<8x128xf32>
    %76 = tpu.concatenate %75, %52 in 1 : vector<8x128xf32>, vector<8x128xf32> -> vector<8x256xf32>
    %c0_25 = arith.constant 0 : index
    %c0_26 = arith.constant 0 : index
    %77 = vector.load %arg5[%c0_25, %c0_26] : memref<256x512xf32, #tpu.memory_space<vmem>>, vector<256x512xf32>
    %cst_27 = arith.constant dense<0.000000e+00> : vector<8x512xf32>
    %78 = tpu.matmul %76, %77, %cst_27 {dimension_numbers = #tpu.dot_dimension_numbers<[1], [0], [0], [1], [0, 0, 1, 1], [], []>} : vector<8x256xf32>, vector<256x512xf32>, vector<8x512xf32> -> vector<8x512xf32>
    %c0_28 = arith.constant 0 : index
    %c0_29 = arith.constant 0 : index
    %79 = vector.load %arg6[%c0_28, %c0_29] : memref<1x512xf32, #tpu.memory_space<vmem>>, vector<1x512xf32>
    %80 = vector.broadcast %79 : vector<1x512xf32> to vector<8x512xf32>
    %81 = arith.addf %78, %80 : vector<8x512xf32>
    %82 = vector.extract_strided_slice %81 {offsets = [0, 0], sizes = [8, 384], strides = [1, 1]} : vector<8x512xf32> to vector<8x384xf32>
    %83 = arith.negf %82 : vector<8x384xf32>
    %84 = math.exp %83 : vector<8x384xf32>
    %cst_30 = arith.constant 1.000000e+00 : f32
    %85 = vector.broadcast %cst_30 : f32 to vector<8x384xf32>
    %86 = arith.addf %85, %84 : vector<8x384xf32>
    %87 = arith.divf %85, %86 : vector<8x384xf32>
    %88 = vector.extract_strided_slice %87 {offsets = [0, 0], sizes = [8, 128], strides = [1, 1]} : vector<8x384xf32> to vector<8x128xf32>
    %89 = vector.extract_strided_slice %87 {offsets = [0, 128], sizes = [8, 128], strides = [1, 1]} : vector<8x384xf32> to vector<8x128xf32>
    %90 = vector.extract_strided_slice %87 {offsets = [0, 256], sizes = [8, 128], strides = [1, 1]} : vector<8x384xf32> to vector<8x128xf32>
    %91 = vector.extract_strided_slice %81 {offsets = [0, 384], sizes = [8, 128], strides = [1, 1]} : vector<8x512xf32> to vector<8x128xf32>
    %92 = math.tanh %91 : vector<8x128xf32>
    %93 = arith.mulf %89, %50 : vector<8x128xf32>
    %94 = arith.mulf %88, %92 : vector<8x128xf32>
    %95 = arith.addf %93, %94 : vector<8x128xf32>
    %96 = math.tanh %95 : vector<8x128xf32>
    %97 = arith.mulf %90, %96 : vector<8x128xf32>
    %c2_i32 = arith.constant 2 : i32
    %c8_i32_31 = arith.constant 8 : i32
    %98 = arith.muli %c2_i32, %c8_i32_31 : i32
    %99 = tpu.assume_multiple %98, 8 : i32
    %100 = arith.index_cast %99 : i32 to index
    %c0_32 = arith.constant 0 : index
    %101 = vector.load %arg10[%100, %c0_32] : memref<64x512xf32, #tpu.memory_space<vmem>>, vector<8x512xf32>
    %c0_33 = arith.constant 0 : index
    %c0_34 = arith.constant 0 : index
    %102 = vector.load %arg4[%c0_33, %c0_34] : memref<128x512xf32, #tpu.memory_space<vmem>>, vector<128x512xf32>
    %cst_35 = arith.constant dense<0.000000e+00> : vector<8x512xf32>
    %103 = tpu.matmul %75, %102, %cst_35 {dimension_numbers = #tpu.dot_dimension_numbers<[1], [0], [0], [1], [0, 0, 1, 1], [], []>} : vector<8x128xf32>, vector<128x512xf32>, vector<8x512xf32> -> vector<8x512xf32>
    %104 = arith.addf %101, %103 : vector<8x512xf32>
    %105 = vector.extract_strided_slice %104 {offsets = [0, 0], sizes = [8, 384], strides = [1, 1]} : vector<8x512xf32> to vector<8x384xf32>
    %106 = arith.negf %105 : vector<8x384xf32>
    %107 = math.exp %106 : vector<8x384xf32>
    %cst_36 = arith.constant 1.000000e+00 : f32
    %108 = vector.broadcast %cst_36 : f32 to vector<8x384xf32>
    %109 = arith.addf %108, %107 : vector<8x384xf32>
    %110 = arith.divf %108, %109 : vector<8x384xf32>
    %111 = vector.extract_strided_slice %110 {offsets = [0, 0], sizes = [8, 128], strides = [1, 1]} : vector<8x384xf32> to vector<8x128xf32>
    %112 = vector.extract_strided_slice %110 {offsets = [0, 128], sizes = [8, 128], strides = [1, 1]} : vector<8x384xf32> to vector<8x128xf32>
    %113 = vector.extract_strided_slice %110 {offsets = [0, 256], sizes = [8, 128], strides = [1, 1]} : vector<8x384xf32> to vector<8x128xf32>
    %114 = vector.extract_strided_slice %104 {offsets = [0, 384], sizes = [8, 128], strides = [1, 1]} : vector<8x512xf32> to vector<8x128xf32>
    %115 = math.tanh %114 : vector<8x128xf32>
    %116 = arith.mulf %112, %73 : vector<8x128xf32>
    %117 = arith.mulf %111, %115 : vector<8x128xf32>
    %118 = arith.addf %116, %117 : vector<8x128xf32>
    %119 = math.tanh %118 : vector<8x128xf32>
    %120 = arith.mulf %113, %119 : vector<8x128xf32>
    %121 = tpu.concatenate %120, %97 in 1 : vector<8x128xf32>, vector<8x128xf32> -> vector<8x256xf32>
    %c0_37 = arith.constant 0 : index
    %c0_38 = arith.constant 0 : index
    %122 = vector.load %arg5[%c0_37, %c0_38] : memref<256x512xf32, #tpu.memory_space<vmem>>, vector<256x512xf32>
    %cst_39 = arith.constant dense<0.000000e+00> : vector<8x512xf32>
    %123 = tpu.matmul %121, %122, %cst_39 {dimension_numbers = #tpu.dot_dimension_numbers<[1], [0], [0], [1], [0, 0, 1, 1], [], []>} : vector<8x256xf32>, vector<256x512xf32>, vector<8x512xf32> -> vector<8x512xf32>
    %c0_40 = arith.constant 0 : index
    %c0_41 = arith.constant 0 : index
    %124 = vector.load %arg6[%c0_40, %c0_41] : memref<1x512xf32, #tpu.memory_space<vmem>>, vector<1x512xf32>
    %125 = vector.broadcast %124 : vector<1x512xf32> to vector<8x512xf32>
    %126 = arith.addf %123, %125 : vector<8x512xf32>
    %127 = vector.extract_strided_slice %126 {offsets = [0, 0], sizes = [8, 384], strides = [1, 1]} : vector<8x512xf32> to vector<8x384xf32>
    %128 = arith.negf %127 : vector<8x384xf32>
    %129 = math.exp %128 : vector<8x384xf32>
    %cst_42 = arith.constant 1.000000e+00 : f32
    %130 = vector.broadcast %cst_42 : f32 to vector<8x384xf32>
    %131 = arith.addf %130, %129 : vector<8x384xf32>
    %132 = arith.divf %130, %131 : vector<8x384xf32>
    %133 = vector.extract_strided_slice %132 {offsets = [0, 0], sizes = [8, 128], strides = [1, 1]} : vector<8x384xf32> to vector<8x128xf32>
    %134 = vector.extract_strided_slice %132 {offsets = [0, 128], sizes = [8, 128], strides = [1, 1]} : vector<8x384xf32> to vector<8x128xf32>
    %135 = vector.extract_strided_slice %132 {offsets = [0, 256], sizes = [8, 128], strides = [1, 1]} : vector<8x384xf32> to vector<8x128xf32>
    %136 = vector.extract_strided_slice %126 {offsets = [0, 384], sizes = [8, 128], strides = [1, 1]} : vector<8x512xf32> to vector<8x128xf32>
    %137 = math.tanh %136 : vector<8x128xf32>
    %138 = arith.mulf %134, %95 : vector<8x128xf32>
    %139 = arith.mulf %133, %137 : vector<8x128xf32>
    %140 = arith.addf %138, %139 : vector<8x128xf32>
    %141 = math.tanh %140 : vector<8x128xf32>
    %142 = arith.mulf %135, %141 : vector<8x128xf32>
    %c3_i32 = arith.constant 3 : i32
    %c8_i32_43 = arith.constant 8 : i32
    %143 = arith.muli %c3_i32, %c8_i32_43 : i32
    %144 = tpu.assume_multiple %143, 8 : i32
    %145 = arith.index_cast %144 : i32 to index
    %c0_44 = arith.constant 0 : index
    %146 = vector.load %arg10[%145, %c0_44] : memref<64x512xf32, #tpu.memory_space<vmem>>, vector<8x512xf32>
    %c0_45 = arith.constant 0 : index
    %c0_46 = arith.constant 0 : index
    %147 = vector.load %arg4[%c0_45, %c0_46] : memref<128x512xf32, #tpu.memory_space<vmem>>, vector<128x512xf32>
    %cst_47 = arith.constant dense<0.000000e+00> : vector<8x512xf32>
    %148 = tpu.matmul %120, %147, %cst_47 {dimension_numbers = #tpu.dot_dimension_numbers<[1], [0], [0], [1], [0, 0, 1, 1], [], []>} : vector<8x128xf32>, vector<128x512xf32>, vector<8x512xf32> -> vector<8x512xf32>
    %149 = arith.addf %146, %148 : vector<8x512xf32>
    %150 = vector.extract_strided_slice %149 {offsets = [0, 0], sizes = [8, 384], strides = [1, 1]} : vector<8x512xf32> to vector<8x384xf32>
    %151 = arith.negf %150 : vector<8x384xf32>
    %152 = math.exp %151 : vector<8x384xf32>
    %cst_48 = arith.constant 1.000000e+00 : f32
    %153 = vector.broadcast %cst_48 : f32 to vector<8x384xf32>
    %154 = arith.addf %153, %152 : vector<8x384xf32>
    %155 = arith.divf %153, %154 : vector<8x384xf32>
    %156 = vector.extract_strided_slice %155 {offsets = [0, 0], sizes = [8, 128], strides = [1, 1]} : vector<8x384xf32> to vector<8x128xf32>
    %157 = vector.extract_strided_slice %155 {offsets = [0, 128], sizes = [8, 128], strides = [1, 1]} : vector<8x384xf32> to vector<8x128xf32>
    %158 = vector.extract_strided_slice %155 {offsets = [0, 256], sizes = [8, 128], strides = [1, 1]} : vector<8x384xf32> to vector<8x128xf32>
    %159 = vector.extract_strided_slice %149 {offsets = [0, 384], sizes = [8, 128], strides = [1, 1]} : vector<8x512xf32> to vector<8x128xf32>
    %160 = math.tanh %159 : vector<8x128xf32>
    %161 = arith.mulf %157, %118 : vector<8x128xf32>
    %162 = arith.mulf %156, %160 : vector<8x128xf32>
    %163 = arith.addf %161, %162 : vector<8x128xf32>
    %164 = math.tanh %163 : vector<8x128xf32>
    %165 = arith.mulf %158, %164 : vector<8x128xf32>
    %166 = tpu.concatenate %165, %142 in 1 : vector<8x128xf32>, vector<8x128xf32> -> vector<8x256xf32>
    %c0_49 = arith.constant 0 : index
    %c0_50 = arith.constant 0 : index
    %167 = vector.load %arg5[%c0_49, %c0_50] : memref<256x512xf32, #tpu.memory_space<vmem>>, vector<256x512xf32>
    %cst_51 = arith.constant dense<0.000000e+00> : vector<8x512xf32>
    %168 = tpu.matmul %166, %167, %cst_51 {dimension_numbers = #tpu.dot_dimension_numbers<[1], [0], [0], [1], [0, 0, 1, 1], [], []>} : vector<8x256xf32>, vector<256x512xf32>, vector<8x512xf32> -> vector<8x512xf32>
    %c0_52 = arith.constant 0 : index
    %c0_53 = arith.constant 0 : index
    %169 = vector.load %arg6[%c0_52, %c0_53] : memref<1x512xf32, #tpu.memory_space<vmem>>, vector<1x512xf32>
    %170 = vector.broadcast %169 : vector<1x512xf32> to vector<8x512xf32>
    %171 = arith.addf %168, %170 : vector<8x512xf32>
    %172 = vector.extract_strided_slice %171 {offsets = [0, 0], sizes = [8, 384], strides = [1, 1]} : vector<8x512xf32> to vector<8x384xf32>
    %173 = arith.negf %172 : vector<8x384xf32>
    %174 = math.exp %173 : vector<8x384xf32>
    %cst_54 = arith.constant 1.000000e+00 : f32
    %175 = vector.broadcast %cst_54 : f32 to vector<8x384xf32>
    %176 = arith.addf %175, %174 : vector<8x384xf32>
    %177 = arith.divf %175, %176 : vector<8x384xf32>
    %178 = vector.extract_strided_slice %177 {offsets = [0, 0], sizes = [8, 128], strides = [1, 1]} : vector<8x384xf32> to vector<8x128xf32>
    %179 = vector.extract_strided_slice %177 {offsets = [0, 128], sizes = [8, 128], strides = [1, 1]} : vector<8x384xf32> to vector<8x128xf32>
    %180 = vector.extract_strided_slice %177 {offsets = [0, 256], sizes = [8, 128], strides = [1, 1]} : vector<8x384xf32> to vector<8x128xf32>
    %181 = vector.extract_strided_slice %171 {offsets = [0, 384], sizes = [8, 128], strides = [1, 1]} : vector<8x512xf32> to vector<8x128xf32>
    %182 = math.tanh %181 : vector<8x128xf32>
    %183 = arith.mulf %179, %140 : vector<8x128xf32>
    %184 = arith.mulf %178, %182 : vector<8x128xf32>
    %185 = arith.addf %183, %184 : vector<8x128xf32>
    %186 = math.tanh %185 : vector<8x128xf32>
    %187 = arith.mulf %180, %186 : vector<8x128xf32>
    %c4_i32 = arith.constant 4 : i32
    %c8_i32_55 = arith.constant 8 : i32
    %188 = arith.muli %c4_i32, %c8_i32_55 : i32
    %189 = tpu.assume_multiple %188, 8 : i32
    %190 = arith.index_cast %189 : i32 to index
    %c0_56 = arith.constant 0 : index
    %191 = vector.load %arg10[%190, %c0_56] : memref<64x512xf32, #tpu.memory_space<vmem>>, vector<8x512xf32>
    %c0_57 = arith.constant 0 : index
    %c0_58 = arith.constant 0 : index
    %192 = vector.load %arg4[%c0_57, %c0_58] : memref<128x512xf32, #tpu.memory_space<vmem>>, vector<128x512xf32>
    %cst_59 = arith.constant dense<0.000000e+00> : vector<8x512xf32>
    %193 = tpu.matmul %165, %192, %cst_59 {dimension_numbers = #tpu.dot_dimension_numbers<[1], [0], [0], [1], [0, 0, 1, 1], [], []>} : vector<8x128xf32>, vector<128x512xf32>, vector<8x512xf32> -> vector<8x512xf32>
    %194 = arith.addf %191, %193 : vector<8x512xf32>
    %195 = vector.extract_strided_slice %194 {offsets = [0, 0], sizes = [8, 384], strides = [1, 1]} : vector<8x512xf32> to vector<8x384xf32>
    %196 = arith.negf %195 : vector<8x384xf32>
    %197 = math.exp %196 : vector<8x384xf32>
    %cst_60 = arith.constant 1.000000e+00 : f32
    %198 = vector.broadcast %cst_60 : f32 to vector<8x384xf32>
    %199 = arith.addf %198, %197 : vector<8x384xf32>
    %200 = arith.divf %198, %199 : vector<8x384xf32>
    %201 = vector.extract_strided_slice %200 {offsets = [0, 0], sizes = [8, 128], strides = [1, 1]} : vector<8x384xf32> to vector<8x128xf32>
    %202 = vector.extract_strided_slice %200 {offsets = [0, 128], sizes = [8, 128], strides = [1, 1]} : vector<8x384xf32> to vector<8x128xf32>
    %203 = vector.extract_strided_slice %200 {offsets = [0, 256], sizes = [8, 128], strides = [1, 1]} : vector<8x384xf32> to vector<8x128xf32>
    %204 = vector.extract_strided_slice %194 {offsets = [0, 384], sizes = [8, 128], strides = [1, 1]} : vector<8x512xf32> to vector<8x128xf32>
    %205 = math.tanh %204 : vector<8x128xf32>
    %206 = arith.mulf %202, %163 : vector<8x128xf32>
    %207 = arith.mulf %201, %205 : vector<8x128xf32>
    %208 = arith.addf %206, %207 : vector<8x128xf32>
    %209 = math.tanh %208 : vector<8x128xf32>
    %210 = arith.mulf %203, %209 : vector<8x128xf32>
    %211 = tpu.concatenate %210, %187 in 1 : vector<8x128xf32>, vector<8x128xf32> -> vector<8x256xf32>
    %c0_61 = arith.constant 0 : index
    %c0_62 = arith.constant 0 : index
    %212 = vector.load %arg5[%c0_61, %c0_62] : memref<256x512xf32, #tpu.memory_space<vmem>>, vector<256x512xf32>
    %cst_63 = arith.constant dense<0.000000e+00> : vector<8x512xf32>
    %213 = tpu.matmul %211, %212, %cst_63 {dimension_numbers = #tpu.dot_dimension_numbers<[1], [0], [0], [1], [0, 0, 1, 1], [], []>} : vector<8x256xf32>, vector<256x512xf32>, vector<8x512xf32> -> vector<8x512xf32>
    %c0_64 = arith.constant 0 : index
    %c0_65 = arith.constant 0 : index
    %214 = vector.load %arg6[%c0_64, %c0_65] : memref<1x512xf32, #tpu.memory_space<vmem>>, vector<1x512xf32>
    %215 = vector.broadcast %214 : vector<1x512xf32> to vector<8x512xf32>
    %216 = arith.addf %213, %215 : vector<8x512xf32>
    %217 = vector.extract_strided_slice %216 {offsets = [0, 0], sizes = [8, 384], strides = [1, 1]} : vector<8x512xf32> to vector<8x384xf32>
    %218 = arith.negf %217 : vector<8x384xf32>
    %219 = math.exp %218 : vector<8x384xf32>
    %cst_66 = arith.constant 1.000000e+00 : f32
    %220 = vector.broadcast %cst_66 : f32 to vector<8x384xf32>
    %221 = arith.addf %220, %219 : vector<8x384xf32>
    %222 = arith.divf %220, %221 : vector<8x384xf32>
    %223 = vector.extract_strided_slice %222 {offsets = [0, 0], sizes = [8, 128], strides = [1, 1]} : vector<8x384xf32> to vector<8x128xf32>
    %224 = vector.extract_strided_slice %222 {offsets = [0, 128], sizes = [8, 128], strides = [1, 1]} : vector<8x384xf32> to vector<8x128xf32>
    %225 = vector.extract_strided_slice %222 {offsets = [0, 256], sizes = [8, 128], strides = [1, 1]} : vector<8x384xf32> to vector<8x128xf32>
    %226 = vector.extract_strided_slice %216 {offsets = [0, 384], sizes = [8, 128], strides = [1, 1]} : vector<8x512xf32> to vector<8x128xf32>
    %227 = math.tanh %226 : vector<8x128xf32>
    %228 = arith.mulf %224, %185 : vector<8x128xf32>
    %229 = arith.mulf %223, %227 : vector<8x128xf32>
    %230 = arith.addf %228, %229 : vector<8x128xf32>
    %231 = math.tanh %230 : vector<8x128xf32>
    %232 = arith.mulf %225, %231 : vector<8x128xf32>
    %c5_i32 = arith.constant 5 : i32
    %c8_i32_67 = arith.constant 8 : i32
    %233 = arith.muli %c5_i32, %c8_i32_67 : i32
    %234 = tpu.assume_multiple %233, 8 : i32
    %235 = arith.index_cast %234 : i32 to index
    %c0_68 = arith.constant 0 : index
    %236 = vector.load %arg10[%235, %c0_68] : memref<64x512xf32, #tpu.memory_space<vmem>>, vector<8x512xf32>
    %c0_69 = arith.constant 0 : index
    %c0_70 = arith.constant 0 : index
    %237 = vector.load %arg4[%c0_69, %c0_70] : memref<128x512xf32, #tpu.memory_space<vmem>>, vector<128x512xf32>
    %cst_71 = arith.constant dense<0.000000e+00> : vector<8x512xf32>
    %238 = tpu.matmul %210, %237, %cst_71 {dimension_numbers = #tpu.dot_dimension_numbers<[1], [0], [0], [1], [0, 0, 1, 1], [], []>} : vector<8x128xf32>, vector<128x512xf32>, vector<8x512xf32> -> vector<8x512xf32>
    %239 = arith.addf %236, %238 : vector<8x512xf32>
    %240 = vector.extract_strided_slice %239 {offsets = [0, 0], sizes = [8, 384], strides = [1, 1]} : vector<8x512xf32> to vector<8x384xf32>
    %241 = arith.negf %240 : vector<8x384xf32>
    %242 = math.exp %241 : vector<8x384xf32>
    %cst_72 = arith.constant 1.000000e+00 : f32
    %243 = vector.broadcast %cst_72 : f32 to vector<8x384xf32>
    %244 = arith.addf %243, %242 : vector<8x384xf32>
    %245 = arith.divf %243, %244 : vector<8x384xf32>
    %246 = vector.extract_strided_slice %245 {offsets = [0, 0], sizes = [8, 128], strides = [1, 1]} : vector<8x384xf32> to vector<8x128xf32>
    %247 = vector.extract_strided_slice %245 {offsets = [0, 128], sizes = [8, 128], strides = [1, 1]} : vector<8x384xf32> to vector<8x128xf32>
    %248 = vector.extract_strided_slice %245 {offsets = [0, 256], sizes = [8, 128], strides = [1, 1]} : vector<8x384xf32> to vector<8x128xf32>
    %249 = vector.extract_strided_slice %239 {offsets = [0, 384], sizes = [8, 128], strides = [1, 1]} : vector<8x512xf32> to vector<8x128xf32>
    %250 = math.tanh %249 : vector<8x128xf32>
    %251 = arith.mulf %247, %208 : vector<8x128xf32>
    %252 = arith.mulf %246, %250 : vector<8x128xf32>
    %253 = arith.addf %251, %252 : vector<8x128xf32>
    %254 = math.tanh %253 : vector<8x128xf32>
    %255 = arith.mulf %248, %254 : vector<8x128xf32>
    %256 = tpu.concatenate %255, %232 in 1 : vector<8x128xf32>, vector<8x128xf32> -> vector<8x256xf32>
    %c0_73 = arith.constant 0 : index
    %c0_74 = arith.constant 0 : index
    %257 = vector.load %arg5[%c0_73, %c0_74] : memref<256x512xf32, #tpu.memory_space<vmem>>, vector<256x512xf32>
    %cst_75 = arith.constant dense<0.000000e+00> : vector<8x512xf32>
    %258 = tpu.matmul %256, %257, %cst_75 {dimension_numbers = #tpu.dot_dimension_numbers<[1], [0], [0], [1], [0, 0, 1, 1], [], []>} : vector<8x256xf32>, vector<256x512xf32>, vector<8x512xf32> -> vector<8x512xf32>
    %c0_76 = arith.constant 0 : index
    %c0_77 = arith.constant 0 : index
    %259 = vector.load %arg6[%c0_76, %c0_77] : memref<1x512xf32, #tpu.memory_space<vmem>>, vector<1x512xf32>
    %260 = vector.broadcast %259 : vector<1x512xf32> to vector<8x512xf32>
    %261 = arith.addf %258, %260 : vector<8x512xf32>
    %262 = vector.extract_strided_slice %261 {offsets = [0, 0], sizes = [8, 384], strides = [1, 1]} : vector<8x512xf32> to vector<8x384xf32>
    %263 = arith.negf %262 : vector<8x384xf32>
    %264 = math.exp %263 : vector<8x384xf32>
    %cst_78 = arith.constant 1.000000e+00 : f32
    %265 = vector.broadcast %cst_78 : f32 to vector<8x384xf32>
    %266 = arith.addf %265, %264 : vector<8x384xf32>
    %267 = arith.divf %265, %266 : vector<8x384xf32>
    %268 = vector.extract_strided_slice %267 {offsets = [0, 0], sizes = [8, 128], strides = [1, 1]} : vector<8x384xf32> to vector<8x128xf32>
    %269 = vector.extract_strided_slice %267 {offsets = [0, 128], sizes = [8, 128], strides = [1, 1]} : vector<8x384xf32> to vector<8x128xf32>
    %270 = vector.extract_strided_slice %267 {offsets = [0, 256], sizes = [8, 128], strides = [1, 1]} : vector<8x384xf32> to vector<8x128xf32>
    %271 = vector.extract_strided_slice %261 {offsets = [0, 384], sizes = [8, 128], strides = [1, 1]} : vector<8x512xf32> to vector<8x128xf32>
    %272 = math.tanh %271 : vector<8x128xf32>
    %273 = arith.mulf %269, %230 : vector<8x128xf32>
    %274 = arith.mulf %268, %272 : vector<8x128xf32>
    %275 = arith.addf %273, %274 : vector<8x128xf32>
    %276 = math.tanh %275 : vector<8x128xf32>
    %277 = arith.mulf %270, %276 : vector<8x128xf32>
    %c6_i32 = arith.constant 6 : i32
    %c8_i32_79 = arith.constant 8 : i32
    %278 = arith.muli %c6_i32, %c8_i32_79 : i32
    %279 = tpu.assume_multiple %278, 8 : i32
    %280 = arith.index_cast %279 : i32 to index
    %c0_80 = arith.constant 0 : index
    %281 = vector.load %arg10[%280, %c0_80] : memref<64x512xf32, #tpu.memory_space<vmem>>, vector<8x512xf32>
    %c0_81 = arith.constant 0 : index
    %c0_82 = arith.constant 0 : index
    %282 = vector.load %arg4[%c0_81, %c0_82] : memref<128x512xf32, #tpu.memory_space<vmem>>, vector<128x512xf32>
    %cst_83 = arith.constant dense<0.000000e+00> : vector<8x512xf32>
    %283 = tpu.matmul %255, %282, %cst_83 {dimension_numbers = #tpu.dot_dimension_numbers<[1], [0], [0], [1], [0, 0, 1, 1], [], []>} : vector<8x128xf32>, vector<128x512xf32>, vector<8x512xf32> -> vector<8x512xf32>
    %284 = arith.addf %281, %283 : vector<8x512xf32>
    %285 = vector.extract_strided_slice %284 {offsets = [0, 0], sizes = [8, 384], strides = [1, 1]} : vector<8x512xf32> to vector<8x384xf32>
    %286 = arith.negf %285 : vector<8x384xf32>
    %287 = math.exp %286 : vector<8x384xf32>
    %cst_84 = arith.constant 1.000000e+00 : f32
    %288 = vector.broadcast %cst_84 : f32 to vector<8x384xf32>
    %289 = arith.addf %288, %287 : vector<8x384xf32>
    %290 = arith.divf %288, %289 : vector<8x384xf32>
    %291 = vector.extract_strided_slice %290 {offsets = [0, 0], sizes = [8, 128], strides = [1, 1]} : vector<8x384xf32> to vector<8x128xf32>
    %292 = vector.extract_strided_slice %290 {offsets = [0, 128], sizes = [8, 128], strides = [1, 1]} : vector<8x384xf32> to vector<8x128xf32>
    %293 = vector.extract_strided_slice %290 {offsets = [0, 256], sizes = [8, 128], strides = [1, 1]} : vector<8x384xf32> to vector<8x128xf32>
    %294 = vector.extract_strided_slice %284 {offsets = [0, 384], sizes = [8, 128], strides = [1, 1]} : vector<8x512xf32> to vector<8x128xf32>
    %295 = math.tanh %294 : vector<8x128xf32>
    %296 = arith.mulf %292, %253 : vector<8x128xf32>
    %297 = arith.mulf %291, %295 : vector<8x128xf32>
    %298 = arith.addf %296, %297 : vector<8x128xf32>
    %299 = math.tanh %298 : vector<8x128xf32>
    %300 = arith.mulf %293, %299 : vector<8x128xf32>
    %301 = tpu.concatenate %300, %277 in 1 : vector<8x128xf32>, vector<8x128xf32> -> vector<8x256xf32>
    %c0_85 = arith.constant 0 : index
    %c0_86 = arith.constant 0 : index
    %302 = vector.load %arg5[%c0_85, %c0_86] : memref<256x512xf32, #tpu.memory_space<vmem>>, vector<256x512xf32>
    %cst_87 = arith.constant dense<0.000000e+00> : vector<8x512xf32>
    %303 = tpu.matmul %301, %302, %cst_87 {dimension_numbers = #tpu.dot_dimension_numbers<[1], [0], [0], [1], [0, 0, 1, 1], [], []>} : vector<8x256xf32>, vector<256x512xf32>, vector<8x512xf32> -> vector<8x512xf32>
    %c0_88 = arith.constant 0 : index
    %c0_89 = arith.constant 0 : index
    %304 = vector.load %arg6[%c0_88, %c0_89] : memref<1x512xf32, #tpu.memory_space<vmem>>, vector<1x512xf32>
    %305 = vector.broadcast %304 : vector<1x512xf32> to vector<8x512xf32>
    %306 = arith.addf %303, %305 : vector<8x512xf32>
    %307 = vector.extract_strided_slice %306 {offsets = [0, 0], sizes = [8, 384], strides = [1, 1]} : vector<8x512xf32> to vector<8x384xf32>
    %308 = arith.negf %307 : vector<8x384xf32>
    %309 = math.exp %308 : vector<8x384xf32>
    %cst_90 = arith.constant 1.000000e+00 : f32
    %310 = vector.broadcast %cst_90 : f32 to vector<8x384xf32>
    %311 = arith.addf %310, %309 : vector<8x384xf32>
    %312 = arith.divf %310, %311 : vector<8x384xf32>
    %313 = vector.extract_strided_slice %312 {offsets = [0, 0], sizes = [8, 128], strides = [1, 1]} : vector<8x384xf32> to vector<8x128xf32>
    %314 = vector.extract_strided_slice %312 {offsets = [0, 128], sizes = [8, 128], strides = [1, 1]} : vector<8x384xf32> to vector<8x128xf32>
    %315 = vector.extract_strided_slice %312 {offsets = [0, 256], sizes = [8, 128], strides = [1, 1]} : vector<8x384xf32> to vector<8x128xf32>
    %316 = vector.extract_strided_slice %306 {offsets = [0, 384], sizes = [8, 128], strides = [1, 1]} : vector<8x512xf32> to vector<8x128xf32>
    %317 = math.tanh %316 : vector<8x128xf32>
    %318 = arith.mulf %314, %275 : vector<8x128xf32>
    %319 = arith.mulf %313, %317 : vector<8x128xf32>
    %320 = arith.addf %318, %319 : vector<8x128xf32>
    %321 = math.tanh %320 : vector<8x128xf32>
    %322 = arith.mulf %315, %321 : vector<8x128xf32>
    %c7_i32 = arith.constant 7 : i32
    %c8_i32_91 = arith.constant 8 : i32
    %323 = arith.muli %c7_i32, %c8_i32_91 : i32
    %324 = tpu.assume_multiple %323, 8 : i32
    %325 = arith.index_cast %324 : i32 to index
    %c0_92 = arith.constant 0 : index
    %326 = vector.load %arg10[%325, %c0_92] : memref<64x512xf32, #tpu.memory_space<vmem>>, vector<8x512xf32>
    %c0_93 = arith.constant 0 : index
    %c0_94 = arith.constant 0 : index
    %327 = vector.load %arg4[%c0_93, %c0_94] : memref<128x512xf32, #tpu.memory_space<vmem>>, vector<128x512xf32>
    %cst_95 = arith.constant dense<0.000000e+00> : vector<8x512xf32>
    %328 = tpu.matmul %300, %327, %cst_95 {dimension_numbers = #tpu.dot_dimension_numbers<[1], [0], [0], [1], [0, 0, 1, 1], [], []>} : vector<8x128xf32>, vector<128x512xf32>, vector<8x512xf32> -> vector<8x512xf32>
    %329 = arith.addf %326, %328 : vector<8x512xf32>
    %330 = vector.extract_strided_slice %329 {offsets = [0, 0], sizes = [8, 384], strides = [1, 1]} : vector<8x512xf32> to vector<8x384xf32>
    %331 = arith.negf %330 : vector<8x384xf32>
    %332 = math.exp %331 : vector<8x384xf32>
    %cst_96 = arith.constant 1.000000e+00 : f32
    %333 = vector.broadcast %cst_96 : f32 to vector<8x384xf32>
    %334 = arith.addf %333, %332 : vector<8x384xf32>
    %335 = arith.divf %333, %334 : vector<8x384xf32>
    %336 = vector.extract_strided_slice %335 {offsets = [0, 0], sizes = [8, 128], strides = [1, 1]} : vector<8x384xf32> to vector<8x128xf32>
    %337 = vector.extract_strided_slice %335 {offsets = [0, 128], sizes = [8, 128], strides = [1, 1]} : vector<8x384xf32> to vector<8x128xf32>
    %338 = vector.extract_strided_slice %335 {offsets = [0, 256], sizes = [8, 128], strides = [1, 1]} : vector<8x384xf32> to vector<8x128xf32>
    %339 = vector.extract_strided_slice %329 {offsets = [0, 384], sizes = [8, 128], strides = [1, 1]} : vector<8x512xf32> to vector<8x128xf32>
    %340 = math.tanh %339 : vector<8x128xf32>
    %341 = arith.mulf %337, %298 : vector<8x128xf32>
    %342 = arith.mulf %336, %340 : vector<8x128xf32>
    %343 = arith.addf %341, %342 : vector<8x128xf32>
    %344 = math.tanh %343 : vector<8x128xf32>
    %345 = arith.mulf %338, %344 : vector<8x128xf32>
    %346 = tpu.concatenate %345, %322 in 1 : vector<8x128xf32>, vector<8x128xf32> -> vector<8x256xf32>
    %c0_97 = arith.constant 0 : index
    %c0_98 = arith.constant 0 : index
    %347 = vector.load %arg5[%c0_97, %c0_98] : memref<256x512xf32, #tpu.memory_space<vmem>>, vector<256x512xf32>
    %cst_99 = arith.constant dense<0.000000e+00> : vector<8x512xf32>
    %348 = tpu.matmul %346, %347, %cst_99 {dimension_numbers = #tpu.dot_dimension_numbers<[1], [0], [0], [1], [0, 0, 1, 1], [], []>} : vector<8x256xf32>, vector<256x512xf32>, vector<8x512xf32> -> vector<8x512xf32>
    %c0_100 = arith.constant 0 : index
    %c0_101 = arith.constant 0 : index
    %349 = vector.load %arg6[%c0_100, %c0_101] : memref<1x512xf32, #tpu.memory_space<vmem>>, vector<1x512xf32>
    %350 = vector.broadcast %349 : vector<1x512xf32> to vector<8x512xf32>
    %351 = arith.addf %348, %350 : vector<8x512xf32>
    %352 = vector.extract_strided_slice %351 {offsets = [0, 0], sizes = [8, 384], strides = [1, 1]} : vector<8x512xf32> to vector<8x384xf32>
    %353 = arith.negf %352 : vector<8x384xf32>
    %354 = math.exp %353 : vector<8x384xf32>
    %cst_102 = arith.constant 1.000000e+00 : f32
    %355 = vector.broadcast %cst_102 : f32 to vector<8x384xf32>
    %356 = arith.addf %355, %354 : vector<8x384xf32>
    %357 = arith.divf %355, %356 : vector<8x384xf32>
    %358 = vector.extract_strided_slice %357 {offsets = [0, 0], sizes = [8, 128], strides = [1, 1]} : vector<8x384xf32> to vector<8x128xf32>
    %359 = vector.extract_strided_slice %357 {offsets = [0, 128], sizes = [8, 128], strides = [1, 1]} : vector<8x384xf32> to vector<8x128xf32>
    %360 = vector.extract_strided_slice %357 {offsets = [0, 256], sizes = [8, 128], strides = [1, 1]} : vector<8x384xf32> to vector<8x128xf32>
    %361 = vector.extract_strided_slice %351 {offsets = [0, 384], sizes = [8, 128], strides = [1, 1]} : vector<8x512xf32> to vector<8x128xf32>
    %362 = math.tanh %361 : vector<8x128xf32>
    %363 = arith.mulf %359, %320 : vector<8x128xf32>
    %364 = arith.mulf %358, %362 : vector<8x128xf32>
    %365 = arith.addf %363, %364 : vector<8x128xf32>
    %366 = math.tanh %365 : vector<8x128xf32>
    %367 = arith.mulf %360, %366 : vector<8x128xf32>
    %c8_i32_103 = arith.constant 8 : i32
    %c0_104 = arith.constant 0 : index
    %c0_105 = arith.constant 0 : index
    %368 = vector.load %arg7[%c0_104, %c0_105] : memref<128x128xf32, #tpu.memory_space<vmem>>, vector<128x128xf32>
    %cst_106 = arith.constant dense<0.000000e+00> : vector<8x128xf32>
    %369 = tpu.matmul %367, %368, %cst_106 {dimension_numbers = #tpu.dot_dimension_numbers<[1], [0], [0], [1], [0, 0, 1, 1], [], []>} : vector<8x128xf32>, vector<128x128xf32>, vector<8x128xf32> -> vector<8x128xf32>
    %c0_107 = arith.constant 0 : index
    %c0_108 = arith.constant 0 : index
    %370 = vector.load %arg8[%c0_107, %c0_108] : memref<1x128xf32, #tpu.memory_space<vmem>>, vector<1x128xf32>
    %371 = vector.broadcast %370 : vector<1x128xf32> to vector<8x128xf32>
    %372 = arith.addf %369, %371 : vector<8x128xf32>
    %c0_109 = arith.constant 0 : index
    %c0_110 = arith.constant 0 : index
    %373 = vector.load %arg9[%c0_109, %c0_110] : memref<8x128xf32, #tpu.memory_space<vmem>>, vector<8x128xf32>
    tpu.vector_store %arg9[%c0_109, %c0_110], %372 {strides = array<i32>} : memref<8x128xf32, #tpu.memory_space<vmem>>, vector<8x128xf32>,
    return
  }
  func.func @transform_0(%arg0: i32) -> (i32, i32) {
    %c0_i32 = arith.constant 0 : i32
    %c0_i32_0 = arith.constant 0 : i32
    %c0_i32_1 = arith.constant 0 : i32
    return %c0_i32, %c0_i32_0 : i32, i32
  }
  func.func @transform_1(%arg0: i32) -> (i32, i32) {
    %c0_i32 = arith.constant 0 : i32
    %c0_i32_0 = arith.constant 0 : i32
    %c0_i32_1 = arith.constant 0 : i32
    return %c0_i32, %c0_i32_0 : i32, i32
  }
  func.func @transform_2(%arg0: i32) -> (i32, i32) {
    %c0_i32 = arith.constant 0 : i32
    %c0_i32_0 = arith.constant 0 : i32
    %c0_i32_1 = arith.constant 0 : i32
    return %c0_i32, %c0_i32_0 : i32, i32
  }
  func.func @transform_3(%arg0: i32) -> (i32, i32) {
    %c0_i32 = arith.constant 0 : i32
    %c0_i32_0 = arith.constant 0 : i32
    %c0_i32_1 = arith.constant 0 : i32
    return %c0_i32, %c0_i32_0 : i32, i32
  }
  func.func @transform_4(%arg0: i32) -> (i32, i32) {
    %c0_i32 = arith.constant 0 : i32
    %c0_i32_0 = arith.constant 0 : i32
    %c0_i32_1 = arith.constant 0 : i32
    return %c0_i32, %c0_i32_0 : i32, i32
  }
  func.func @transform_5(%arg0: i32) -> (i32, i32) {
    %c0_i32 = arith.constant 0 : i32
    %c0_i32_0 = arith.constant 0 : i32
    %c0_i32_1 = arith.constant 0 : i32
    return %c0_i32, %c0_i32_0 : i32, i32
  }
  func.func @transform_6(%arg0: i32) -> (i32, i32) {
    %c0_i32 = arith.constant 0 : i32
    %c0_i32_0 = arith.constant 0 : i32
    %c0_i32_1 = arith.constant 0 : i32
    return %c0_i32, %c0_i32_0 : i32, i32
  }
  func.func @transform_7(%arg0: i32) -> (i32, i32) {
    %c0_i32 = arith.constant 0 : i32
    %c0_i32_0 = arith.constant 0 : i32
    %c0_i32_1 = arith.constant 0 : i32
    return %c0_i32, %c0_i32_0 : i32, i32
  }
  func.func @transform_8(%arg0: i32) -> (i32, i32) {
    %c0_i32 = arith.constant 0 : i32
    %c0_i32_0 = arith.constant 0 : i32
    %c0_i32_1 = arith.constant 0 : i32
    return %c0_i32, %c0_i32_0 : i32, i32
  }
}

</mosaic_0001>

<bundles_post_ra>
// kernel: lstm_forward.1
= control target key start
LH: loop header
LB: loop body
LE: loop exit
PB: predicated region body
PF: predicated region fallthrough
CT: control target
= control target key end

     0   :  { %13 = vsyncpa [#allocation4], 0  ;;  %s6947_s0 = inlined_call_operand.vmem [shape: f32[64,64], index: 0, kind: input, shape index: {}]   ;;  %s6948_s1 = inlined_call_operand.hbm [shape: f32[64,512], index: 1, kind: input, shape index: {}]   ;;  %s6949_s2 = inlined_call_operand.vmem [shape: f32[1,512], index: 2, kind: input, shape index: {}]   ;;  %s6950_s3 = inlined_call_operand.hbm [shape: f32[128,512], index: 3, kind: input, shape index: {}]   ;;  %s6951_s4 = inlined_call_operand.hbm [shape: f32[256,512], index: 4, kind: input, shape index: {}]   ;;  %s6952_s5 = inlined_call_operand.vmem [shape: f32[1,512], index: 5, kind: input, shape index: {}]   ;;  %s6953_s6 = inlined_call_operand.vmem [shape: f32[128,128], index: 6, kind: input, shape index: {}]   ;;  %s6954_s7 = inlined_call_operand.vmem [shape: f32[1,128], index: 7, kind: input, shape index: {}]   ;;  %s6955_s8 = inlined_call_operand.vmem [shape: f32[8,128], index: 8, kind: output, shape index: {}]  }
   0x1   :  { %14 = vsyncpa [#allocation6], 0  ;;  %s5587_s27 = smov [#allocation5]   ;;  %s5588_s29 = smov [#allocation3]  }
   0x2   :  { %s36_s28 = sshll.u32 %s5587_s27, 4  ;;  %s22_s30 = sshll.u32 %s5588_s29, 4  ;;  %s37_s28 = int_to_ptr.vmem [resolvable:$true] %s36_s28  ;;  %s5640_s30 = int_to_ptr.vmem [resolvable:$true] %s22_s30 }
   0x3   :  { %s5517_s11 = scalar_lea.hbm %s6950_s3, 8192 }
   0x4   :  { %p5518_p0 = scmp.ne.s32.totalorder %s6950_s3, %s5517_s11  ;;  %p5521_p1 = scmp.lt.u32.totalorder %s5517_s11, %s6950_s3 }
   0x6   :  { %p5523_p2 = pnand %p5521_p1, %p5518_p0 }
   0x8   :  { %5526 = shalt.err (!%p5523_p2)
}
   0x9   :  { %s5527_s16 = scalar_lea.vmem %s37_s28, 8192  ;;  %p5532_p4 = scmp.lt.s32.totalorder %s37_s28, %s37_s28 }
   0xa   :  { %p5528_p3 = scmp.ne.s32.totalorder %s37_s28, %s5527_s16  ;;  %p5533_p5 = scmp.lt.s32.totalorder %s5527_s16, %s5527_s16 }
   0xc   :  { %p5534_p6 = por %p5533_p5, %p5532_p4 }
   0xe   :  { %p5535_p7 = pnand %p5534_p6, %p5528_p3 }
  0x10   :  { %5538 = shalt.err (!%p5535_p7)
}
  0x11   :  { %s5589_s17 = smov 512   ;;  %s5590_s18 = smov 32  }
  0x12   :  { %42 = dma.hbm_to_vmem [thread:$0]  %s6950_s3, 8192, %s37_s28, [#allocation6], %s5589_s17, %s5589_s17, %s5590_s18  }
  0x13   :  { %s5539_s23 = scalar_lea.hbm %s6948_s1, 4096 }
  0x14   :  { %p5540_p8 = scmp.ne.s32.totalorder %s6948_s1, %s5539_s23  ;;  %p5543_p9 = scmp.lt.u32.totalorder %s5539_s23, %s6948_s1 }
  0x16   :  { %p5545_p10 = pnand %p5543_p9, %p5540_p8 }
  0x18   :  { %5548 = shalt.err (!%p5545_p10)
}
  0x19   :  { %s5549_s29 = scalar_lea.vmem %s5640_s30, 4096  ;;  %p5554_p12 = scmp.lt.s32.totalorder %s5640_s30, %s5640_s30 }
  0x1a   :  { %p5550_p11 = scmp.ne.s32.totalorder %s5640_s30, %s5549_s29  ;;  %p5555_p13 = scmp.lt.s32.totalorder %s5549_s29, %s5549_s29 }
  0x1c   :  { %p5556_p0 = por %p5555_p13, %p5554_p12 }
  0x1e   :  { %p5557_p1 = pnand %p5556_p0, %p5550_p11 }
  0x20   :  { %5560 = shalt.err (!%p5557_p1)
}
  0x21   :  { %28 = dma.hbm_to_vmem [thread:$0]  %s6948_s1, 4096, %s5640_s30, [#allocation4], %s5589_s17, %s5589_s17, %s5590_s18  }
  0x22   :  { %s5591_s9 = smov [#allocation7]   ;;  %s5561_s13 = scalar_lea.hbm %s6951_s4, 16384 }
  0x23   :  { %s48_s10 = sshll.u32 %s5591_s9, 4  ;;  %p5562_p2 = scmp.ne.s32.totalorder %s6951_s4, %s5561_s13  ;;  %s49_s10 = int_to_ptr.vmem [resolvable:$true] %s48_s10 }
  0x24   :  { %p5565_p3 = scmp.lt.u32.totalorder %s5561_s13, %s6951_s4 }
  0x26   :  { %p5567_p4 = pnand %p5565_p3, %p5562_p2 }
  0x28   :  { %5570 = shalt.err (!%p5567_p4)
}
  0x29   :  { %s5571_s20 = scalar_lea.vmem %s49_s10, 16384  ;;  %p5576_p6 = scmp.lt.s32.totalorder %s49_s10, %s49_s10 }
  0x2a   :  { %p5572_p5 = scmp.ne.s32.totalorder %s49_s10, %s5571_s20  ;;  %p5577_p7 = scmp.lt.s32.totalorder %s5571_s20, %s5571_s20 }
  0x2c   :  { %p5578_p8 = por %p5577_p7, %p5576_p6 }
  0x2e   :  { %p5579_p9 = pnand %p5578_p8, %p5572_p5 }
  0x30   :  { %5582 = shalt.err (!%p5579_p9)
}
  0x31   :  { %54 = dma.hbm_to_vmem [thread:$0]  %s6951_s4, 16384, %s49_s10, [#allocation6], %s5589_s17, %s5589_s17, %s5590_s18  }
  0x32   :  { %5583 = dma.done.wait [#allocation4], 4096  }
  0x33   :  { %5584 = vsyncadd [#allocation4], 4294963200 }
  0x34   :  { %5585 = dma.done.wait [#allocation6], 24576  }
  0x35   :  { %5586 = vsyncadd [#allocation6], 4294942720  ;;  %v6956_v0 = vmov 0.0   ;;  %v79_v1 = vld [vmem:[#allocation3 + $0x8] sm:$0xff]  ;;  %v81_v3 = vld [vmem:[#allocation3 + $0x18] sm:$0xff]  ;;  %vm132_vm0 = vcmask 523264  }
  0x36   :  { %221 = vmatprep.mubr.f32.mxu0 %v6956_v0  ;;  %334 = vmatprep.mubr.f32.mxu1 %v6956_v0  ;;  %v83_v2 = vld [vmem:[#allocation3 + $0x28] sm:$0xff]  ;;  %v85_v5 = vld [vmem:[#allocation3 + $0x38] sm:$0xff]  ;;  %v78_v6 = vld [vmem:[#allocation3] sm:$0xff]  ;;  %vm5594_vm1 = vmmov 0  }
  0x37   :  { %v3597_v4 = vpack.c.bf16 %v83_v2, %v79_v1  ;;  %v82_v7 = vld [vmem:[#allocation3 + $0x20] sm:$0xff]  ;;  %v3613_v8 = vpack.c.bf16 %v85_v5, %v81_v3  ;;  %v80_v10 = vld [vmem:[#allocation3 + $0x10] sm:$0xff]  ;;  %v87_v12 = vld [vmem:[#allocation3 + $0x48] sm:$0xff] }
  0x38   :  { %v3599_v9 = vpack.c.bf16 %v82_v7, %v78_v6  ;;  %v84_v11 = vld [vmem:[#allocation3 + $0x30] sm:$0xff]  ;;  %v91_v14 = vld [vmem:[#allocation3 + $0x68] sm:$0xff]  ;;  %v89_v15 = vld [vmem:[#allocation3 + $0x58] sm:$0xff] }
  0x39   :  { %3598 = vmatprep.subr.bf16.mxu0 %v3597_v4  ;;  %v3615_v13 = vpack.c.bf16 %v84_v11, %v80_v10  ;;  %v93_v16 = vld [vmem:[#allocation3 + $0x78] sm:$0xff]  ;;  %3614 = vmatprep.subr.bf16.mxu1 %v3613_v8  ;;  %v3601_v17 = vpack.c.bf16 %v91_v14, %v87_v12  ;;  %v86_v19 = vld [vmem:[#allocation3 + $0x40] sm:$0xff]  ;;  %v88_v21 = vld [vmem:[#allocation3 + $0x50] sm:$0xff] }
  0x3a   :  { %3600 = vmatpush1.bf16.msra.mxu0 %v3599_v9  ;;  %v3617_v18 = vpack.c.bf16 %v93_v16, %v89_v15  ;;  %v90_v20 = vld [vmem:[#allocation3 + $0x60] sm:$0xff]  ;;  %v92_v23 = vld [vmem:[#allocation3 + $0x70] sm:$0xff]  ;;  %v95_v24 = vld [vmem:[#allocation3 + $0x88] sm:$0xff] }
  0x3b   :  { %3616 = vmatpush1.bf16.msra.mxu1 %v3615_v13  ;;  %v3603_v22 = vpack.c.bf16 %v90_v20, %v86_v19  ;;  %v99_v25 = vld [vmem:[#allocation3 + $0xa8] sm:$0xff]  ;;  %3602 = vmatprep.subr.bf16.mxu0 %v3601_v17  ;;  %v3619_v26 = vpack.c.bf16 %v92_v23, %v88_v21  ;;  %v97_v28 = vld [vmem:[#allocation3 + $0x98] sm:$0xff]  ;;  %v94_v30 = vld [vmem:[#allocation3 + $0x80] sm:$0xff] }
  0x3c   :  { %3618 = vmatprep.subr.bf16.mxu1 %v3617_v18  ;;  %v3605_v27 = vpack.c.bf16 %v99_v25, %v95_v24  ;;  %v101_v29 = vld [vmem:[#allocation3 + $0xb8] sm:$0xff]  ;;  %v98_v32 = vld [vmem:[#allocation3 + $0xa0] sm:$0xff]  ;;  %v96_v33 = vld [vmem:[#allocation3 + $0x90] sm:$0xff] }
  0x3d   :  { %v3621_v31 = vpack.c.bf16 %v101_v29, %v97_v28  ;;  %v100_v34 = vld [vmem:[#allocation3 + $0xb0] sm:$0xff]  ;;  %v3607_v35 = vpack.c.bf16 %v98_v32, %v94_v30  ;;  %v103_v36 = vld [vmem:[#allocation3 + $0xc8] sm:$0xff]  ;;  %v105_v38 = vld [vmem:[#allocation3 + $0xd8] sm:$0xff] }
  0x3e   :  { %3604 = vmatpush1.bf16.msra.mxu0 %v3603_v22  ;;  %v107_v37 = vld [vmem:[#allocation3 + $0xe8] sm:$0xff]  ;;  %v3623_v39 = vpack.c.bf16 %v100_v34, %v96_v33  ;;  %v109_v41 = vld [vmem:[#allocation3 + $0xf8] sm:$0xff]  ;;  %v102_v42 = vld [vmem:[#allocation3 + $0xc0] sm:$0xff] }
  0x3f   :  { %3620 = vmatpush1.bf16.msra.mxu1 %v3619_v26  ;;  %3606 = vmatprep.subr.bf16.mxu0 %v3605_v27  ;;  %v3609_v40 = vpack.c.bf16 %v107_v37, %v103_v36  ;;  %v106_v43 = vld [vmem:[#allocation3 + $0xe0] sm:$0xff]  ;;  %v3625_v44 = vpack.c.bf16 %v109_v41, %v105_v38  ;;  %v104_v45 = vld [vmem:[#allocation3 + $0xd0] sm:$0xff]  ;;  %v423_v47 = vld [vmem:[#allocation5 + $0x8] sm:$0xff] }
  0x40   :  { %3622 = vmatprep.subr.bf16.mxu1 %v3621_v31  ;;  %v108_v46 = vld [vmem:[#allocation3 + $0xf0] sm:$0xff]  ;;  %v427_v48 = vld [vmem:[#allocation5 + $0x28] sm:$0xff]  ;;  %v425_v49 = vld [vmem:[#allocation5 + $0x18] sm:$0xff]  ;;  %v3611_v50 = vpack.c.bf16 %v106_v43, %v102_v42 }
  0x41   :  { %v429_v51 = vld [vmem:[#allocation5 + $0x38] sm:$0xff]  ;;  %v3627_v52 = vpack.c.bf16 %v108_v46, %v104_v45  ;;  %v5694_v53 = vpack.c.bf16 %v427_v48, %v423_v47  ;;  %v422_v54 = vld [vmem:[#allocation5] sm:$0xff]  ;;  %v424_v57 = vld [vmem:[#allocation5 + $0x10] sm:$0xff] }
  0x42   :  { %3608 = vmatpush1.bf16.msra.mxu0 %v3607_v35  ;;  %v426_v55 = vld [vmem:[#allocation5 + $0x20] sm:$0xff]  ;;  %v5696_v56 = vpack.c.bf16 %v429_v51, %v425_v49  ;;  %v428_v58 = vld [vmem:[#allocation5 + $0x30] sm:$0xff]  ;;  %v431_v59 = vld [vmem:[#allocation5 + $0x48] sm:$0xff] }
  0x43   :  { %3624 = vmatpush1.bf16.msra.mxu1 %v3623_v39  ;;  %3610 = vmatprep.subr.bf16.mxu0 %v3609_v40  ;;  %7092 = vst [vmem:[#allocation10_spill] sm:$0xff] %v5694_v53  ;;  %v435_v60 = vld [vmem:[#allocation5 + $0x68] sm:$0xff]  ;;  %v70_v61 = vld [vmem:[%s6947_s0] sm:$0xff]  ;;  %v5701_v62 = vpack.c.bf16 %v426_v55, %v422_v54  ;;  %v433_v63 = vld [vmem:[#allocation5 + $0x58] sm:$0xff]  ;;  %v5704_v2 = vpack.c.bf16 %v428_v58, %v424_v57 }
  0x44   :  { %3626 = vmatprep.subr.bf16.mxu1 %v3625_v44  ;;  %7093 = vst [vmem:[#allocation11_spill] sm:$0xff] %v5696_v56  ;;  %v437_v1 = vld [vmem:[#allocation5 + $0x78] sm:$0xff]  ;;  %v430_v3 = vld [vmem:[#allocation5 + $0x40] sm:$0xff]  ;;  %v5707_v5 = vpack.c.bf16 %v435_v60, %v431_v59  ;;  %v432_v6 = vld [vmem:[#allocation5 + $0x50] sm:$0xff] }
  0x45   :  { %v434_v4 = vld [vmem:[#allocation5 + $0x60] sm:$0xff]  ;;  %v436_v7 = vld [vmem:[#allocation5 + $0x70] sm:$0xff]  ;;  %v5710_v8 = vpack.c.bf16 %v437_v1, %v433_v63  ;;  %v439_v9 = vld [vmem:[#allocation5 + $0x88] sm:$0xff] }
  0x46   :  { %3612 = vmatpush1.bf16.msra.mxu0 %v3611_v50  ;;  %v443_v10 = vld [vmem:[#allocation5 + $0xa8] sm:$0xff]  ;;  %v5717_v12 = vpack.c.bf16 %v434_v4, %v430_v3  ;;  %v441_v13 = vld [vmem:[#allocation5 + $0x98] sm:$0xff]  ;;  %v5721_v15 = vpack.c.bf16 %v436_v7, %v432_v6  ;;  %v438_v16 = vld [vmem:[#allocation5 + $0x80] sm:$0xff] }
  0x47   :  { %3628 = vmatpush1.bf16.msra.mxu1 %v3627_v52  ;;  %3630 = vmatprep.subr.bf16.mxu0 %v5694_v53  ;;  %v71_v11 = vld [vmem:[%s6947_s0 + $0x8] sm:$0xff]  ;;  %v445_v14 = vld [vmem:[#allocation5 + $0xb8] sm:$0xff]  ;;  %v442_v17 = vld [vmem:[#allocation5 + $0xa0] sm:$0xff]  ;;  %v5725_v18 = vpack.c.bf16 %v443_v10, %v439_v9 }
  0x48   :  { %3662 = vmatprep.subr.bf16.mxu1 %v5696_v56  ;;  %v440_v19 = vld [vmem:[#allocation5 + $0x90] sm:$0xff]  ;;  %v5729_v21 = vpack.c.bf16 %v445_v14, %v441_v13  ;;  %v447_v22 = vld [vmem:[#allocation5 + $0xc8] sm:$0xff]  ;;  %v5736_v25 = vpack.c.bf16 %v442_v17, %v438_v16  ;;  %v449_v26 = vld [vmem:[#allocation5 + $0xd8] sm:$0xff] }
  0x49   :  { %3480 = vmatmul.mubr.msk.f32.vlgmr.msra.gmra.mrb[0].mxu0 %vm132_vm0, %v70_v61  ;;  %v444_v20 = vld [vmem:[#allocation5 + $0xb0] sm:$0xff]  ;;  %v451_v23 = vld [vmem:[#allocation5 + $0xe8] sm:$0xff]  ;;  %v453_v27 = vld [vmem:[#allocation5 + $0xf8] sm:$0xff] }
  0x4a   :  { %3488 = vmatmul.mubr.msk.f32.vlgmr.msra.gmra.mrb[0].mxu1 %vm132_vm0, %v70_v61  ;;  %3632 = vmatpush1.bf16.msra.mxu0 %v5701_v62  ;;  %v72_v24 = vld [vmem:[%s6947_s0 + $0x10] sm:$0xff]  ;;  %v5740_v28 = vpack.c.bf16 %v444_v20, %v440_v19  ;;  %v446_v29 = vld [vmem:[#allocation5 + $0xc0] sm:$0xff]  ;;  %v5744_v31 = vpack.c.bf16 %v451_v23, %v447_v22  ;;  %v5748_v34 = vpack.c.bf16 %v453_v27, %v449_v26  ;;  %v455_v35 = vld [vmem:[#allocation5 + $0x108] sm:$0xff] }
  0x4b   :  { %3664 = vmatpush1.bf16.msra.mxu1 %v5704_v2  ;;  %227 = vmatprep.mubr.f32.mxu0 %v6956_v0  ;;  %v450_v30 = vld [vmem:[#allocation5 + $0xe0] sm:$0xff]  ;;  %v448_v32 = vld [vmem:[#allocation5 + $0xd0] sm:$0xff]  ;;  %v459_v36 = vld [vmem:[#allocation5 + $0x128] sm:$0xff] }
  0x4c   :  { %340 = vmatprep.mubr.f32.mxu1 %v6956_v0  ;;  %3634 = vmatprep.subr.bf16.mxu0 %v5707_v5  ;;  %v452_v33 = vld [vmem:[#allocation5 + $0xf0] sm:$0xff]  ;;  %v73_v37 = vld [vmem:[%s6947_s0 + $0x18] sm:$0xff]  ;;  %v5755_v38 = vpack.c.bf16 %v450_v30, %v446_v29  ;;  %v454_v42 = vld [vmem:[#allocation5 + $0x100] sm:$0xff]  ;;  %v5763_v44 = vpack.c.bf16 %v459_v36, %v455_v35 }
  0x4d   :  { %3481 = vmatmul.mubr.msk.f32.gmra.mrb[2].mxu0 %vm132_vm0, %v71_v11  ;;  %3666 = vmatprep.subr.bf16.mxu1 %v5710_v8  ;;  %v457_v39 = vld [vmem:[#allocation5 + $0x118] sm:$0xff]  ;;  %v5759_v41 = vpack.c.bf16 %v452_v33, %v448_v32  ;;  %v458_v43 = vld [vmem:[#allocation5 + $0x120] sm:$0xff]  ;;  %v456_v45 = vld [vmem:[#allocation5 + $0x110] sm:$0xff] }
  0x4e   :  { %3489 = vmatmul.mubr.msk.f32.gmra.mrb[2].mxu1 %vm132_vm0, %v71_v11  ;;  %3636 = vmatpush1.bf16.msra.mxu0 %v5717_v12  ;;  %v461_v40 = vld [vmem:[#allocation5 + $0x138] sm:$0xff]  ;;  %v460_v46 = vld [vmem:[#allocation5 + $0x130] sm:$0xff]  ;;  %v463_v48 = vld [vmem:[#allocation5 + $0x148] sm:$0xff]  ;;  %v5774_v51 = vpack.c.bf16 %v458_v43, %v454_v42 }
  0x4f   :  { %3668 = vmatpush1.bf16.msra.mxu1 %v5721_v15  ;;  %233 = vmatprep.mubr.f32.mxu0 %v6956_v0  ;;  %v5767_v47 = vpack.c.bf16 %v461_v40, %v457_v39  ;;  %v467_v49 = vld [vmem:[#allocation5 + $0x168] sm:$0xff]  ;;  %v74_v50 = vld [vmem:[%s6947_s0 + $0x20] sm:$0xff]  ;;  %v465_v52 = vld [vmem:[#allocation5 + $0x158] sm:$0xff]  ;;  %v5778_v55 = vpack.c.bf16 %v460_v46, %v456_v45 }
  0x50   :  { %346 = vmatprep.mubr.f32.mxu1 %v6956_v0  ;;  %3638 = vmatprep.subr.bf16.mxu0 %v5725_v18  ;;  %v469_v54 = vld [vmem:[#allocation5 + $0x178] sm:$0xff]  ;;  %v462_v57 = vld [vmem:[#allocation5 + $0x140] sm:$0xff]  ;;  %v5782_v59 = vpack.c.bf16 %v467_v49, %v463_v48  ;;  %v464_v60 = vld [vmem:[#allocation5 + $0x150] sm:$0xff] }
  0x51   :  { %3482 = vmatmul.mubr.msk.f32.gmra.mrb[4].mxu0 %vm132_vm0, %v72_v24  ;;  %3670 = vmatprep.subr.bf16.mxu1 %v5729_v21  ;;  %v466_v58 = vld [vmem:[#allocation5 + $0x160] sm:$0xff]  ;;  %v468_v61 = vld [vmem:[#allocation5 + $0x170] sm:$0xff]  ;;  %v5786_v63 = vpack.c.bf16 %v469_v54, %v465_v52  ;;  %v471_v1 = vld [vmem:[#allocation5 + $0x188] sm:$0xff] }
  0x52   :  { %3490 = vmatmul.mubr.msk.f32.gmra.mrb[4].mxu1 %vm132_vm0, %v72_v24  ;;  %3640 = vmatpush1.bf16.msra.mxu0 %v5736_v25  ;;  %v475_v3 = vld [vmem:[#allocation5 + $0x1a8] sm:$0xff]  ;;  %v5793_v6 = vpack.c.bf16 %v466_v58, %v462_v57  ;;  %v473_v7 = vld [vmem:[#allocation5 + $0x198] sm:$0xff]  ;;  %v5797_v10 = vpack.c.bf16 %v468_v61, %v464_v60  ;;  %v470_v11 = vld [vmem:[#allocation5 + $0x180] sm:$0xff] }
  0x53   :  { %3672 = vmatpush1.bf16.msra.mxu1 %v5740_v28  ;;  %239 = vmatprep.mubr.f32.mxu0 %v6956_v0  ;;  %v75_v4 = vld [vmem:[%s6947_s0 + $0x28] sm:$0xff]  ;;  %v477_v9 = vld [vmem:[#allocation5 + $0x1b8] sm:$0xff]  ;;  %v474_v13 = vld [vmem:[#allocation5 + $0x1a0] sm:$0xff]  ;;  %v5801_v14 = vpack.c.bf16 %v475_v3, %v471_v1 }
  0x54   :  { %352 = vmatprep.mubr.f32.mxu1 %v6956_v0  ;;  %3642 = vmatprep.subr.bf16.mxu0 %v5744_v31  ;;  %v472_v16 = vld [vmem:[#allocation5 + $0x190] sm:$0xff]  ;;  %v5805_v19 = vpack.c.bf16 %v477_v9, %v473_v7  ;;  %v479_v20 = vld [vmem:[#allocation5 + $0x1c8] sm:$0xff]  ;;  %v5812_v24 = vpack.c.bf16 %v474_v13, %v470_v11  ;;  %v481_v26 = vld [vmem:[#allocation5 + $0x1d8] sm:$0xff] }
  0x55   :  { %3483 = vmatmul.mubr.msk.f32.gmra.mrb[6].mxu0 %vm132_vm0, %v73_v37  ;;  %3674 = vmatprep.subr.bf16.mxu1 %v5748_v34  ;;  %v476_v17 = vld [vmem:[#allocation5 + $0x1b0] sm:$0xff]  ;;  %v483_v22 = vld [vmem:[#allocation5 + $0x1e8] sm:$0xff]  ;;  %v485_v27 = vld [vmem:[#allocation5 + $0x1f8] sm:$0xff] }
  0x56   :  { %3491 = vmatmul.mubr.msk.f32.gmra.mrb[6].mxu1 %vm132_vm0, %v73_v37  ;;  %3644 = vmatpush1.bf16.msra.mxu0 %v5755_v38  ;;  %v76_v23 = vld [vmem:[%s6947_s0 + $0x30] sm:$0xff]  ;;  %v5816_v29 = vpack.c.bf16 %v476_v17, %v472_v16  ;;  %v478_v30 = vld [vmem:[#allocation5 + $0x1c0] sm:$0xff]  ;;  %v5820_v33 = vpack.c.bf16 %v483_v22, %v479_v20  ;;  %v5824_v37 = vpack.c.bf16 %v485_v27, %v481_v26  ;;  %v657_v39 = vld [vmem:[#allocation7 + $0x8] sm:$0xff] }
  0x57   :  { %3676 = vmatpush1.bf16.msra.mxu1 %v5759_v41  ;;  %245 = vmatprep.mubr.f32.mxu0 %v6956_v0  ;;  %v482_v32 = vld [vmem:[#allocation5 + $0x1e0] sm:$0xff]  ;;  %v480_v35 = vld [vmem:[#allocation5 + $0x1d0] sm:$0xff]  ;;  %v661_v40 = vld [vmem:[#allocation7 + $0x28] sm:$0xff] }
  0x58   :  { %358 = vmatprep.mubr.f32.mxu1 %v6956_v0  ;;  %3646 = vmatprep.subr.bf16.mxu0 %v5763_v44  ;;  %v484_v36 = vld [vmem:[#allocation5 + $0x1f0] sm:$0xff]  ;;  %v77_v42 = vld [vmem:[%s6947_s0 + $0x38] sm:$0xff]  ;;  %v5831_v43 = vpack.c.bf16 %v482_v32, %v478_v30  ;;  %v656_v49 = vld [vmem:[#allocation7] sm:$0xff]  ;;  %v5839_v54 = vpack.c.bf16 %v661_v40, %v657_v39 }
  0x59   :  { %3484 = vmatmul.mubr.msk.f32.gmra.mrb[8].mxu0 %vm132_vm0, %v74_v50  ;;  %3678 = vmatprep.subr.bf16.mxu1 %v5767_v47  ;;  %v659_v45 = vld [vmem:[#allocation7 + $0x18] sm:$0xff]  ;;  %v5835_v48 = vpack.c.bf16 %v484_v36, %v480_v35  ;;  %v658_v52 = vld [vmem:[#allocation7 + $0x10] sm:$0xff]  ;;  %v665_v58 = vld [vmem:[#allocation7 + $0x48] sm:$0xff] }
  0x5a   :  { %3492 = vmatmul.mubr.msk.f32.gmra.mrb[8].mxu1 %vm132_vm0, %v74_v50  ;;  %3648 = vmatpush1.bf16.msra.mxu0 %v5774_v51  ;;  %v663_v46 = vld [vmem:[#allocation7 + $0x38] sm:$0xff]  ;;  %v660_v50 = vld [vmem:[#allocation7 + $0x20] sm:$0xff]  ;;  %v662_v57 = vld [vmem:[#allocation7 + $0x30] sm:$0xff] }
  0x5b   :  { %3680 = vmatpush1.bf16.msra.mxu1 %v5778_v55  ;;  %251 = vmatprep.mubr.f32.mxu0 %v6956_v0  ;;  %v669_v60 = vld [vmem:[#allocation7 + $0x68] sm:$0xff]  ;;  %v5843_v61 = vpack.c.bf16 %v663_v46, %v659_v45  ;;  %v667_v1 = vld [vmem:[#allocation7 + $0x58] sm:$0xff]  ;;  %v5851_v7 = vpack.c.bf16 %v662_v57, %v658_v52  ;;  %v664_v11 = vld [vmem:[#allocation7 + $0x40] sm:$0xff] }
  0x5c   :  { %364 = vmatprep.mubr.f32.mxu1 %v6956_v0  ;;  %3650 = vmatprep.subr.bf16.mxu0 %v5782_v59  ;;  %v671_v3 = vld [vmem:[#allocation7 + $0x78] sm:$0xff]  ;;  %v5853_v9 = vpack.c.bf16 %v669_v60, %v665_v58  ;;  %v668_v13 = vld [vmem:[#allocation7 + $0x60] sm:$0xff]  ;;  %v666_v16 = vld [vmem:[#allocation7 + $0x50] sm:$0xff] }
  0x5d   :  { %3485 = vmatmul.mubr.msk.f32.gmra.mrb[10].mxu0 %vm132_vm0, %v75_v4  ;;  %3682 = vmatprep.subr.bf16.mxu1 %v5786_v63  ;;  %v5857_v17 = vpack.c.bf16 %v671_v3, %v667_v1  ;;  %v670_v20 = vld [vmem:[#allocation7 + $0x70] sm:$0xff]  ;;  %v673_v22 = vld [vmem:[#allocation7 + $0x88] sm:$0xff]  ;;  %v675_v26 = vld [vmem:[#allocation7 + $0x98] sm:$0xff]  ;;  %v5863_v30 = vpack.c.bf16 %v668_v13, %v664_v11 }
  0x5e   :  { %3493 = vmatmul.mubr.msk.f32.gmra.mrb[10].mxu1 %vm132_vm0, %v75_v4  ;;  %3652 = vmatpush1.bf16.msra.mxu0 %v5793_v6  ;;  %v5847_v4 = vpack.c.bf16 %v660_v50, %v656_v49  ;;  %v679_v27 = vld [vmem:[#allocation7 + $0xb8] sm:$0xff]  ;;  %v5867_v32 = vpack.c.bf16 %v670_v20, %v666_v16  ;;  %v672_v36 = vld [vmem:[#allocation7 + $0x80] sm:$0xff]  ;;  %v674_v40 = vld [vmem:[#allocation7 + $0x90] sm:$0xff] }
  0x5f   :  { %3684 = vmatpush1.bf16.msra.mxu1 %v5797_v10  ;;  %257 = vmatprep.mubr.f32.mxu0 %v6956_v0  ;;  %v676_v39 = vld [vmem:[#allocation7 + $0xa0] sm:$0xff]  ;;  %v678_v45 = vld [vmem:[#allocation7 + $0xb0] sm:$0xff]  ;;  %v681_v46 = vld [vmem:[#allocation7 + $0xc8] sm:$0xff] }
  0x60   :  { %370 = vmatprep.mubr.f32.mxu1 %v6956_v0  ;;  %3654 = vmatprep.subr.bf16.mxu0 %v5801_v14  ;;  %v685_v49 = vld [vmem:[#allocation7 + $0xe8] sm:$0xff]  ;;  %v683_v50 = vld [vmem:[#allocation7 + $0xd8] sm:$0xff]  ;;  %v5877_v57 = vpack.c.bf16 %v676_v39, %v672_v36  ;;  %v5881_v58 = vpack.c.bf16 %v678_v45, %v674_v40  ;;  %v680_v1 = vld [vmem:[#allocation7 + $0xc0] sm:$0xff] }
  0x61   :  { %3486 = vmatmul.mubr.msk.f32.gmra.mrb[12].mxu0 %vm132_vm0, %v76_v23  ;;  %3686 = vmatprep.subr.bf16.mxu1 %v5805_v19  ;;  %v687_v52 = vld [vmem:[#allocation7 + $0xf8] sm:$0xff]  ;;  %v5883_v60 = vpack.c.bf16 %v685_v49, %v681_v46  ;;  %v684_v3 = vld [vmem:[#allocation7 + $0xe0] sm:$0xff]  ;;  %v682_v11 = vld [vmem:[#allocation7 + $0xd0] sm:$0xff] }
  0x62   :  { %3494 = vmatmul.mubr.msk.f32.gmra.mrb[12].mxu1 %vm132_vm0, %v76_v23  ;;  %3656 = vmatpush1.bf16.msra.mxu0 %v5812_v24  ;;  %v677_v23 = vld [vmem:[#allocation7 + $0xa8] sm:$0xff]  ;;  %7095 = vst [vmem:[#allocation13_spill] sm:$0xff] %v5877_v57  ;;  %7096 = vst [vmem:[#allocation14_spill] sm:$0xff] %v5881_v58  ;;  %v5886_v13 = vpack.c.bf16 %v687_v52, %v683_v50  ;;  %v686_v16 = vld [vmem:[#allocation7 + $0xf0] sm:$0xff] }
  0x63   :  { %3688 = vmatpush1.bf16.msra.mxu1 %v5816_v29  ;;  %263 = vmatprep.mubr.f32.mxu0 %v6956_v0  ;;  %v5869_v35 = vpack.c.bf16 %v677_v23, %v673_v22  ;;  %7097 = vst [vmem:[#allocation15_spill] sm:$0xff] %v5883_v60  ;;  %v689_v20 = vld [vmem:[#allocation7 + $0x108] sm:$0xff]  ;;  %v691_v23 = vld [vmem:[#allocation7 + $0x118] sm:$0xff]  ;;  %v5893_v36 = vpack.c.bf16 %v686_v16, %v682_v11  ;;  %v688_v40 = vld [vmem:[#allocation7 + $0x100] sm:$0xff] }
  0x64   :  { %376 = vmatprep.mubr.f32.mxu1 %v6956_v0  ;;  %3658 = vmatprep.subr.bf16.mxu0 %v5820_v33  ;;  %7098 = vst [vmem:[#allocation16_spill] sm:$0xff] %v5886_v13  ;;  %v693_v22 = vld [vmem:[#allocation7 + $0x128] sm:$0xff]  ;;  %v692_v45 = vld [vmem:[#allocation7 + $0x120] sm:$0xff]  ;;  %v690_v49 = vld [vmem:[#allocation7 + $0x110] sm:$0xff] }
  0x65   :  { %3487 = vmatmul.mubr.msk.f32.gmra.mrb[14].mxu0 %vm132_vm0, %v77_v42  ;;  %3690 = vmatprep.subr.bf16.mxu1 %v5824_v37  ;;  %7100 = vst [vmem:[#allocation18_spill] sm:$0xff] %v5893_v36  ;;  %v5895_v39 = vpack.c.bf16 %v693_v22, %v689_v20  ;;  %v694_v50 = vld [vmem:[#allocation7 + $0x130] sm:$0xff]  ;;  %v5901_v52 = vpack.c.bf16 %v692_v45, %v688_v40  ;;  %v701_v11 = vld [vmem:[#allocation7 + $0x168] sm:$0xff]  ;;  %v699_v16 = vld [vmem:[#allocation7 + $0x158] sm:$0xff] }
  0x66   :  { %3495 = vmatmul.mubr.msk.f32.gmra.mrb[14].mxu1 %vm132_vm0, %v77_v42  ;;  %3660 = vmatpush1.bf16.msra.mxu0 %v5831_v43  ;;  %v5872_v42 = vpack.c.bf16 %v679_v27, %v675_v26  ;;  %v695_v26 = vld [vmem:[#allocation7 + $0x138] sm:$0xff]  ;;  %v5889_v27 = vpack.c.bf16 %v684_v3, %v680_v1  ;;  %v5905_v1 = vpack.c.bf16 %v694_v50, %v690_v49  ;;  %v697_v3 = vld [vmem:[#allocation7 + $0x148] sm:$0xff]  ;;  %v698_v49 = vld [vmem:[#allocation7 + $0x150] sm:$0xff] }
  0x67   :  { %3692 = vmatpush1.bf16.msra.mxu1 %v5835_v48  ;;  %550 = vmatprep.mubr.f32.mxu0 %v6956_v0  ;;  %7101 = vst [vmem:[#allocation19_spill] sm:$0xff] %v5895_v39  ;;  %v5898_v46 = vpack.c.bf16 %v695_v26, %v691_v23  ;;  %7103 = vst [vmem:[#allocation21_spill] sm:$0xff] %v5901_v52  ;;  %v5910_v20 = vpack.c.bf16 %v701_v11, %v697_v3  ;;  %v703_v22 = vld [vmem:[#allocation7 + $0x178] sm:$0xff]  ;;  %v696_v23 = vld [vmem:[#allocation7 + $0x140] sm:$0xff] }
  0x68   :  { %621 = vmatprep.mubr.f32.mxu1 %v6956_v0  ;;  %3694 = vmatprep.subr.bf16.mxu0 %v5839_v54  ;;  %7094 = vst [vmem:[#allocation12_spill] sm:$0xff] %v5872_v42  ;;  %7099 = vst [vmem:[#allocation17_spill] sm:$0xff] %v5889_v27  ;;  %v700_v26 = vld [vmem:[#allocation7 + $0x160] sm:$0xff]  ;;  %v5912_v40 = vpack.c.bf16 %v703_v22, %v699_v16  ;;  %v702_v50 = vld [vmem:[#allocation7 + $0x170] sm:$0xff] }
  0x69   :  { %551 = vmatmul.mubr.f32.vlgmr.msra.gmra.mrb[0].mxu0 %v6956_v0  ;;  %3758 = vmatprep.subr.bf16.mxu1 %v5843_v61  ;;  %7102 = vst [vmem:[#allocation20_spill] sm:$0xff] %v5898_v46  ;;  %7104 = vst [vmem:[#allocation22_spill] sm:$0xff] %v5905_v1  ;;  %v5914_v45 = vpack.c.bf16 %v700_v26, %v696_v23  ;;  %v709_v3 = vld [vmem:[#allocation7 + $0x1a8] sm:$0xff]  ;;  %v707_v11 = vld [vmem:[#allocation7 + $0x198] sm:$0xff] }
  0x6a   :  { %622 = vmatmul.mubr.f32.vlgmr.msra.gmra.mrb[0].mxu1 %v6956_v0  ;;  %3696 = vmatpush1.bf16.msra.mxu0 %v5847_v4  ;;  %7105 = vst [vmem:[#allocation23_spill] sm:$0xff] %v5910_v20  ;;  %7106 = vst [vmem:[#allocation24_spill] sm:$0xff] %v5912_v40  ;;  %v711_v16 = vld [vmem:[#allocation7 + $0x1b8] sm:$0xff]  ;;  %v704_v22 = vld [vmem:[#allocation7 + $0x180] sm:$0xff] }
  0x6b   :  { %3760 = vmatpush1.bf16.msra.mxu1 %v5851_v7  ;;  %3698 = vmatprep.subr.bf16.mxu0 %v5853_v9  ;;  %7107 = vst [vmem:[#allocation25_spill] sm:$0xff] %v5914_v45  ;;  %v708_v23 = vld [vmem:[#allocation7 + $0x1a0] sm:$0xff]  ;;  %v5924_v26 = vpack.c.bf16 %v711_v16, %v707_v11  ;;  %v719_v11 = vld [vmem:[#allocation7 + $0x1f8] sm:$0xff] }
  0x6c   :  { %3762 = vmatprep.subr.bf16.mxu1 %v5857_v17  ;;  %870 = vmatprep.mubr.f32.mxu0 %v6956_v0  ;;  %v712_v16 = vld [vmem:[#allocation7 + $0x1c0] sm:$0xff] }
  0x6d   :  { %941 = vmatprep.mubr.f32.mxu1 %v6956_v0  ;;  %v5917_v0 = vpack.c.bf16 %v702_v50, %v698_v49  ;;  %7110 = vst [vmem:[#allocation28_spill] sm:$0xff] %v5924_v26  ;;  %v706_v49 = vld [vmem:[#allocation7 + $0x190] sm:$0xff] }
  0x6e   :  { %3700 = vmatpush1.bf16.msra.mxu0 %v5863_v30  ;;  %v710_v50 = vld [vmem:[#allocation7 + $0x1b0] sm:$0xff] }
  0x6f   :  { %3764 = vmatpush1.bf16.msra.mxu1 %v5867_v32  ;;  %3702 = vmatprep.subr.bf16.mxu0 %v5869_v35  ;;  %7108 = vst [vmem:[#allocation26_spill] sm:$0xff] %v5917_v0 }
  0x70   :  { %3766 = vmatprep.subr.bf16.mxu1 %v5872_v42 }
  0x72   :  { %3704 = vmatpush1.bf16.msra.mxu0 %v5877_v57 }
  0x73   :  { %3768 = vmatpush1.bf16.msra.mxu1 %v5881_v58  ;;  %3706 = vmatprep.subr.bf16.mxu0 %v5883_v60 }
  0x74   :  { %3770 = vmatprep.subr.bf16.mxu1 %v5886_v13 }
  0x76   :  { %3708 = vmatpush1.bf16.msra.mxu0 %v5889_v27 }
  0x77   :  { %3772 = vmatpush1.bf16.msra.mxu1 %v5893_v36  ;;  %3710 = vmatprep.subr.bf16.mxu0 %v5895_v39  ;;  %v771_v39 = vld [vmem:[#allocation7 + $0x398] sm:$0xff] }
  0x78   :  { %3774 = vmatprep.subr.bf16.mxu1 %v5898_v46  ;;  %v5926_v46 = vpack.c.bf16 %v708_v23, %v704_v22  ;;  %v716_v22 = vld [vmem:[#allocation7 + $0x1e0] sm:$0xff]  ;;  %v775_v36 = vld [vmem:[#allocation7 + $0x3b8] sm:$0xff] }
  0x7a   :  { %3712 = vmatpush1.bf16.msra.mxu0 %v5901_v52  ;;  %7111 = vst [vmem:[#allocation29_spill] sm:$0xff] %v5926_v46 }
  0x7b   :  { %3776 = vmatpush1.bf16.msra.mxu1 %v5905_v1  ;;  %3714 = vmatprep.subr.bf16.mxu0 %v5910_v20  ;;  %v705_v1 = vld [vmem:[#allocation7 + $0x188] sm:$0xff]  ;;  %v5938_v20 = vpack.c.bf16 %v716_v22, %v712_v16  ;;  %v724_v16 = vld [vmem:[#allocation7 + $0x220] sm:$0xff] }
  0x7c   :  { %3778 = vmatprep.subr.bf16.mxu1 %v5912_v40  ;;  %v5922_v52 = vpack.c.bf16 %v709_v3, %v705_v1  ;;  %v5929_v40 = vpack.c.bf16 %v710_v50, %v706_v49  ;;  %v717_v1 = vld [vmem:[#allocation7 + $0x1e8] sm:$0xff]  ;;  %v715_v3 = vld [vmem:[#allocation7 + $0x1d8] sm:$0xff]  ;;  %v714_v49 = vld [vmem:[#allocation7 + $0x1d0] sm:$0xff] }
  0x7d   :  { %v5936_v23 = vpack.c.bf16 %v719_v11, %v715_v3  ;;  %7115 = vst [vmem:[#allocation33_spill] sm:$0xff] %v5938_v20  ;;  %v718_v50 = vld [vmem:[#allocation7 + $0x1f0] sm:$0xff]  ;;  %v727_v3 = vld [vmem:[#allocation7 + $0x238] sm:$0xff]  ;;  %v720_v11 = vld [vmem:[#allocation7 + $0x200] sm:$0xff] }
  0x7e   :  { %3716 = vmatpush1.bf16.msra.mxu0 %v5914_v45  ;;  %7109 = vst [vmem:[#allocation27_spill] sm:$0xff] %v5922_v52  ;;  %7112 = vst [vmem:[#allocation30_spill] sm:$0xff] %v5929_v40 }
  0x7f   :  { %3780 = vmatpush1.bf16.msra.mxu1 %v5917_v0  ;;  %3718 = vmatprep.subr.bf16.mxu0 %v5922_v52  ;;  %v713_v0 = vld [vmem:[#allocation7 + $0x1c8] sm:$0xff]  ;;  %7114 = vst [vmem:[#allocation32_spill] sm:$0xff] %v5936_v23  ;;  %v5950_v52 = vpack.c.bf16 %v724_v16, %v720_v11  ;;  %v732_v11 = vld [vmem:[#allocation7 + $0x260] sm:$0xff] }
  0x80   :  { %3782 = vmatprep.subr.bf16.mxu1 %v5924_v26  ;;  %v5934_v45 = vpack.c.bf16 %v717_v1, %v713_v0  ;;  %v5941_v26 = vpack.c.bf16 %v718_v50, %v714_v49  ;;  %v725_v0 = vld [vmem:[#allocation7 + $0x228] sm:$0xff]  ;;  %v723_v1 = vld [vmem:[#allocation7 + $0x218] sm:$0xff]  ;;  %v722_v49 = vld [vmem:[#allocation7 + $0x210] sm:$0xff] }
  0x81   :  { %v5948_v22 = vpack.c.bf16 %v727_v3, %v723_v1  ;;  %7119 = vst [vmem:[#allocation37_spill] sm:$0xff] %v5950_v52  ;;  %v726_v50 = vld [vmem:[#allocation7 + $0x230] sm:$0xff]  ;;  %v735_v1 = vld [vmem:[#allocation7 + $0x278] sm:$0xff]  ;;  %v728_v3 = vld [vmem:[#allocation7 + $0x240] sm:$0xff] }
  0x82   :  { %3720 = vmatpush1.bf16.msra.mxu0 %v5926_v46  ;;  %7113 = vst [vmem:[#allocation31_spill] sm:$0xff] %v5934_v45  ;;  %7116 = vst [vmem:[#allocation34_spill] sm:$0xff] %v5941_v26 }
  0x83   :  { %3784 = vmatpush1.bf16.msra.mxu1 %v5929_v40  ;;  %3722 = vmatprep.subr.bf16.mxu0 %v5934_v45  ;;  %v721_v40 = vld [vmem:[#allocation7 + $0x208] sm:$0xff]  ;;  %7118 = vst [vmem:[#allocation36_spill] sm:$0xff] %v5948_v22  ;;  %v5962_v45 = vpack.c.bf16 %v732_v11, %v728_v3  ;;  %v740_v3 = vld [vmem:[#allocation7 + $0x2a0] sm:$0xff] }
  0x84   :  { %3786 = vmatprep.subr.bf16.mxu1 %v5936_v23  ;;  %v5946_v46 = vpack.c.bf16 %v725_v0, %v721_v40  ;;  %v5953_v23 = vpack.c.bf16 %v726_v50, %v722_v49  ;;  %v733_v40 = vld [vmem:[#allocation7 + $0x268] sm:$0xff]  ;;  %v731_v0 = vld [vmem:[#allocation7 + $0x258] sm:$0xff]  ;;  %v730_v49 = vld [vmem:[#allocation7 + $0x250] sm:$0xff] }
  0x85   :  { %v5960_v16 = vpack.c.bf16 %v735_v1, %v731_v0  ;;  %7123 = vst [vmem:[#allocation41_spill] sm:$0xff] %v5962_v45  ;;  %v734_v50 = vld [vmem:[#allocation7 + $0x270] sm:$0xff]  ;;  %v743_v0 = vld [vmem:[#allocation7 + $0x2b8] sm:$0xff]  ;;  %v736_v1 = vld [vmem:[#allocation7 + $0x280] sm:$0xff] }
  0x86   :  { %3724 = vmatpush1.bf16.msra.mxu0 %v5938_v20  ;;  %7117 = vst [vmem:[#allocation35_spill] sm:$0xff] %v5946_v46  ;;  %7120 = vst [vmem:[#allocation38_spill] sm:$0xff] %v5953_v23 }
  0x87   :  { %3788 = vmatpush1.bf16.msra.mxu1 %v5941_v26  ;;  %3726 = vmatprep.subr.bf16.mxu0 %v5946_v46  ;;  %v729_v26 = vld [vmem:[#allocation7 + $0x248] sm:$0xff]  ;;  %7122 = vst [vmem:[#allocation40_spill] sm:$0xff] %v5960_v16  ;;  %v5974_v46 = vpack.c.bf16 %v740_v3, %v736_v1  ;;  %v748_v1 = vld [vmem:[#allocation7 + $0x2e0] sm:$0xff] }
  0x88   :  { %3790 = vmatprep.subr.bf16.mxu1 %v5948_v22  ;;  %v5958_v20 = vpack.c.bf16 %v733_v40, %v729_v26  ;;  %v5965_v22 = vpack.c.bf16 %v734_v50, %v730_v49  ;;  %v741_v26 = vld [vmem:[#allocation7 + $0x2a8] sm:$0xff]  ;;  %v739_v40 = vld [vmem:[#allocation7 + $0x298] sm:$0xff]  ;;  %v738_v49 = vld [vmem:[#allocation7 + $0x290] sm:$0xff] }
  0x89   :  { %v5972_v11 = vpack.c.bf16 %v743_v0, %v739_v40  ;;  %7127 = vst [vmem:[#allocation45_spill] sm:$0xff] %v5974_v46  ;;  %v742_v50 = vld [vmem:[#allocation7 + $0x2b0] sm:$0xff]  ;;  %v751_v40 = vld [vmem:[#allocation7 + $0x2f8] sm:$0xff]  ;;  %v744_v0 = vld [vmem:[#allocation7 + $0x2c0] sm:$0xff] }
  0x8a   :  { %3728 = vmatpush1.bf16.msra.mxu0 %v5950_v52  ;;  %7121 = vst [vmem:[#allocation39_spill] sm:$0xff] %v5958_v20  ;;  %7124 = vst [vmem:[#allocation42_spill] sm:$0xff] %v5965_v22 }
  0x8b   :  { %3792 = vmatpush1.bf16.msra.mxu1 %v5953_v23  ;;  %3730 = vmatprep.subr.bf16.mxu0 %v5958_v20  ;;  %v737_v23 = vld [vmem:[#allocation7 + $0x288] sm:$0xff]  ;;  %7126 = vst [vmem:[#allocation44_spill] sm:$0xff] %v5972_v11  ;;  %v5986_v20 = vpack.c.bf16 %v748_v1, %v744_v0  ;;  %v756_v0 = vld [vmem:[#allocation7 + $0x320] sm:$0xff] }
  0x8c   :  { %3794 = vmatprep.subr.bf16.mxu1 %v5960_v16  ;;  %v5970_v52 = vpack.c.bf16 %v741_v26, %v737_v23  ;;  %v5977_v16 = vpack.c.bf16 %v742_v50, %v738_v49  ;;  %v749_v23 = vld [vmem:[#allocation7 + $0x2e8] sm:$0xff]  ;;  %v747_v26 = vld [vmem:[#allocation7 + $0x2d8] sm:$0xff]  ;;  %v746_v49 = vld [vmem:[#allocation7 + $0x2d0] sm:$0xff] }
  0x8d   :  { %v5984_v3 = vpack.c.bf16 %v751_v40, %v747_v26  ;;  %7131 = vst [vmem:[#allocation49_spill] sm:$0xff] %v5986_v20  ;;  %v750_v50 = vld [vmem:[#allocation7 + $0x2f0] sm:$0xff]  ;;  %v759_v26 = vld [vmem:[#allocation7 + $0x338] sm:$0xff]  ;;  %v752_v40 = vld [vmem:[#allocation7 + $0x300] sm:$0xff] }
  0x8e   :  { %3732 = vmatpush1.bf16.msra.mxu0 %v5962_v45  ;;  %7125 = vst [vmem:[#allocation43_spill] sm:$0xff] %v5970_v52  ;;  %7128 = vst [vmem:[#allocation46_spill] sm:$0xff] %v5977_v16 }
  0x8f   :  { %3796 = vmatpush1.bf16.msra.mxu1 %v5965_v22  ;;  %3734 = vmatprep.subr.bf16.mxu0 %v5970_v52  ;;  %v745_v22 = vld [vmem:[#allocation7 + $0x2c8] sm:$0xff]  ;;  %7130 = vst [vmem:[#allocation48_spill] sm:$0xff] %v5984_v3  ;;  %v5998_v52 = vpack.c.bf16 %v756_v0, %v752_v40  ;;  %v764_v40 = vld [vmem:[#allocation7 + $0x360] sm:$0xff] }
  0x90   :  { %3798 = vmatprep.subr.bf16.mxu1 %v5972_v11  ;;  %v5982_v45 = vpack.c.bf16 %v749_v23, %v745_v22  ;;  %v5989_v11 = vpack.c.bf16 %v750_v50, %v746_v49  ;;  %v757_v22 = vld [vmem:[#allocation7 + $0x328] sm:$0xff]  ;;  %v755_v23 = vld [vmem:[#allocation7 + $0x318] sm:$0xff]  ;;  %v754_v49 = vld [vmem:[#allocation7 + $0x310] sm:$0xff] }
  0x91   :  { %v5996_v1 = vpack.c.bf16 %v759_v26, %v755_v23  ;;  %7135 = vst [vmem:[#allocation53_spill] sm:$0xff] %v5998_v52  ;;  %v758_v50 = vld [vmem:[#allocation7 + $0x330] sm:$0xff]  ;;  %v767_v23 = vld [vmem:[#allocation7 + $0x378] sm:$0xff]  ;;  %v760_v26 = vld [vmem:[#allocation7 + $0x340] sm:$0xff] }
  0x92   :  { %3736 = vmatpush1.bf16.msra.mxu0 %v5974_v46  ;;  %7129 = vst [vmem:[#allocation47_spill] sm:$0xff] %v5982_v45  ;;  %7132 = vst [vmem:[#allocation50_spill] sm:$0xff] %v5989_v11 }
  0x93   :  { %3800 = vmatpush1.bf16.msra.mxu1 %v5977_v16  ;;  %3738 = vmatprep.subr.bf16.mxu0 %v5982_v45  ;;  %v753_v16 = vld [vmem:[#allocation7 + $0x308] sm:$0xff]  ;;  %7134 = vst [vmem:[#allocation52_spill] sm:$0xff] %v5996_v1  ;;  %v6010_v45 = vpack.c.bf16 %v764_v40, %v760_v26  ;;  %v770_v26 = vld [vmem:[#allocation7 + $0x390] sm:$0xff] }
  0x94   :  { %3802 = vmatprep.subr.bf16.mxu1 %v5984_v3  ;;  %v5994_v46 = vpack.c.bf16 %v757_v22, %v753_v16  ;;  %v6001_v3 = vpack.c.bf16 %v758_v50, %v754_v49  ;;  %v765_v16 = vld [vmem:[#allocation7 + $0x368] sm:$0xff]  ;;  %v763_v22 = vld [vmem:[#allocation7 + $0x358] sm:$0xff]  ;;  %v762_v49 = vld [vmem:[#allocation7 + $0x350] sm:$0xff] }
  0x95   :  { %v6008_v0 = vpack.c.bf16 %v767_v23, %v763_v22  ;;  %7139 = vst [vmem:[#allocation57_spill] sm:$0xff] %v6010_v45  ;;  %v766_v50 = vld [vmem:[#allocation7 + $0x370] sm:$0xff]  ;;  %v768_v22 = vld [vmem:[#allocation7 + $0x380] sm:$0xff] }
  0x96   :  { %3740 = vmatpush1.bf16.msra.mxu0 %v5986_v20  ;;  %7133 = vst [vmem:[#allocation51_spill] sm:$0xff] %v5994_v46  ;;  %7136 = vst [vmem:[#allocation54_spill] sm:$0xff] %v6001_v3  ;;  %v772_v23 = vld [vmem:[#allocation7 + $0x3a0] sm:$0xff] }
  0x97   :  { %3804 = vmatpush1.bf16.msra.mxu1 %v5989_v11  ;;  %3742 = vmatprep.subr.bf16.mxu0 %v5994_v46  ;;  %v761_v11 = vld [vmem:[#allocation7 + $0x348] sm:$0xff]  ;;  %7138 = vst [vmem:[#allocation56_spill] sm:$0xff] %v6008_v0  ;;  %v6022_v40 = vpack.c.bf16 %v772_v23, %v768_v22  ;;  %v782_v22 = vld [vmem:[#allocation7 + $0x3f0] sm:$0xff] }
  0x98   :  { %3806 = vmatprep.subr.bf16.mxu1 %v5996_v1  ;;  %v6006_v20 = vpack.c.bf16 %v765_v16, %v761_v11  ;;  %v769_v46 = vld [vmem:[#allocation7 + $0x388] sm:$0xff]  ;;  %v6019_v16 = vpack.c.bf16 %v775_v36, %v771_v39  ;;  %v779_v36 = vld [vmem:[#allocation7 + $0x3d8] sm:$0xff] }
  0x99   :  { %v773_v1 = vld [vmem:[#allocation7 + $0x3a8] sm:$0xff]  ;;  %7143 = vst [vmem:[#allocation61_spill] sm:$0xff] %v6022_v40  ;;  %v783_v39 = vld [vmem:[#allocation7 + $0x3f8] sm:$0xff] }
  0x9a   :  { %3744 = vmatpush1.bf16.msra.mxu0 %v5998_v52  ;;  %7137 = vst [vmem:[#allocation55_spill] sm:$0xff] %v6006_v20  ;;  %v6013_v52 = vpack.c.bf16 %v766_v50, %v762_v49  ;;  %v6017_v11 = vpack.c.bf16 %v773_v1, %v769_v46  ;;  %7142 = vst [vmem:[#allocation60_spill] sm:$0xff] %v6019_v16  ;;  %v774_v49 = vld [vmem:[#allocation7 + $0x3b0] sm:$0xff]  ;;  %v777_v50 = vld [vmem:[#allocation7 + $0x3c8] sm:$0xff] }
  0x9b   :  { %3808 = vmatpush1.bf16.msra.mxu1 %v6001_v3  ;;  %3746 = vmatprep.subr.bf16.mxu0 %v6006_v20  ;;  %v781_v20 = vld [vmem:[#allocation7 + $0x3e8] sm:$0xff]  ;;  %v776_v1 = vld [vmem:[#allocation7 + $0x3c0] sm:$0xff] }
  0x9c   :  { %7140 = vst [vmem:[#allocation58_spill] sm:$0xff] %v6013_v52  ;;  %3810 = vmatprep.subr.bf16.mxu1 %v6008_v0  ;;  %7141 = vst [vmem:[#allocation59_spill] sm:$0xff] %v6017_v11  ;;  %v6026_v0 = vpack.c.bf16 %v774_v49, %v770_v26  ;;  %v6028_v46 = vpack.c.bf16 %v781_v20, %v777_v50  ;;  %v780_v3 = vld [vmem:[#allocation7 + $0x3e0] sm:$0xff]  ;;  %v112_v20 = vlaneseq }
  0x9d   :  { %v6033_v23 = vpack.c.bf16 %v780_v3, %v776_v1 }
  0x9e   :  { %3748 = vmatpush1.bf16.msra.mxu0 %v6010_v45  ;;  %7144 = vst [vmem:[#allocation62_spill] sm:$0xff] %v6026_v0  ;;  %7145 = vst [vmem:[#allocation63_spill] sm:$0xff] %v6028_v46  ;;  %v6030_v45 = vpack.c.bf16 %v783_v39, %v779_v36  ;;  %v6044_v49 = vshrl.u32 %v112_v20, 7 }
  0x9f   :  { %3812 = vmatpush1.bf16.msra.mxu1 %v6013_v52  ;;  %3750 = vmatprep.subr.bf16.mxu0 %v6017_v11  ;;  %v778_v52 = vld [vmem:[#allocation7 + $0x3d0] sm:$0xff]  ;;  %7147 = vst [vmem:[#allocation65_spill] sm:$0xff] %v6033_v23 }
  0xa0   :  { %3814 = vmatprep.subr.bf16.mxu1 %v6019_v16  ;;  %7146 = vst [vmem:[#allocation64_spill] sm:$0xff] %v6030_v45  ;;  %v6037_v26 = vpack.c.bf16 %v782_v22, %v778_v52  ;;  %7149 = vst [vmem:[#allocation67_spill] sm:$0xff] %v6044_v49  ;;  %v7052_v3 = vsub.s32 0, %v6044_v49  ;;  %v110_v52 = vld [vmem:[%s6949_s2] sm:$0xf]  ;;  %v7053_v50 = vsub.s32 1, %v6044_v49 }
  0xa1   :  { %v7062_v22 = vsub.s32 2, %v6044_v49 }
  0xa2   :  { %3752 = vmatpush1.bf16.msra.mxu0 %v6022_v40  ;;  %7148 = vst [vmem:[#allocation66_spill] sm:$0xff] %v6037_v26  ;;  %v6053_v36 = vrot.slane %v110_v52, %v7052_v3  ;;  %v6057_v39 = vrot.slane %v110_v52, %v7053_v50  ;;  %v7069_v50 = vsub.s32 3, %v6044_v49 }
  0xa3   :  { %3816 = vmatpush1.bf16.msra.mxu1 %v6026_v0  ;;  %3754 = vmatprep.subr.bf16.mxu0 %v6028_v46  ;;  %v6064_v46 = vrot.slane %v110_v52, %v7062_v22 }
  0xa4   :  { %3818 = vmatprep.subr.bf16.mxu1 %v6030_v45  ;;  %7150 = vst [vmem:[#allocation68_spill] sm:$0xff] %v6053_v36  ;;  %7151 = vst [vmem:[#allocation69_spill] sm:$0xff] %v6057_v39 }
  0xa5   :  { %7152 = vst [vmem:[#allocation70_spill] sm:$0xff] %v6064_v46 }
  0xa6   :  { %3756 = vmatpush1.bf16.msra.mxu0 %v6033_v23 }
  0xa7   :  { %3820 = vmatpush1.bf16.msra.mxu1 %v6037_v26  ;;  %3822 = vmatprep.subr.bf16.mxu0 %v5694_v53 }
  0xa8   :  { %3854 = vmatprep.subr.bf16.mxu1 %v5696_v56 }
 0x13c   :  { %v552_v1 = vpop.f32.mrb[0].mxu0 }
 0x13d   :  { %v5189_v20 = vadd.f32 %v552_v1, %v6053_v36  ;;  %v623_v56 = vpop.f32.mrb[0].mxu1  ;;  %v554_v53 = vpop.f32.mrb[1].mxu0  ;;  %v6070_v1 = vrot.slane %v110_v52, %v7069_v50  ;;  %v7168_v50 = vld [vmem:[#allocation32_spill] sm:$0xff] }
 0x13e   :  { %v5190_v26 = vadd.f32 %v554_v53, %v6057_v39  ;;  %v625_v23 = vpop.f32.mrb[1].mxu1  ;;  %v5205_v0 = vadd.f32 %v623_v56, %v6064_v46 }
 0x13f   :  { %v3496_v45 = vmul.f32 -1.442695, %v5189_v20  ;;  %v5206_v53 = vadd.f32 %v625_v23, %v6070_v1 }
 0x140   :  { %v3497_v3 = vmul.f32 -1.442695, %v5190_v26  ;;  %v3498_v36 = vmul.f32 -1.442695, %v5205_v0 }
 0x141   :  { %5261 = vpow2.f32 %v3496_v45 }
 0x142   :  { %5263 = vpow2.f32 %v3497_v3 }
 0x143   :  { %5265 = vpow2.f32 %v3498_v36 }
 0x144   :  { %5267 = vtanh.f32 %v5206_v53  ;;  %v7159_v53 = vld [vmem:[#allocation23_spill] sm:$0xff] }
 0x14b   :  { %v5262_v39 = vpop.eup %5261 }
 0x14c   :  { %v641_v20 = vadd.f32 1.0, %v5262_v39  ;;  %v5264_v40 = vpop.eup %5263  ;;  %v7157_v39 = vld [vmem:[#allocation21_spill] sm:$0xff] }
 0x14d   :  { %v642_v26 = vadd.f32 1.0, %v5264_v40  ;;  %v5266_v45 = vpop.eup %5265  ;;  %v7153_v40 = vmov 0.0  }
 0x14e   :  { %5269 = vrcp.f32 %v641_v20  ;;  %v5268_v22 = vpop.eup %5267  ;;  %v643_v46 = vadd.f32 1.0, %v5266_v45  ;;  %v7160_v20 = vld [vmem:[#allocation24_spill] sm:$0xff]  ;;  %v7162_v45 = vld [vmem:[#allocation26_spill] sm:$0xff] }
 0x14f   :  { %5271 = vrcp.f32 %v642_v26  ;;  %v7161_v26 = vld [vmem:[#allocation25_spill] sm:$0xff] }
 0x150   :  { %5273 = vrcp.f32 %v643_v46  ;;  %v7155_v46 = vld [vmem:[#allocation19_spill] sm:$0xff] }
 0x158   :  { %v5270_v3 = vpop.eup %5269 }
 0x159   :  { %v652_v16 = vmul.f32 %v5270_v3, %v5268_v22  ;;  %v5272_v56 = vpop.eup %5271  ;;  %v7158_v22 = vld [vmem:[#allocation22_spill] sm:$0xff]  ;;  %v7163_v3 = vld [vmem:[#allocation27_spill] sm:$0xff] }
 0x15a   :  { %v651_v49 = vmul.f32 0.0, %v5272_v56  ;;  %v5274_v0 = vpop.eup %5273  ;;  %v7164_v56 = vld [vmem:[#allocation28_spill] sm:$0xff] }
 0x15c   :  { %v6073_v52 = vadd.f32 %v652_v16, %v651_v49  ;;  %v7154_v16 = vld [vmem:[#allocation18_spill] sm:$0xff]  ;;  %v7156_v49 = vld [vmem:[#allocation20_spill] sm:$0xff] }
 0x15e   :  { %5275 = vtanh.f32 %v6073_v52 }
 0x168   :  { %v5276_v23 = vpop.eup %5275 }
 0x169   :  { %v655_v36 = vmul.f32 %v5276_v23, %v5274_v0  ;;  %v7165_v0 = vld [vmem:[#allocation29_spill] sm:$0xff]  ;;  %v7166_v23 = vld [vmem:[#allocation30_spill] sm:$0xff] }
 0x16b   :  { %871 = vmatmul.mubr.f32.vlgmr.msra.gmra.mrb[16].mxu0 %v655_v36  ;;  %942 = vmatmul.mubr.f32.vlgmr.msra.gmra.mrb[16].mxu1 %v655_v36 }
 0x16c   :  { %3824 = vmatpush1.bf16.msra.mxu0 %v5701_v62  ;;  %3856 = vmatpush1.bf16.msra.mxu1 %v5704_v2 }
 0x16d   :  { %3826 = vmatprep.subr.bf16.mxu0 %v5707_v5  ;;  %3858 = vmatprep.subr.bf16.mxu1 %v5710_v8 }
 0x16e   :  { %1043 = vmatprep.mubr.f32.mxu0 %v7153_v40  ;;  %1114 = vmatprep.mubr.f32.mxu1 %v7153_v40 }
 0x170   :  { %3828 = vmatpush1.bf16.msra.mxu0 %v5717_v12  ;;  %3860 = vmatpush1.bf16.msra.mxu1 %v5721_v15 }
 0x171   :  { %3830 = vmatprep.subr.bf16.mxu0 %v5725_v18  ;;  %3862 = vmatprep.subr.bf16.mxu1 %v5729_v21 }
 0x174   :  { %3832 = vmatpush1.bf16.msra.mxu0 %v5736_v25  ;;  %3864 = vmatpush1.bf16.msra.mxu1 %v5740_v28 }
 0x175   :  { %3834 = vmatprep.subr.bf16.mxu0 %v5744_v31  ;;  %3866 = vmatprep.subr.bf16.mxu1 %v5748_v34 }
 0x178   :  { %3836 = vmatpush1.bf16.msra.mxu0 %v5755_v38  ;;  %3868 = vmatpush1.bf16.msra.mxu1 %v5759_v41 }
 0x179   :  { %3838 = vmatprep.subr.bf16.mxu0 %v5763_v44  ;;  %3870 = vmatprep.subr.bf16.mxu1 %v5767_v47 }
 0x17c   :  { %3840 = vmatpush1.bf16.msra.mxu0 %v5774_v51  ;;  %3872 = vmatpush1.bf16.msra.mxu1 %v5778_v55 }
 0x17d   :  { %3842 = vmatprep.subr.bf16.mxu0 %v5782_v59  ;;  %3874 = vmatprep.subr.bf16.mxu1 %v5786_v63 }
 0x180   :  { %3844 = vmatpush1.bf16.msra.mxu0 %v5793_v6  ;;  %3876 = vmatpush1.bf16.msra.mxu1 %v5797_v10 }
 0x181   :  { %3846 = vmatprep.subr.bf16.mxu0 %v5801_v14  ;;  %3878 = vmatprep.subr.bf16.mxu1 %v5805_v19 }
 0x184   :  { %3848 = vmatpush1.bf16.msra.mxu0 %v5812_v24  ;;  %3880 = vmatpush1.bf16.msra.mxu1 %v5816_v29 }
 0x185   :  { %3850 = vmatprep.subr.bf16.mxu0 %v5820_v33  ;;  %3882 = vmatprep.subr.bf16.mxu1 %v5824_v37 }
 0x188   :  { %3852 = vmatpush1.bf16.msra.mxu0 %v5831_v43  ;;  %3884 = vmatpush1.bf16.msra.mxu1 %v5835_v48 }
 0x189   :  { %3886 = vmatprep.subr.bf16.mxu0 %v5839_v54  ;;  %3950 = vmatprep.subr.bf16.mxu1 %v5843_v61 }
 0x18b   :  { %1044 = vmatmul.mubr.f32.vlgmr.msra.gmra.mrb[2].mxu0 %v655_v36  ;;  %1115 = vmatmul.mubr.f32.vlgmr.msra.gmra.mrb[2].mxu1 %v655_v36  ;;  %v7167_v36 = vld [vmem:[#allocation31_spill] sm:$0xff] }
 0x18c   :  { %3888 = vmatpush1.bf16.msra.mxu0 %v5847_v4  ;;  %3952 = vmatpush1.bf16.msra.mxu1 %v5851_v7 }
 0x18d   :  { %3890 = vmatprep.subr.bf16.mxu0 %v5853_v9  ;;  %3954 = vmatprep.subr.bf16.mxu1 %v5857_v17 }
 0x190   :  { %3892 = vmatpush1.bf16.msra.mxu0 %v5863_v30  ;;  %3956 = vmatpush1.bf16.msra.mxu1 %v5867_v32 }
 0x191   :  { %3894 = vmatprep.subr.bf16.mxu0 %v5869_v35  ;;  %3958 = vmatprep.subr.bf16.mxu1 %v5872_v42 }
 0x194   :  { %3896 = vmatpush1.bf16.msra.mxu0 %v5877_v57  ;;  %3960 = vmatpush1.bf16.msra.mxu1 %v5881_v58 }
 0x195   :  { %3898 = vmatprep.subr.bf16.mxu0 %v5883_v60  ;;  %3962 = vmatprep.subr.bf16.mxu1 %v5886_v13 }
 0x198   :  { %3900 = vmatpush1.bf16.msra.mxu0 %v5889_v27  ;;  %3964 = vmatpush1.bf16.msra.mxu1 %v7154_v16 }
 0x199   :  { %3902 = vmatprep.subr.bf16.mxu0 %v7155_v46  ;;  %3966 = vmatprep.subr.bf16.mxu1 %v7156_v49 }
 0x19c   :  { %3904 = vmatpush1.bf16.msra.mxu0 %v7157_v39  ;;  %3968 = vmatpush1.bf16.msra.mxu1 %v7158_v22  ;;  %v7169_v22 = vld [vmem:[#allocation33_spill] sm:$0xff] }
 0x19d   :  { %3906 = vmatprep.subr.bf16.mxu0 %v7159_v53  ;;  %3970 = vmatprep.subr.bf16.mxu1 %v7160_v20  ;;  %v7170_v53 = vld [vmem:[#allocation34_spill] sm:$0xff]  ;;  %v7171_v20 = vld [vmem:[#allocation35_spill] sm:$0xff] }
 0x1a0   :  { %3908 = vmatpush1.bf16.msra.mxu0 %v7161_v26  ;;  %3972 = vmatpush1.bf16.msra.mxu1 %v7162_v45  ;;  %v7172_v26 = vld [vmem:[#allocation36_spill] sm:$0xff]  ;;  %v7173_v45 = vld [vmem:[#allocation37_spill] sm:$0xff] }
 0x1a1   :  { %3910 = vmatprep.subr.bf16.mxu0 %v7163_v3  ;;  %3974 = vmatprep.subr.bf16.mxu1 %v7164_v56  ;;  %v7174_v3 = vld [vmem:[#allocation38_spill] sm:$0xff]  ;;  %v7175_v56 = vld [vmem:[#allocation39_spill] sm:$0xff] }
 0x1a4   :  { %3912 = vmatpush1.bf16.msra.mxu0 %v7165_v0  ;;  %3976 = vmatpush1.bf16.msra.mxu1 %v7166_v23  ;;  %v7176_v0 = vld [vmem:[#allocation40_spill] sm:$0xff]  ;;  %v7177_v23 = vld [vmem:[#allocation41_spill] sm:$0xff] }
 0x1a5   :  { %3914 = vmatprep.subr.bf16.mxu0 %v7167_v36  ;;  %3978 = vmatprep.subr.bf16.mxu1 %v7168_v50  ;;  %v7178_v36 = vld [vmem:[#allocation42_spill] sm:$0xff]  ;;  %v7179_v50 = vld [vmem:[#allocation43_spill] sm:$0xff] }
 0x1a8   :  { %3916 = vmatpush1.bf16.msra.mxu0 %v7169_v22  ;;  %3980 = vmatpush1.bf16.msra.mxu1 %v7170_v53  ;;  %v7180_v22 = vld [vmem:[#allocation44_spill] sm:$0xff]  ;;  %v7181_v53 = vld [vmem:[#allocation45_spill] sm:$0xff] }
 0x1a9   :  { %3918 = vmatprep.subr.bf16.mxu0 %v7171_v20  ;;  %3982 = vmatprep.subr.bf16.mxu1 %v7172_v26  ;;  %v7182_v20 = vld [vmem:[#allocation46_spill] sm:$0xff]  ;;  %v7183_v26 = vld [vmem:[#allocation47_spill] sm:$0xff] }
 0x1ac   :  { %3920 = vmatpush1.bf16.msra.mxu0 %v7173_v45  ;;  %3984 = vmatpush1.bf16.msra.mxu1 %v7174_v3  ;;  %v7184_v45 = vld [vmem:[#allocation48_spill] sm:$0xff]  ;;  %v7185_v3 = vld [vmem:[#allocation49_spill] sm:$0xff] }
 0x1ad   :  { %3922 = vmatprep.subr.bf16.mxu0 %v7175_v56  ;;  %3986 = vmatprep.subr.bf16.mxu1 %v7176_v0  ;;  %v7186_v56 = vld [vmem:[#allocation50_spill] sm:$0xff]  ;;  %v7187_v0 = vld [vmem:[#allocation51_spill] sm:$0xff] }
 0x1b0   :  { %3924 = vmatpush1.bf16.msra.mxu0 %v7177_v23  ;;  %3988 = vmatpush1.bf16.msra.mxu1 %v7178_v36  ;;  %v7188_v23 = vld [vmem:[#allocation52_spill] sm:$0xff]  ;;  %v7189_v36 = vld [vmem:[#allocation53_spill] sm:$0xff] }
 0x1b1   :  { %3926 = vmatprep.subr.bf16.mxu0 %v7179_v50  ;;  %3990 = vmatprep.subr.bf16.mxu1 %v7180_v22  ;;  %v7190_v50 = vld [vmem:[#allocation54_spill] sm:$0xff]  ;;  %v7191_v22 = vld [vmem:[#allocation55_spill] sm:$0xff] }
 0x1b4   :  { %3928 = vmatpush1.bf16.msra.mxu0 %v7181_v53  ;;  %3992 = vmatpush1.bf16.msra.mxu1 %v7182_v20  ;;  %v7192_v53 = vld [vmem:[#allocation56_spill] sm:$0xff]  ;;  %v7193_v20 = vld [vmem:[#allocation57_spill] sm:$0xff] }
 0x1b5   :  { %3930 = vmatprep.subr.bf16.mxu0 %v7183_v26  ;;  %3994 = vmatprep.subr.bf16.mxu1 %v7184_v45  ;;  %v7194_v26 = vld [vmem:[#allocation58_spill] sm:$0xff] }
 0x1b8   :  { %3932 = vmatpush1.bf16.msra.mxu0 %v7185_v3  ;;  %3996 = vmatpush1.bf16.msra.mxu1 %v7186_v56  ;;  %v7195_v3 = vld [vmem:[#allocation60_spill] sm:$0xff]  ;;  %v7196_v56 = vld [vmem:[#allocation61_spill] sm:$0xff] }
 0x1b9   :  { %3934 = vmatprep.subr.bf16.mxu0 %v7187_v0  ;;  %3998 = vmatprep.subr.bf16.mxu1 %v7188_v23  ;;  %v7197_v0 = vld [vmem:[#allocation62_spill] sm:$0xff]  ;;  %v7198_v23 = vld [vmem:[#allocation63_spill] sm:$0xff] }
 0x1bc   :  { %3936 = vmatpush1.bf16.msra.mxu0 %v7189_v36  ;;  %4000 = vmatpush1.bf16.msra.mxu1 %v7190_v50  ;;  %v7199_v36 = vld [vmem:[#allocation64_spill] sm:$0xff]  ;;  %v7200_v50 = vld [vmem:[#allocation65_spill] sm:$0xff] }
 0x1bd   :  { %3938 = vmatprep.subr.bf16.mxu0 %v7191_v22  ;;  %4002 = vmatprep.subr.bf16.mxu1 %v7192_v53  ;;  %v7201_v22 = vld [vmem:[#allocation66_spill] sm:$0xff] }
 0x1be   :  { %v7202_v53 = vld [vmem:[#allocation10_spill] sm:$0xff] }
 0x1c0   :  { %3940 = vmatpush1.bf16.msra.mxu0 %v7193_v20  ;;  %4004 = vmatpush1.bf16.msra.mxu1 %v7194_v26  ;;  %v7203_v20 = vld [vmem:[#allocation11_spill] sm:$0xff] }
 0x1c1   :  { %3942 = vmatprep.subr.bf16.mxu0 %v6017_v11  ;;  %4006 = vmatprep.subr.bf16.mxu1 %v7195_v3  ;;  %v784_v3 = vld [vmem:[%s6952_s5] sm:$0xf]  ;;  %v7204_v11 = vld [vmem:[#allocation67_spill] sm:$0xff] }
 0x1c2   :  { %v7209_v46 = vsub.s32 2, %v7204_v11 }
 0x1c4   :  { %3944 = vmatpush1.bf16.msra.mxu0 %v7196_v56  ;;  %4008 = vmatpush1.bf16.msra.mxu1 %v7197_v0  ;;  %v7205_v56 = vsub.s32 0, %v7204_v11  ;;  %v6189_v16 = vrot.slane %v784_v3, %v7209_v46 }
 0x1c5   :  { %3946 = vmatprep.subr.bf16.mxu0 %v7198_v23  ;;  %4010 = vmatprep.subr.bf16.mxu1 %v7199_v36  ;;  %v7207_v23 = vsub.s32 1, %v7204_v11 }
 0x1c6   :  { %v6179_v26 = vrot.slane %v784_v3, %v7205_v56  ;;  %7210 = vst [vmem:[#allocation72_spill] sm:$0xff] %v6189_v16  ;;  %v7211_v56 = vsub.s32 3, %v7204_v11 }
 0x1c7   :  { %v6183_v0 = vrot.slane %v784_v3, %v7207_v23 }
 0x1c8   :  { %3948 = vmatpush1.bf16.msra.mxu0 %v7200_v50  ;;  %4012 = vmatpush1.bf16.msra.mxu1 %v7201_v22  ;;  %7206 = vst [vmem:[#allocation67_spill] sm:$0xff] %v6179_v26  ;;  %v6193_v23 = vrot.slane %v784_v3, %v7211_v56 }
 0x1c9   :  { %4014 = vmatprep.subr.bf16.mxu0 %v7202_v53  ;;  %4046 = vmatprep.subr.bf16.mxu1 %v7203_v20  ;;  %7208 = vst [vmem:[#allocation71_spill] sm:$0xff] %v6183_v0 }
 0x1ca   :  { %7212 = vst [vmem:[#allocation73_spill] sm:$0xff] %v6193_v23 }
 0x23e   :  { %v872_v36 = vpop.f32.mrb[16].mxu0  ;;  %v943_v50 = vpop.f32.mrb[16].mxu1 }
 0x23f   :  { %v873_v22 = vadd.f32 %v872_v36, %v6179_v26  ;;  %v874_v45 = vpop.f32.mrb[17].mxu0  ;;  %v945_v53 = vpop.f32.mrb[17].mxu1  ;;  %v944_v27 = vadd.f32 %v943_v50, %v6189_v16 }
 0x240   :  { %v875_v20 = vadd.f32 %v874_v45, %v6183_v0  ;;  %v946_v36 = vadd.f32 %v945_v53, %v6193_v23 }
 0x241   :  { %v3499_v39 = vmul.f32 -1.442695, %v873_v22  ;;  %v3501_v26 = vmul.f32 -1.442695, %v944_v27  ;;  %v7213_v27 = vld [vmem:[#allocation68_spill] sm:$0xff] }
 0x242   :  { %v3500_v49 = vmul.f32 -1.442695, %v875_v20 }
 0x243   :  { %5277 = vpow2.f32 %v3499_v39 }
 0x244   :  { %5279 = vpow2.f32 %v3500_v49 }
 0x245   :  { %5281 = vtanh.f32 %v946_v36 }
 0x246   :  { %5283 = vpow2.f32 %v3501_v26  ;;  %v7214_v26 = vld [vmem:[#allocation69_spill] sm:$0xff] }
 0x24d   :  { %v5278_v13 = vpop.eup %5277 }
 0x24e   :  { %v957_v60 = vadd.f32 1.0, %v5278_v13  ;;  %v5280_v22 = vpop.eup %5279 }
 0x24f   :  { %v958_v39 = vadd.f32 1.0, %v5280_v22  ;;  %v5282_v46 = vpop.eup %5281 }
 0x250   :  { %5285 = vrcp.f32 %v957_v60  ;;  %v5284_v20 = vpop.eup %5283 }
 0x251   :  { %5287 = vrcp.f32 %v958_v39  ;;  %v959_v3 = vadd.f32 1.0, %v5284_v20 }
 0x253   :  { %5289 = vrcp.f32 %v959_v3 }
 0x25a   :  { %v5286_v49 = vpop.eup %5285 }
 0x25b   :  { %v968_v45 = vmul.f32 %v5286_v49, %v5282_v46  ;;  %v5288_v11 = vpop.eup %5287  ;;  %v7215_v46 = vld [vmem:[#allocation70_spill] sm:$0xff] }
 0x25c   :  { %v967_v56 = vmul.f32 0.0, %v5288_v11 }
 0x25d   :  { %v5290_v49 = vpop.eup %5289 }
 0x25e   :  { %v1045_v0 = vpop.f32.mrb[2].mxu0  ;;  %v1116_v50 = vpop.f32.mrb[2].mxu1  ;;  %v6197_v16 = vadd.f32 %v968_v45, %v967_v56 }
 0x25f   :  { %v5191_v53 = vadd.f32 %v1045_v0, %v7213_v27  ;;  %v1047_v13 = vpop.f32.mrb[3].mxu0  ;;  %v1118_v36 = vpop.f32.mrb[3].mxu1  ;;  %v5207_v20 = vadd.f32 %v1116_v50, %v7215_v46 }
 0x260   :  { %v5192_v60 = vadd.f32 %v1047_v13, %v7214_v26  ;;  %5291 = vtanh.f32 %v6197_v16  ;;  %v5208_v11 = vadd.f32 %v1118_v36, %v6070_v1 }
 0x261   :  { %v3502_v22 = vmul.f32 -1.442695, %v5191_v53  ;;  %v3504_v56 = vmul.f32 -1.442695, %v5207_v20 }
 0x262   :  { %v3503_v39 = vmul.f32 -1.442695, %v5192_v60 }
 0x263   :  { %5293 = vpow2.f32 %v3502_v22 }
 0x264   :  { %5295 = vpow2.f32 %v3503_v39 }
 0x265   :  { %5297 = vtanh.f32 %v5208_v11 }
 0x266   :  { %5299 = vpow2.f32 %v3504_v56  ;;  %v7220_v56 = vld [vmem:[#allocation19_spill] sm:$0xff] }
 0x26a   :  { %v5292_v45 = vpop.eup %5291 }
 0x26b   :  { %v971_v23 = vmul.f32 %v5292_v45, %v5290_v49  ;;  %v7219_v45 = vld [vmem:[#allocation18_spill] sm:$0xff] }
 0x26d   :  { %v5294_v0 = vpop.eup %5293  ;;  %1213 = vmatprep.mubr.f32.mxu0 %v971_v23  ;;  %1284 = vmatprep.mubr.f32.mxu1 %v971_v23 }
 0x26e   :  { %v1134_v27 = vadd.f32 1.0, %v5294_v0  ;;  %v5296_v3 = vpop.eup %5295  ;;  %v7221_v0 = vld [vmem:[#allocation20_spill] sm:$0xff] }
 0x26f   :  { %v1135_v53 = vadd.f32 1.0, %v5296_v3  ;;  %v5298_v13 = vpop.eup %5297  ;;  %v7222_v3 = vld [vmem:[#allocation21_spill] sm:$0xff] }
 0x270   :  { %5301 = vrcp.f32 %v1134_v27  ;;  %v5300_v60 = vpop.eup %5299  ;;  %v7217_v27 = vld [vmem:[#allocation16_spill] sm:$0xff] }
 0x271   :  { %5303 = vrcp.f32 %v1135_v53  ;;  %v1136_v46 = vadd.f32 1.0, %v5300_v60  ;;  %v7223_v53 = vld [vmem:[#allocation22_spill] sm:$0xff]  ;;  %v7225_v60 = vld [vmem:[#allocation24_spill] sm:$0xff] }
 0x273   :  { %5305 = vrcp.f32 %v1136_v46  ;;  %v7218_v46 = vld [vmem:[#allocation17_spill] sm:$0xff] }
 0x27a   :  { %v5302_v22 = vpop.eup %5301 }
 0x27b   :  { %v1145_v50 = vmul.f32 %v5302_v22, %v5298_v13  ;;  %v5304_v39 = vpop.eup %5303  ;;  %v7224_v13 = vld [vmem:[#allocation23_spill] sm:$0xff]  ;;  %v7226_v22 = vld [vmem:[#allocation25_spill] sm:$0xff] }
 0x27c   :  { %v1144_v36 = vmul.f32 %v5304_v39, %v6073_v52  ;;  %v7216_v52 = vld [vmem:[#allocation15_spill] sm:$0xff] }
 0x27d   :  { %v5306_v49 = vpop.eup %5305  ;;  %v7228_v39 = vld [vmem:[#allocation27_spill] sm:$0xff] }
 0x27e   :  { %v6205_v20 = vadd.f32 %v1145_v50, %v1144_v36  ;;  %v7227_v50 = vld [vmem:[#allocation26_spill] sm:$0xff]  ;;  %v7229_v36 = vld [vmem:[#allocation28_spill] sm:$0xff] }
 0x280   :  { %5307 = vtanh.f32 %v6205_v20 }
 0x28a   :  { %v5308_v23 = vpop.eup %5307 }
 0x28b   :  { %v1148_v11 = vmul.f32 %v5308_v23, %v5306_v49  ;;  %v7230_v49 = vld [vmem:[#allocation29_spill] sm:$0xff]  ;;  %v7231_v23 = vld [vmem:[#allocation30_spill] sm:$0xff] }
 0x28d   :  { %1214 = vmatmul.mubr.f32.vlgmr.msra.gmra.mrb[18].mxu0 %v1148_v11  ;;  %1285 = vmatmul.mubr.f32.vlgmr.msra.gmra.mrb[18].mxu1 %v1148_v11 }
 0x28e   :  { %4016 = vmatpush1.bf16.msra.mxu0 %v5701_v62  ;;  %4048 = vmatpush1.bf16.msra.mxu1 %v5704_v2 }
 0x28f   :  { %4018 = vmatprep.subr.bf16.mxu0 %v5707_v5  ;;  %4050 = vmatprep.subr.bf16.mxu1 %v5710_v8 }
 0x290   :  { %1386 = vmatprep.mubr.f32.mxu0 %v7153_v40  ;;  %1457 = vmatprep.mubr.f32.mxu1 %v7153_v40 }
 0x292   :  { %4020 = vmatpush1.bf16.msra.mxu0 %v5717_v12  ;;  %4052 = vmatpush1.bf16.msra.mxu1 %v5721_v15 }
 0x293   :  { %4022 = vmatprep.subr.bf16.mxu0 %v5725_v18  ;;  %4054 = vmatprep.subr.bf16.mxu1 %v5729_v21 }
 0x296   :  { %4024 = vmatpush1.bf16.msra.mxu0 %v5736_v25  ;;  %4056 = vmatpush1.bf16.msra.mxu1 %v5740_v28 }
 0x297   :  { %4026 = vmatprep.subr.bf16.mxu0 %v5744_v31  ;;  %4058 = vmatprep.subr.bf16.mxu1 %v5748_v34 }
 0x29a   :  { %4028 = vmatpush1.bf16.msra.mxu0 %v5755_v38  ;;  %4060 = vmatpush1.bf16.msra.mxu1 %v5759_v41 }
 0x29b   :  { %4030 = vmatprep.subr.bf16.mxu0 %v5763_v44  ;;  %4062 = vmatprep.subr.bf16.mxu1 %v5767_v47 }
 0x29e   :  { %4032 = vmatpush1.bf16.msra.mxu0 %v5774_v51  ;;  %4064 = vmatpush1.bf16.msra.mxu1 %v5778_v55 }
 0x29f   :  { %4034 = vmatprep.subr.bf16.mxu0 %v5782_v59  ;;  %4066 = vmatprep.subr.bf16.mxu1 %v5786_v63 }
 0x2a2   :  { %4036 = vmatpush1.bf16.msra.mxu0 %v5793_v6  ;;  %4068 = vmatpush1.bf16.msra.mxu1 %v5797_v10 }
 0x2a3   :  { %4038 = vmatprep.subr.bf16.mxu0 %v5801_v14  ;;  %4070 = vmatprep.subr.bf16.mxu1 %v5805_v19 }
 0x2a6   :  { %4040 = vmatpush1.bf16.msra.mxu0 %v5812_v24  ;;  %4072 = vmatpush1.bf16.msra.mxu1 %v5816_v29 }
 0x2a7   :  { %4042 = vmatprep.subr.bf16.mxu0 %v5820_v33  ;;  %4074 = vmatprep.subr.bf16.mxu1 %v5824_v37 }
 0x2aa   :  { %4044 = vmatpush1.bf16.msra.mxu0 %v5831_v43  ;;  %4076 = vmatpush1.bf16.msra.mxu1 %v5835_v48 }
 0x2ab   :  { %4078 = vmatprep.subr.bf16.mxu0 %v5839_v54  ;;  %4142 = vmatprep.subr.bf16.mxu1 %v5843_v61 }
 0x2ad   :  { %1387 = vmatmul.mubr.f32.vlgmr.msra.gmra.mrb[4].mxu0 %v1148_v11  ;;  %1458 = vmatmul.mubr.f32.vlgmr.msra.gmra.mrb[4].mxu1 %v1148_v11  ;;  %v7232_v11 = vld [vmem:[#allocation31_spill] sm:$0xff] }
 0x2ae   :  { %4080 = vmatpush1.bf16.msra.mxu0 %v5847_v4  ;;  %4144 = vmatpush1.bf16.msra.mxu1 %v5851_v7 }
 0x2af   :  { %4082 = vmatprep.subr.bf16.mxu0 %v5853_v9  ;;  %4146 = vmatprep.subr.bf16.mxu1 %v5857_v17 }
 0x2b2   :  { %4084 = vmatpush1.bf16.msra.mxu0 %v5863_v30  ;;  %4148 = vmatpush1.bf16.msra.mxu1 %v5867_v32 }
 0x2b3   :  { %4086 = vmatprep.subr.bf16.mxu0 %v5869_v35  ;;  %4150 = vmatprep.subr.bf16.mxu1 %v5872_v42 }
 0x2b6   :  { %4088 = vmatpush1.bf16.msra.mxu0 %v5877_v57  ;;  %4152 = vmatpush1.bf16.msra.mxu1 %v5881_v58 }
 0x2b7   :  { %4090 = vmatprep.subr.bf16.mxu0 %v7216_v52  ;;  %4154 = vmatprep.subr.bf16.mxu1 %v7217_v27  ;;  %v7273_v27 = vld [vmem:[#allocation73_spill] sm:$0xff] }
 0x2ba   :  { %4092 = vmatpush1.bf16.msra.mxu0 %v7218_v46  ;;  %4156 = vmatpush1.bf16.msra.mxu1 %v7219_v45  ;;  %v7271_v45 = vld [vmem:[#allocation71_spill] sm:$0xff] }
 0x2bb   :  { %4094 = vmatprep.subr.bf16.mxu0 %v7220_v56  ;;  %4158 = vmatprep.subr.bf16.mxu1 %v7221_v0  ;;  %v7270_v0 = vld [vmem:[#allocation67_spill] sm:$0xff] }
 0x2be   :  { %4096 = vmatpush1.bf16.msra.mxu0 %v7222_v3  ;;  %4160 = vmatpush1.bf16.msra.mxu1 %v7223_v53  ;;  %v7233_v3 = vld [vmem:[#allocation32_spill] sm:$0xff]  ;;  %v7234_v53 = vld [vmem:[#allocation33_spill] sm:$0xff] }
 0x2bf   :  { %4098 = vmatprep.subr.bf16.mxu0 %v7224_v13  ;;  %4162 = vmatprep.subr.bf16.mxu1 %v7225_v60  ;;  %v7235_v13 = vld [vmem:[#allocation34_spill] sm:$0xff]  ;;  %v7236_v60 = vld [vmem:[#allocation35_spill] sm:$0xff] }
 0x2c2   :  { %4100 = vmatpush1.bf16.msra.mxu0 %v7226_v22  ;;  %4164 = vmatpush1.bf16.msra.mxu1 %v7227_v50  ;;  %v7237_v22 = vld [vmem:[#allocation36_spill] sm:$0xff]  ;;  %v7238_v50 = vld [vmem:[#allocation37_spill] sm:$0xff] }
 0x2c3   :  { %4102 = vmatprep.subr.bf16.mxu0 %v7228_v39  ;;  %4166 = vmatprep.subr.bf16.mxu1 %v7229_v36  ;;  %v7239_v39 = vld [vmem:[#allocation38_spill] sm:$0xff]  ;;  %v7240_v36 = vld [vmem:[#allocation39_spill] sm:$0xff] }
 0x2c6   :  { %4104 = vmatpush1.bf16.msra.mxu0 %v7230_v49  ;;  %4168 = vmatpush1.bf16.msra.mxu1 %v7231_v23  ;;  %v7241_v49 = vld [vmem:[#allocation40_spill] sm:$0xff]  ;;  %v7242_v23 = vld [vmem:[#allocation41_spill] sm:$0xff] }
 0x2c7   :  { %4106 = vmatprep.subr.bf16.mxu0 %v7232_v11  ;;  %4170 = vmatprep.subr.bf16.mxu1 %v7233_v3  ;;  %v7243_v11 = vld [vmem:[#allocation42_spill] sm:$0xff]  ;;  %v7244_v3 = vld [vmem:[#allocation43_spill] sm:$0xff] }
 0x2ca   :  { %4108 = vmatpush1.bf16.msra.mxu0 %v7234_v53  ;;  %4172 = vmatpush1.bf16.msra.mxu1 %v7235_v13  ;;  %v7245_v53 = vld [vmem:[#allocation44_spill] sm:$0xff]  ;;  %v7246_v13 = vld [vmem:[#allocation45_spill] sm:$0xff] }
 0x2cb   :  { %4110 = vmatprep.subr.bf16.mxu0 %v7236_v60  ;;  %4174 = vmatprep.subr.bf16.mxu1 %v7237_v22  ;;  %v7247_v60 = vld [vmem:[#allocation46_spill] sm:$0xff]  ;;  %v7248_v22 = vld [vmem:[#allocation47_spill] sm:$0xff] }
 0x2ce   :  { %4112 = vmatpush1.bf16.msra.mxu0 %v7238_v50  ;;  %4176 = vmatpush1.bf16.msra.mxu1 %v7239_v39  ;;  %v7249_v50 = vld [vmem:[#allocation48_spill] sm:$0xff]  ;;  %v7250_v39 = vld [vmem:[#allocation49_spill] sm:$0xff] }
 0x2cf   :  { %4114 = vmatprep.subr.bf16.mxu0 %v7240_v36  ;;  %4178 = vmatprep.subr.bf16.mxu1 %v7241_v49  ;;  %v7251_v36 = vld [vmem:[#allocation50_spill] sm:$0xff]  ;;  %v7252_v49 = vld [vmem:[#allocation51_spill] sm:$0xff] }
 0x2d2   :  { %4116 = vmatpush1.bf16.msra.mxu0 %v7242_v23  ;;  %4180 = vmatpush1.bf16.msra.mxu1 %v7243_v11  ;;  %v7253_v23 = vld [vmem:[#allocation52_spill] sm:$0xff]  ;;  %v7254_v11 = vld [vmem:[#allocation53_spill] sm:$0xff] }
 0x2d3   :  { %4118 = vmatprep.subr.bf16.mxu0 %v7244_v3  ;;  %4182 = vmatprep.subr.bf16.mxu1 %v7245_v53  ;;  %v7255_v3 = vld [vmem:[#allocation54_spill] sm:$0xff]  ;;  %v7256_v53 = vld [vmem:[#allocation55_spill] sm:$0xff] }
 0x2d6   :  { %4120 = vmatpush1.bf16.msra.mxu0 %v7246_v13  ;;  %4184 = vmatpush1.bf16.msra.mxu1 %v7247_v60  ;;  %v7257_v13 = vld [vmem:[#allocation56_spill] sm:$0xff]  ;;  %v7258_v60 = vld [vmem:[#allocation57_spill] sm:$0xff] }
 0x2d7   :  { %4122 = vmatprep.subr.bf16.mxu0 %v7248_v22  ;;  %4186 = vmatprep.subr.bf16.mxu1 %v7249_v50  ;;  %v7259_v22 = vld [vmem:[#allocation58_spill] sm:$0xff]  ;;  %v7260_v50 = vld [vmem:[#allocation59_spill] sm:$0xff] }
 0x2da   :  { %4124 = vmatpush1.bf16.msra.mxu0 %v7250_v39  ;;  %4188 = vmatpush1.bf16.msra.mxu1 %v7251_v36  ;;  %v7261_v39 = vld [vmem:[#allocation60_spill] sm:$0xff]  ;;  %v7262_v36 = vld [vmem:[#allocation61_spill] sm:$0xff] }
 0x2db   :  { %4126 = vmatprep.subr.bf16.mxu0 %v7252_v49  ;;  %4190 = vmatprep.subr.bf16.mxu1 %v7253_v23  ;;  %v7263_v49 = vld [vmem:[#allocation62_spill] sm:$0xff]  ;;  %v7264_v23 = vld [vmem:[#allocation63_spill] sm:$0xff] }
 0x2de   :  { %4128 = vmatpush1.bf16.msra.mxu0 %v7254_v11  ;;  %4192 = vmatpush1.bf16.msra.mxu1 %v7255_v3  ;;  %v7265_v11 = vld [vmem:[#allocation64_spill] sm:$0xff]  ;;  %v7266_v3 = vld [vmem:[#allocation65_spill] sm:$0xff] }
 0x2df   :  { %4130 = vmatprep.subr.bf16.mxu0 %v7256_v53  ;;  %4194 = vmatprep.subr.bf16.mxu1 %v7257_v13  ;;  %v7267_v53 = vld [vmem:[#allocation66_spill] sm:$0xff] }
 0x2e0   :  { %v7268_v13 = vld [vmem:[#allocation10_spill] sm:$0xff] }
 0x2e2   :  { %4132 = vmatpush1.bf16.msra.mxu0 %v7258_v60  ;;  %4196 = vmatpush1.bf16.msra.mxu1 %v7259_v22  ;;  %v7269_v60 = vld [vmem:[#allocation11_spill] sm:$0xff] }
 0x2e3   :  { %4134 = vmatprep.subr.bf16.mxu0 %v7260_v50  ;;  %4198 = vmatprep.subr.bf16.mxu1 %v7261_v39 }
 0x2e6   :  { %4136 = vmatpush1.bf16.msra.mxu0 %v7262_v36  ;;  %4200 = vmatpush1.bf16.msra.mxu1 %v7263_v49 }
 0x2e7   :  { %4138 = vmatprep.subr.bf16.mxu0 %v7264_v23  ;;  %4202 = vmatprep.subr.bf16.mxu1 %v7265_v11  ;;  %v7272_v11 = vld [vmem:[#allocation72_spill] sm:$0xff] }
 0x2ea   :  { %4140 = vmatpush1.bf16.msra.mxu0 %v7266_v3  ;;  %4204 = vmatpush1.bf16.msra.mxu1 %v7267_v53 }
 0x2eb   :  { %4206 = vmatprep.subr.bf16.mxu0 %v7268_v13  ;;  %4238 = vmatprep.subr.bf16.mxu1 %v7269_v60 }
 0x360   :  { %v1215_v22 = vpop.f32.mrb[18].mxu0  ;;  %v1286_v50 = vpop.f32.mrb[18].mxu1 }
 0x361   :  { %v1216_v39 = vadd.f32 %v1215_v22, %v7270_v0  ;;  %v1217_v56 = vpop.f32.mrb[19].mxu0  ;;  %v1288_v36 = vpop.f32.mrb[19].mxu1  ;;  %v1287_v3 = vadd.f32 %v1286_v50, %v7272_v11 }
 0x362   :  { %v1218_v49 = vadd.f32 %v1217_v56, %v7271_v45  ;;  %v1289_v53 = vadd.f32 %v1288_v36, %v7273_v27 }
 0x363   :  { %v3505_v46 = vmul.f32 -1.442695, %v1216_v39  ;;  %v3507_v52 = vmul.f32 -1.442695, %v1287_v3  ;;  %v7274_v3 = vld [vmem:[#allocation68_spill] sm:$0xff] }
 0x364   :  { %v3506_v23 = vmul.f32 -1.442695, %v1218_v49 }
 0x365   :  { %5309 = vpow2.f32 %v3505_v46 }
 0x366   :  { %5311 = vpow2.f32 %v3506_v23 }
 0x367   :  { %5313 = vtanh.f32 %v1289_v53 }
 0x368   :  { %5315 = vpow2.f32 %v3507_v52 }
 0x36f   :  { %v5310_v13 = vpop.eup %5309 }
 0x370   :  { %v1300_v58 = vadd.f32 1.0, %v5310_v13  ;;  %v5312_v60 = vpop.eup %5311 }
 0x371   :  { %v1301_v22 = vadd.f32 1.0, %v5312_v60  ;;  %v5314_v0 = vpop.eup %5313 }
 0x372   :  { %5317 = vrcp.f32 %v1300_v58  ;;  %v5316_v57 = vpop.eup %5315 }
 0x373   :  { %5319 = vrcp.f32 %v1301_v22  ;;  %v1302_v46 = vadd.f32 1.0, %v5316_v57  ;;  %v7275_v57 = vld [vmem:[#allocation70_spill] sm:$0xff] }
 0x375   :  { %5321 = vrcp.f32 %v1302_v46 }
 0x37c   :  { %v5318_v56 = vpop.eup %5317 }
 0x37d   :  { %v1311_v39 = vmul.f32 %v5318_v56, %v5314_v0  ;;  %v5320_v49 = vpop.eup %5319 }
 0x37e   :  { %v1310_v23 = vmul.f32 %v5320_v49, %v6197_v16 }
 0x37f   :  { %v5322_v16 = vpop.eup %5321 }
 0x380   :  { %v1388_v50 = vpop.f32.mrb[4].mxu0  ;;  %v1459_v11 = vpop.f32.mrb[4].mxu1  ;;  %v6311_v36 = vadd.f32 %v1311_v39, %v1310_v23 }
 0x381   :  { %v5193_v13 = vadd.f32 %v1388_v50, %v7274_v3  ;;  %v1390_v53 = vpop.f32.mrb[5].mxu0  ;;  %v1461_v27 = vpop.f32.mrb[5].mxu1  ;;  %v5209_v0 = vadd.f32 %v1459_v11, %v7275_v57 }
 0x382   :  { %v5194_v58 = vadd.f32 %v1390_v53, %v7214_v26  ;;  %5323 = vtanh.f32 %v6311_v36  ;;  %v5210_v22 = vadd.f32 %v1461_v27, %v6070_v1 }
 0x383   :  { %v3508_v52 = vmul.f32 -1.442695, %v5193_v13  ;;  %v3510_v39 = vmul.f32 -1.442695, %v5209_v0 }
 0x384   :  { %v3509_v60 = vmul.f32 -1.442695, %v5194_v58 }
 0x385   :  { %5325 = vpow2.f32 %v3508_v52 }
 0x386   :  { %5327 = vpow2.f32 %v3509_v60 }
 0x387   :  { %5329 = vtanh.f32 %v5210_v22 }
 0x388   :  { %5331 = vpow2.f32 %v3510_v39  ;;  %v7278_v39 = vld [vmem:[#allocation15_spill] sm:$0xff] }
 0x38c   :  { %v5324_v56 = vpop.eup %5323 }
 0x38d   :  { %v1314_v49 = vmul.f32 %v5324_v56, %v5322_v16 }
 0x38f   :  { %v5326_v23 = vpop.eup %5325  ;;  %1556 = vmatprep.mubr.f32.mxu0 %v1314_v49  ;;  %1627 = vmatprep.mubr.f32.mxu1 %v1314_v49  ;;  %v7279_v49 = vld [vmem:[#allocation16_spill] sm:$0xff] }
 0x390   :  { %v1477_v50 = vadd.f32 1.0, %v5326_v23  ;;  %v5328_v46 = vpop.eup %5327  ;;  %v7280_v23 = vld [vmem:[#allocation17_spill] sm:$0xff] }
 0x391   :  { %v1478_v13 = vadd.f32 1.0, %v5328_v46  ;;  %v5330_v53 = vpop.eup %5329  ;;  %v7282_v46 = vld [vmem:[#allocation19_spill] sm:$0xff] }
 0x392   :  { %5333 = vrcp.f32 %v1477_v50  ;;  %v5332_v58 = vpop.eup %5331  ;;  %v7281_v50 = vld [vmem:[#allocation18_spill] sm:$0xff] }
 0x393   :  { %5335 = vrcp.f32 %v1478_v13  ;;  %v1479_v57 = vadd.f32 1.0, %v5332_v58  ;;  %v7283_v13 = vld [vmem:[#allocation20_spill] sm:$0xff]  ;;  %v7285_v58 = vld [vmem:[#allocation22_spill] sm:$0xff] }
 0x395   :  { %5337 = vrcp.f32 %v1479_v57  ;;  %v7277_v57 = vld [vmem:[#allocation14_spill] sm:$0xff] }
 0x39c   :  { %v5334_v52 = vpop.eup %5333 }
 0x39d   :  { %v1488_v11 = vmul.f32 %v5334_v52, %v5330_v53  ;;  %v5336_v60 = vpop.eup %5335  ;;  %v7284_v53 = vld [vmem:[#allocation21_spill] sm:$0xff]  ;;  %v7286_v52 = vld [vmem:[#allocation23_spill] sm:$0xff] }
 0x39e   :  { %v1487_v27 = vmul.f32 %v5336_v60, %v6205_v20  ;;  %v7276_v20 = vld [vmem:[#allocation13_spill] sm:$0xff] }
 0x39f   :  { %v5338_v16 = vpop.eup %5337  ;;  %v7288_v60 = vld [vmem:[#allocation25_spill] sm:$0xff] }
 0x3a0   :  { %v6319_v0 = vadd.f32 %v1488_v11, %v1487_v27  ;;  %v7287_v11 = vld [vmem:[#allocation24_spill] sm:$0xff]  ;;  %v7289_v27 = vld [vmem:[#allocation26_spill] sm:$0xff] }
 0x3a2   :  { %5339 = vtanh.f32 %v6319_v0 }
 0x3ac   :  { %v5340_v22 = vpop.eup %5339 }
 0x3ad   :  { %v1491_v56 = vmul.f32 %v5340_v22, %v5338_v16  ;;  %v7290_v16 = vld [vmem:[#allocation27_spill] sm:$0xff]  ;;  %v7291_v22 = vld [vmem:[#allocation28_spill] sm:$0xff] }
 0x3af   :  { %1557 = vmatmul.mubr.f32.vlgmr.msra.gmra.mrb[20].mxu0 %v1491_v56  ;;  %1628 = vmatmul.mubr.f32.vlgmr.msra.gmra.mrb[20].mxu1 %v1491_v56 }
 0x3b0   :  { %4208 = vmatpush1.bf16.msra.mxu0 %v5701_v62  ;;  %4240 = vmatpush1.bf16.msra.mxu1 %v5704_v2 }
 0x3b1   :  { %4210 = vmatprep.subr.bf16.mxu0 %v5707_v5  ;;  %4242 = vmatprep.subr.bf16.mxu1 %v5710_v8 }
 0x3b2   :  { %1729 = vmatprep.mubr.f32.mxu0 %v7153_v40  ;;  %1800 = vmatprep.mubr.f32.mxu1 %v7153_v40 }
 0x3b4   :  { %4212 = vmatpush1.bf16.msra.mxu0 %v5717_v12  ;;  %4244 = vmatpush1.bf16.msra.mxu1 %v5721_v15 }
 0x3b5   :  { %4214 = vmatprep.subr.bf16.mxu0 %v5725_v18  ;;  %4246 = vmatprep.subr.bf16.mxu1 %v5729_v21 }
 0x3b8   :  { %4216 = vmatpush1.bf16.msra.mxu0 %v5736_v25  ;;  %4248 = vmatpush1.bf16.msra.mxu1 %v5740_v28 }
 0x3b9   :  { %4218 = vmatprep.subr.bf16.mxu0 %v5744_v31  ;;  %4250 = vmatprep.subr.bf16.mxu1 %v5748_v34 }
 0x3bc   :  { %4220 = vmatpush1.bf16.msra.mxu0 %v5755_v38  ;;  %4252 = vmatpush1.bf16.msra.mxu1 %v5759_v41 }
 0x3bd   :  { %4222 = vmatprep.subr.bf16.mxu0 %v5763_v44  ;;  %4254 = vmatprep.subr.bf16.mxu1 %v5767_v47 }
 0x3c0   :  { %4224 = vmatpush1.bf16.msra.mxu0 %v5774_v51  ;;  %4256 = vmatpush1.bf16.msra.mxu1 %v5778_v55 }
 0x3c1   :  { %4226 = vmatprep.subr.bf16.mxu0 %v5782_v59  ;;  %4258 = vmatprep.subr.bf16.mxu1 %v5786_v63 }
 0x3c4   :  { %4228 = vmatpush1.bf16.msra.mxu0 %v5793_v6  ;;  %4260 = vmatpush1.bf16.msra.mxu1 %v5797_v10 }
 0x3c5   :  { %4230 = vmatprep.subr.bf16.mxu0 %v5801_v14  ;;  %4262 = vmatprep.subr.bf16.mxu1 %v5805_v19 }
 0x3c8   :  { %4232 = vmatpush1.bf16.msra.mxu0 %v5812_v24  ;;  %4264 = vmatpush1.bf16.msra.mxu1 %v5816_v29 }
 0x3c9   :  { %4234 = vmatprep.subr.bf16.mxu0 %v5820_v33  ;;  %4266 = vmatprep.subr.bf16.mxu1 %v5824_v37 }
 0x3cc   :  { %4236 = vmatpush1.bf16.msra.mxu0 %v5831_v43  ;;  %4268 = vmatpush1.bf16.msra.mxu1 %v5835_v48 }
 0x3cd   :  { %4270 = vmatprep.subr.bf16.mxu0 %v5839_v54  ;;  %4334 = vmatprep.subr.bf16.mxu1 %v5843_v61 }
 0x3cf   :  { %1730 = vmatmul.mubr.f32.vlgmr.msra.gmra.mrb[6].mxu0 %v1491_v56  ;;  %1801 = vmatmul.mubr.f32.vlgmr.msra.gmra.mrb[6].mxu1 %v1491_v56  ;;  %v7292_v56 = vld [vmem:[#allocation29_spill] sm:$0xff] }
 0x3d0   :  { %4272 = vmatpush1.bf16.msra.mxu0 %v5847_v4  ;;  %4336 = vmatpush1.bf16.msra.mxu1 %v5851_v7 }
 0x3d1   :  { %4274 = vmatprep.subr.bf16.mxu0 %v5853_v9  ;;  %4338 = vmatprep.subr.bf16.mxu1 %v5857_v17 }
 0x3d4   :  { %4276 = vmatpush1.bf16.msra.mxu0 %v5863_v30  ;;  %4340 = vmatpush1.bf16.msra.mxu1 %v5867_v32 }
 0x3d5   :  { %4278 = vmatprep.subr.bf16.mxu0 %v5869_v35  ;;  %4342 = vmatprep.subr.bf16.mxu1 %v5872_v42 }
 0x3d8   :  { %4280 = vmatpush1.bf16.msra.mxu0 %v7276_v20  ;;  %4344 = vmatpush1.bf16.msra.mxu1 %v7277_v57 }
 0x3d9   :  { %4282 = vmatprep.subr.bf16.mxu0 %v7278_v39  ;;  %4346 = vmatprep.subr.bf16.mxu1 %v7279_v49  ;;  %v7334_v39 = vld [vmem:[#allocation73_spill] sm:$0xff] }
 0x3dc   :  { %4284 = vmatpush1.bf16.msra.mxu0 %v7280_v23  ;;  %4348 = vmatpush1.bf16.msra.mxu1 %v7281_v50  ;;  %v7332_v50 = vld [vmem:[#allocation67_spill] sm:$0xff] }
 0x3dd   :  { %4286 = vmatprep.subr.bf16.mxu0 %v7282_v46  ;;  %4350 = vmatprep.subr.bf16.mxu1 %v7283_v13  ;;  %v7293_v46 = vld [vmem:[#allocation30_spill] sm:$0xff]  ;;  %v7294_v13 = vld [vmem:[#allocation31_spill] sm:$0xff] }
 0x3e0   :  { %4288 = vmatpush1.bf16.msra.mxu0 %v7284_v53  ;;  %4352 = vmatpush1.bf16.msra.mxu1 %v7285_v58  ;;  %v7295_v53 = vld [vmem:[#allocation32_spill] sm:$0xff]  ;;  %v7296_v58 = vld [vmem:[#allocation33_spill] sm:$0xff] }
 0x3e1   :  { %4290 = vmatprep.subr.bf16.mxu0 %v7286_v52  ;;  %4354 = vmatprep.subr.bf16.mxu1 %v7287_v11  ;;  %v7297_v52 = vld [vmem:[#allocation34_spill] sm:$0xff]  ;;  %v7298_v11 = vld [vmem:[#allocation35_spill] sm:$0xff] }
 0x3e4   :  { %4292 = vmatpush1.bf16.msra.mxu0 %v7288_v60  ;;  %4356 = vmatpush1.bf16.msra.mxu1 %v7289_v27  ;;  %v7299_v60 = vld [vmem:[#allocation36_spill] sm:$0xff]  ;;  %v7300_v27 = vld [vmem:[#allocation37_spill] sm:$0xff] }
 0x3e5   :  { %4294 = vmatprep.subr.bf16.mxu0 %v7290_v16  ;;  %4358 = vmatprep.subr.bf16.mxu1 %v7291_v22  ;;  %v7301_v16 = vld [vmem:[#allocation38_spill] sm:$0xff]  ;;  %v7302_v22 = vld [vmem:[#allocation39_spill] sm:$0xff] }
 0x3e8   :  { %4296 = vmatpush1.bf16.msra.mxu0 %v7292_v56  ;;  %4360 = vmatpush1.bf16.msra.mxu1 %v7293_v46  ;;  %v7303_v56 = vld [vmem:[#allocation40_spill] sm:$0xff]  ;;  %v7304_v46 = vld [vmem:[#allocation41_spill] sm:$0xff] }
 0x3e9   :  { %4298 = vmatprep.subr.bf16.mxu0 %v7294_v13  ;;  %4362 = vmatprep.subr.bf16.mxu1 %v7295_v53  ;;  %v7305_v13 = vld [vmem:[#allocation42_spill] sm:$0xff]  ;;  %v7306_v53 = vld [vmem:[#allocation43_spill] sm:$0xff] }
 0x3ec   :  { %4300 = vmatpush1.bf16.msra.mxu0 %v7296_v58  ;;  %4364 = vmatpush1.bf16.msra.mxu1 %v7297_v52  ;;  %v7307_v58 = vld [vmem:[#allocation44_spill] sm:$0xff]  ;;  %v7308_v52 = vld [vmem:[#allocation45_spill] sm:$0xff] }
 0x3ed   :  { %4302 = vmatprep.subr.bf16.mxu0 %v7298_v11  ;;  %4366 = vmatprep.subr.bf16.mxu1 %v7299_v60  ;;  %v7309_v11 = vld [vmem:[#allocation46_spill] sm:$0xff]  ;;  %v7310_v60 = vld [vmem:[#allocation47_spill] sm:$0xff] }
 0x3f0   :  { %4304 = vmatpush1.bf16.msra.mxu0 %v7300_v27  ;;  %4368 = vmatpush1.bf16.msra.mxu1 %v7301_v16  ;;  %v7311_v27 = vld [vmem:[#allocation48_spill] sm:$0xff]  ;;  %v7312_v16 = vld [vmem:[#allocation49_spill] sm:$0xff] }
 0x3f1   :  { %4306 = vmatprep.subr.bf16.mxu0 %v7302_v22  ;;  %4370 = vmatprep.subr.bf16.mxu1 %v7303_v56  ;;  %v7313_v22 = vld [vmem:[#allocation50_spill] sm:$0xff]  ;;  %v7314_v56 = vld [vmem:[#allocation51_spill] sm:$0xff] }
 0x3f4   :  { %4308 = vmatpush1.bf16.msra.mxu0 %v7304_v46  ;;  %4372 = vmatpush1.bf16.msra.mxu1 %v7305_v13  ;;  %v7315_v46 = vld [vmem:[#allocation52_spill] sm:$0xff]  ;;  %v7316_v13 = vld [vmem:[#allocation53_spill] sm:$0xff] }
 0x3f5   :  { %4310 = vmatprep.subr.bf16.mxu0 %v7306_v53  ;;  %4374 = vmatprep.subr.bf16.mxu1 %v7307_v58  ;;  %v7317_v53 = vld [vmem:[#allocation54_spill] sm:$0xff]  ;;  %v7318_v58 = vld [vmem:[#allocation55_spill] sm:$0xff] }
 0x3f8   :  { %4312 = vmatpush1.bf16.msra.mxu0 %v7308_v52  ;;  %4376 = vmatpush1.bf16.msra.mxu1 %v7309_v11  ;;  %v7319_v52 = vld [vmem:[#allocation56_spill] sm:$0xff]  ;;  %v7320_v11 = vld [vmem:[#allocation57_spill] sm:$0xff] }
 0x3f9   :  { %4314 = vmatprep.subr.bf16.mxu0 %v7310_v60  ;;  %4378 = vmatprep.subr.bf16.mxu1 %v7311_v27  ;;  %v7321_v60 = vld [vmem:[#allocation58_spill] sm:$0xff]  ;;  %v7322_v27 = vld [vmem:[#allocation59_spill] sm:$0xff] }
 0x3fc   :  { %4316 = vmatpush1.bf16.msra.mxu0 %v7312_v16  ;;  %4380 = vmatpush1.bf16.msra.mxu1 %v7313_v22  ;;  %v7323_v16 = vld [vmem:[#allocation60_spill] sm:$0xff]  ;;  %v7324_v22 = vld [vmem:[#allocation61_spill] sm:$0xff] }
 0x3fd   :  { %4318 = vmatprep.subr.bf16.mxu0 %v7314_v56  ;;  %4382 = vmatprep.subr.bf16.mxu1 %v7315_v46  ;;  %v7325_v56 = vld [vmem:[#allocation62_spill] sm:$0xff]  ;;  %v7326_v46 = vld [vmem:[#allocation63_spill] sm:$0xff] }
 0x400   :  { %4320 = vmatpush1.bf16.msra.mxu0 %v7316_v13  ;;  %4384 = vmatpush1.bf16.msra.mxu1 %v7317_v53  ;;  %v7327_v13 = vld [vmem:[#allocation64_spill] sm:$0xff]  ;;  %v7328_v53 = vld [vmem:[#allocation65_spill] sm:$0xff] }
 0x401   :  { %4322 = vmatprep.subr.bf16.mxu0 %v7318_v58  ;;  %4386 = vmatprep.subr.bf16.mxu1 %v7319_v52  ;;  %v7329_v58 = vld [vmem:[#allocation66_spill] sm:$0xff] }
 0x402   :  { %v7330_v52 = vld [vmem:[#allocation10_spill] sm:$0xff] }
 0x404   :  { %4324 = vmatpush1.bf16.msra.mxu0 %v7320_v11  ;;  %4388 = vmatpush1.bf16.msra.mxu1 %v7321_v60  ;;  %v7331_v11 = vld [vmem:[#allocation11_spill] sm:$0xff] }
 0x405   :  { %4326 = vmatprep.subr.bf16.mxu0 %v7322_v27  ;;  %4390 = vmatprep.subr.bf16.mxu1 %v7323_v16 }
 0x408   :  { %4328 = vmatpush1.bf16.msra.mxu0 %v7324_v22  ;;  %4392 = vmatpush1.bf16.msra.mxu1 %v7325_v56 }
 0x409   :  { %4330 = vmatprep.subr.bf16.mxu0 %v7326_v46  ;;  %4394 = vmatprep.subr.bf16.mxu1 %v7327_v13  ;;  %v7333_v13 = vld [vmem:[#allocation72_spill] sm:$0xff] }
 0x40c   :  { %4332 = vmatpush1.bf16.msra.mxu0 %v7328_v53  ;;  %4396 = vmatpush1.bf16.msra.mxu1 %v7329_v58 }
 0x40d   :  { %4398 = vmatprep.subr.bf16.mxu0 %v7330_v52  ;;  %4430 = vmatprep.subr.bf16.mxu1 %v7331_v11 }
 0x482   :  { %v1558_v60 = vpop.f32.mrb[20].mxu0  ;;  %v1629_v27 = vpop.f32.mrb[20].mxu1 }
 0x483   :  { %v1559_v16 = vadd.f32 %v1558_v60, %v7332_v50  ;;  %v1560_v23 = vpop.f32.mrb[21].mxu0  ;;  %v1631_v22 = vpop.f32.mrb[21].mxu1  ;;  %v1630_v53 = vadd.f32 %v1629_v27, %v7333_v13 }
 0x484   :  { %v1561_v56 = vadd.f32 %v1560_v23, %v7271_v45  ;;  %v1632_v58 = vadd.f32 %v1631_v22, %v7334_v39 }
 0x485   :  { %v3511_v49 = vmul.f32 -1.442695, %v1559_v16  ;;  %v3513_v57 = vmul.f32 -1.442695, %v1630_v53 }
 0x486   :  { %v3512_v46 = vmul.f32 -1.442695, %v1561_v56 }
 0x487   :  { %5341 = vpow2.f32 %v3511_v49 }
 0x488   :  { %5343 = vpow2.f32 %v3512_v46 }
 0x489   :  { %5345 = vtanh.f32 %v1632_v58 }
 0x48a   :  { %5347 = vpow2.f32 %v3513_v57 }
 0x491   :  { %v5342_v52 = vpop.eup %5341 }
 0x492   :  { %v1643_v20 = vadd.f32 1.0, %v5342_v52  ;;  %v5344_v11 = vpop.eup %5343 }
 0x493   :  { %v1644_v60 = vadd.f32 1.0, %v5344_v11  ;;  %v5346_v50 = vpop.eup %5345 }
 0x494   :  { %5349 = vrcp.f32 %v1643_v20  ;;  %v5348_v42 = vpop.eup %5347 }
 0x495   :  { %5351 = vrcp.f32 %v1644_v60  ;;  %v1645_v49 = vadd.f32 1.0, %v5348_v42  ;;  %v7335_v42 = vld [vmem:[#allocation70_spill] sm:$0xff] }
 0x497   :  { %5353 = vrcp.f32 %v1645_v49 }
 0x49e   :  { %v5350_v23 = vpop.eup %5349 }
 0x49f   :  { %v1654_v16 = vmul.f32 %v5350_v23, %v5346_v50  ;;  %v5352_v56 = vpop.eup %5351 }
 0x4a0   :  { %v1653_v46 = vmul.f32 %v5352_v56, %v6311_v36 }
 0x4a1   :  { %v5354_v36 = vpop.eup %5353 }
 0x4a2   :  { %v1731_v27 = vpop.f32.mrb[6].mxu0  ;;  %v1802_v13 = vpop.f32.mrb[6].mxu1  ;;  %v6425_v22 = vadd.f32 %v1654_v16, %v1653_v46 }
 0x4a3   :  { %v5195_v53 = vadd.f32 %v1731_v27, %v7274_v3  ;;  %v1733_v58 = vpop.f32.mrb[7].mxu0  ;;  %v1804_v52 = vpop.f32.mrb[7].mxu1  ;;  %v5211_v50 = vadd.f32 %v1802_v13, %v7335_v42 }
 0x4a4   :  { %v5196_v20 = vadd.f32 %v1733_v58, %v7214_v26  ;;  %5355 = vtanh.f32 %v6425_v22  ;;  %v5212_v60 = vadd.f32 %v1804_v52, %v6070_v1 }
 0x4a5   :  { %v3514_v57 = vmul.f32 -1.442695, %v5195_v53  ;;  %v3516_v16 = vmul.f32 -1.442695, %v5211_v50 }
 0x4a6   :  { %v3515_v11 = vmul.f32 -1.442695, %v5196_v20 }
 0x4a7   :  { %5357 = vpow2.f32 %v3514_v57 }
 0x4a8   :  { %5359 = vpow2.f32 %v3515_v11 }
 0x4a9   :  { %5361 = vtanh.f32 %v5212_v60 }
 0x4aa   :  { %5363 = vpow2.f32 %v3516_v16  ;;  %v7338_v16 = vld [vmem:[#allocation14_spill] sm:$0xff] }
 0x4ae   :  { %v5356_v23 = vpop.eup %5355 }
 0x4af   :  { %v1657_v56 = vmul.f32 %v5356_v23, %v5354_v36 }
 0x4b1   :  { %v5358_v46 = vpop.eup %5357  ;;  %1899 = vmatprep.mubr.f32.mxu0 %v1657_v56  ;;  %1970 = vmatprep.mubr.f32.mxu1 %v1657_v56  ;;  %v7339_v56 = vld [vmem:[#allocation15_spill] sm:$0xff] }
 0x4b2   :  { %v1820_v27 = vadd.f32 1.0, %v5358_v46  ;;  %v5360_v49 = vpop.eup %5359  ;;  %v7340_v46 = vld [vmem:[#allocation16_spill] sm:$0xff] }
 0x4b3   :  { %v1821_v53 = vadd.f32 1.0, %v5360_v49  ;;  %v5362_v58 = vpop.eup %5361  ;;  %v7342_v49 = vld [vmem:[#allocation18_spill] sm:$0xff] }
 0x4b4   :  { %5365 = vrcp.f32 %v1820_v27  ;;  %v5364_v20 = vpop.eup %5363  ;;  %v7341_v27 = vld [vmem:[#allocation17_spill] sm:$0xff] }
 0x4b5   :  { %5367 = vrcp.f32 %v1821_v53  ;;  %v1822_v42 = vadd.f32 1.0, %v5364_v20  ;;  %v7343_v53 = vld [vmem:[#allocation19_spill] sm:$0xff]  ;;  %v7345_v20 = vld [vmem:[#allocation21_spill] sm:$0xff] }
 0x4b7   :  { %5369 = vrcp.f32 %v1822_v42  ;;  %v7337_v42 = vld [vmem:[#allocation13_spill] sm:$0xff] }
 0x4be   :  { %v5366_v57 = vpop.eup %5365 }
 0x4bf   :  { %v1831_v13 = vmul.f32 %v5366_v57, %v5362_v58  ;;  %v5368_v11 = vpop.eup %5367  ;;  %v7344_v58 = vld [vmem:[#allocation20_spill] sm:$0xff]  ;;  %v7346_v57 = vld [vmem:[#allocation22_spill] sm:$0xff] }
 0x4c0   :  { %v1830_v52 = vmul.f32 %v5368_v11, %v6319_v0  ;;  %v7336_v0 = vld [vmem:[#allocation12_spill] sm:$0xff] }
 0x4c1   :  { %v5370_v36 = vpop.eup %5369  ;;  %v7348_v11 = vld [vmem:[#allocation24_spill] sm:$0xff] }
 0x4c2   :  { %v6433_v50 = vadd.f32 %v1831_v13, %v1830_v52  ;;  %v7347_v13 = vld [vmem:[#allocation23_spill] sm:$0xff]  ;;  %v7349_v52 = vld [vmem:[#allocation25_spill] sm:$0xff] }
 0x4c4   :  { %5371 = vtanh.f32 %v6433_v50 }
 0x4ce   :  { %v5372_v60 = vpop.eup %5371 }
 0x4cf   :  { %v1834_v23 = vmul.f32 %v5372_v60, %v5370_v36  ;;  %v7350_v36 = vld [vmem:[#allocation26_spill] sm:$0xff]  ;;  %v7351_v60 = vld [vmem:[#allocation27_spill] sm:$0xff] }
 0x4d1   :  { %1900 = vmatmul.mubr.f32.vlgmr.msra.gmra.mrb[22].mxu0 %v1834_v23  ;;  %1971 = vmatmul.mubr.f32.vlgmr.msra.gmra.mrb[22].mxu1 %v1834_v23 }
 0x4d2   :  { %4400 = vmatpush1.bf16.msra.mxu0 %v5701_v62  ;;  %4432 = vmatpush1.bf16.msra.mxu1 %v5704_v2 }
 0x4d3   :  { %4402 = vmatprep.subr.bf16.mxu0 %v5707_v5  ;;  %4434 = vmatprep.subr.bf16.mxu1 %v5710_v8 }
 0x4d4   :  { %2072 = vmatprep.mubr.f32.mxu0 %v7153_v40  ;;  %2143 = vmatprep.mubr.f32.mxu1 %v7153_v40 }
 0x4d6   :  { %4404 = vmatpush1.bf16.msra.mxu0 %v5717_v12  ;;  %4436 = vmatpush1.bf16.msra.mxu1 %v5721_v15 }
 0x4d7   :  { %4406 = vmatprep.subr.bf16.mxu0 %v5725_v18  ;;  %4438 = vmatprep.subr.bf16.mxu1 %v5729_v21 }
 0x4da   :  { %4408 = vmatpush1.bf16.msra.mxu0 %v5736_v25  ;;  %4440 = vmatpush1.bf16.msra.mxu1 %v5740_v28 }
 0x4db   :  { %4410 = vmatprep.subr.bf16.mxu0 %v5744_v31  ;;  %4442 = vmatprep.subr.bf16.mxu1 %v5748_v34 }
 0x4de   :  { %4412 = vmatpush1.bf16.msra.mxu0 %v5755_v38  ;;  %4444 = vmatpush1.bf16.msra.mxu1 %v5759_v41 }
 0x4df   :  { %4414 = vmatprep.subr.bf16.mxu0 %v5763_v44  ;;  %4446 = vmatprep.subr.bf16.mxu1 %v5767_v47 }
 0x4e2   :  { %4416 = vmatpush1.bf16.msra.mxu0 %v5774_v51  ;;  %4448 = vmatpush1.bf16.msra.mxu1 %v5778_v55 }
 0x4e3   :  { %4418 = vmatprep.subr.bf16.mxu0 %v5782_v59  ;;  %4450 = vmatprep.subr.bf16.mxu1 %v5786_v63 }
 0x4e6   :  { %4420 = vmatpush1.bf16.msra.mxu0 %v5793_v6  ;;  %4452 = vmatpush1.bf16.msra.mxu1 %v5797_v10 }
 0x4e7   :  { %4422 = vmatprep.subr.bf16.mxu0 %v5801_v14  ;;  %4454 = vmatprep.subr.bf16.mxu1 %v5805_v19 }
 0x4ea   :  { %4424 = vmatpush1.bf16.msra.mxu0 %v5812_v24  ;;  %4456 = vmatpush1.bf16.msra.mxu1 %v5816_v29 }
 0x4eb   :  { %4426 = vmatprep.subr.bf16.mxu0 %v5820_v33  ;;  %4458 = vmatprep.subr.bf16.mxu1 %v5824_v37 }
 0x4ee   :  { %4428 = vmatpush1.bf16.msra.mxu0 %v5831_v43  ;;  %4460 = vmatpush1.bf16.msra.mxu1 %v5835_v48 }
 0x4ef   :  { %4462 = vmatprep.subr.bf16.mxu0 %v5839_v54  ;;  %4526 = vmatprep.subr.bf16.mxu1 %v5843_v61 }
 0x4f1   :  { %2073 = vmatmul.mubr.f32.vlgmr.msra.gmra.mrb[8].mxu0 %v1834_v23  ;;  %2144 = vmatmul.mubr.f32.vlgmr.msra.gmra.mrb[8].mxu1 %v1834_v23  ;;  %v7352_v23 = vld [vmem:[#allocation28_spill] sm:$0xff] }
 0x4f2   :  { %4464 = vmatpush1.bf16.msra.mxu0 %v5847_v4  ;;  %4528 = vmatpush1.bf16.msra.mxu1 %v5851_v7 }
 0x4f3   :  { %4466 = vmatprep.subr.bf16.mxu0 %v5853_v9  ;;  %4530 = vmatprep.subr.bf16.mxu1 %v5857_v17 }
 0x4f6   :  { %4468 = vmatpush1.bf16.msra.mxu0 %v5863_v30  ;;  %4532 = vmatpush1.bf16.msra.mxu1 %v5867_v32 }
 0x4f7   :  { %4470 = vmatprep.subr.bf16.mxu0 %v5869_v35  ;;  %4534 = vmatprep.subr.bf16.mxu1 %v7336_v0 }
 0x4fa   :  { %4472 = vmatpush1.bf16.msra.mxu0 %v7337_v42  ;;  %4536 = vmatpush1.bf16.msra.mxu1 %v7338_v16 }
 0x4fb   :  { %4474 = vmatprep.subr.bf16.mxu0 %v7339_v56  ;;  %4538 = vmatprep.subr.bf16.mxu1 %v7340_v46 }
 0x4fe   :  { %4476 = vmatpush1.bf16.msra.mxu0 %v7341_v27  ;;  %4540 = vmatpush1.bf16.msra.mxu1 %v7342_v49  ;;  %v7353_v49 = vld [vmem:[#allocation29_spill] sm:$0xff]  ;;  %v7393_v27 = vld [vmem:[#allocation67_spill] sm:$0xff] }
 0x4ff   :  { %4478 = vmatprep.subr.bf16.mxu0 %v7343_v53  ;;  %4542 = vmatprep.subr.bf16.mxu1 %v7344_v58  ;;  %v7354_v53 = vld [vmem:[#allocation30_spill] sm:$0xff]  ;;  %v7355_v58 = vld [vmem:[#allocation31_spill] sm:$0xff] }
 0x502   :  { %4480 = vmatpush1.bf16.msra.mxu0 %v7345_v20  ;;  %4544 = vmatpush1.bf16.msra.mxu1 %v7346_v57  ;;  %v7356_v20 = vld [vmem:[#allocation32_spill] sm:$0xff]  ;;  %v7357_v57 = vld [vmem:[#allocation33_spill] sm:$0xff] }
 0x503   :  { %4482 = vmatprep.subr.bf16.mxu0 %v7347_v13  ;;  %4546 = vmatprep.subr.bf16.mxu1 %v7348_v11  ;;  %v7358_v13 = vld [vmem:[#allocation34_spill] sm:$0xff]  ;;  %v7359_v11 = vld [vmem:[#allocation35_spill] sm:$0xff] }
 0x506   :  { %4484 = vmatpush1.bf16.msra.mxu0 %v7349_v52  ;;  %4548 = vmatpush1.bf16.msra.mxu1 %v7350_v36  ;;  %v7360_v52 = vld [vmem:[#allocation36_spill] sm:$0xff]  ;;  %v7361_v36 = vld [vmem:[#allocation37_spill] sm:$0xff] }
 0x507   :  { %4486 = vmatprep.subr.bf16.mxu0 %v7351_v60  ;;  %4550 = vmatprep.subr.bf16.mxu1 %v7352_v23  ;;  %v7362_v60 = vld [vmem:[#allocation38_spill] sm:$0xff]  ;;  %v7363_v23 = vld [vmem:[#allocation39_spill] sm:$0xff] }
 0x50a   :  { %4488 = vmatpush1.bf16.msra.mxu0 %v7353_v49  ;;  %4552 = vmatpush1.bf16.msra.mxu1 %v7354_v53  ;;  %v7364_v49 = vld [vmem:[#allocation40_spill] sm:$0xff]  ;;  %v7365_v53 = vld [vmem:[#allocation41_spill] sm:$0xff] }
 0x50b   :  { %4490 = vmatprep.subr.bf16.mxu0 %v7355_v58  ;;  %4554 = vmatprep.subr.bf16.mxu1 %v7356_v20  ;;  %v7366_v58 = vld [vmem:[#allocation42_spill] sm:$0xff]  ;;  %v7367_v20 = vld [vmem:[#allocation43_spill] sm:$0xff] }
 0x50e   :  { %4492 = vmatpush1.bf16.msra.mxu0 %v7357_v57  ;;  %4556 = vmatpush1.bf16.msra.mxu1 %v7358_v13  ;;  %v7368_v57 = vld [vmem:[#allocation44_spill] sm:$0xff]  ;;  %v7369_v13 = vld [vmem:[#allocation45_spill] sm:$0xff] }
 0x50f   :  { %4494 = vmatprep.subr.bf16.mxu0 %v7359_v11  ;;  %4558 = vmatprep.subr.bf16.mxu1 %v7360_v52  ;;  %v7370_v11 = vld [vmem:[#allocation46_spill] sm:$0xff]  ;;  %v7371_v52 = vld [vmem:[#allocation47_spill] sm:$0xff] }
 0x512   :  { %4496 = vmatpush1.bf16.msra.mxu0 %v7361_v36  ;;  %4560 = vmatpush1.bf16.msra.mxu1 %v7362_v60  ;;  %v7372_v36 = vld [vmem:[#allocation48_spill] sm:$0xff]  ;;  %v7373_v60 = vld [vmem:[#allocation49_spill] sm:$0xff] }
 0x513   :  { %4498 = vmatprep.subr.bf16.mxu0 %v7363_v23  ;;  %4562 = vmatprep.subr.bf16.mxu1 %v7364_v49  ;;  %v7374_v23 = vld [vmem:[#allocation50_spill] sm:$0xff]  ;;  %v7375_v49 = vld [vmem:[#allocation51_spill] sm:$0xff] }
 0x516   :  { %4500 = vmatpush1.bf16.msra.mxu0 %v7365_v53  ;;  %4564 = vmatpush1.bf16.msra.mxu1 %v7366_v58  ;;  %v7376_v53 = vld [vmem:[#allocation52_spill] sm:$0xff]  ;;  %v7377_v58 = vld [vmem:[#allocation53_spill] sm:$0xff] }
 0x517   :  { %4502 = vmatprep.subr.bf16.mxu0 %v7367_v20  ;;  %4566 = vmatprep.subr.bf16.mxu1 %v7368_v57  ;;  %v7378_v20 = vld [vmem:[#allocation54_spill] sm:$0xff]  ;;  %v7379_v57 = vld [vmem:[#allocation55_spill] sm:$0xff] }
 0x51a   :  { %4504 = vmatpush1.bf16.msra.mxu0 %v7369_v13  ;;  %4568 = vmatpush1.bf16.msra.mxu1 %v7370_v11  ;;  %v7380_v13 = vld [vmem:[#allocation56_spill] sm:$0xff]  ;;  %v7381_v11 = vld [vmem:[#allocation57_spill] sm:$0xff] }
 0x51b   :  { %4506 = vmatprep.subr.bf16.mxu0 %v7371_v52  ;;  %4570 = vmatprep.subr.bf16.mxu1 %v7372_v36  ;;  %v7382_v52 = vld [vmem:[#allocation58_spill] sm:$0xff]  ;;  %v7383_v36 = vld [vmem:[#allocation59_spill] sm:$0xff] }
 0x51e   :  { %4508 = vmatpush1.bf16.msra.mxu0 %v7373_v60  ;;  %4572 = vmatpush1.bf16.msra.mxu1 %v7374_v23  ;;  %v7384_v60 = vld [vmem:[#allocation60_spill] sm:$0xff]  ;;  %v7385_v23 = vld [vmem:[#allocation61_spill] sm:$0xff] }
 0x51f   :  { %4510 = vmatprep.subr.bf16.mxu0 %v7375_v49  ;;  %4574 = vmatprep.subr.bf16.mxu1 %v7376_v53  ;;  %v7386_v49 = vld [vmem:[#allocation62_spill] sm:$0xff]  ;;  %v7387_v53 = vld [vmem:[#allocation63_spill] sm:$0xff] }
 0x522   :  { %4512 = vmatpush1.bf16.msra.mxu0 %v7377_v58  ;;  %4576 = vmatpush1.bf16.msra.mxu1 %v7378_v20  ;;  %v7388_v58 = vld [vmem:[#allocation64_spill] sm:$0xff]  ;;  %v7389_v20 = vld [vmem:[#allocation65_spill] sm:$0xff] }
 0x523   :  { %4514 = vmatprep.subr.bf16.mxu0 %v7379_v57  ;;  %4578 = vmatprep.subr.bf16.mxu1 %v7380_v13  ;;  %v7390_v57 = vld [vmem:[#allocation66_spill] sm:$0xff] }
 0x524   :  { %v7391_v13 = vld [vmem:[#allocation10_spill] sm:$0xff] }
 0x526   :  { %4516 = vmatpush1.bf16.msra.mxu0 %v7381_v11  ;;  %4580 = vmatpush1.bf16.msra.mxu1 %v7382_v52  ;;  %v7392_v11 = vld [vmem:[#allocation11_spill] sm:$0xff] }
 0x527   :  { %4518 = vmatprep.subr.bf16.mxu0 %v7383_v36  ;;  %4582 = vmatprep.subr.bf16.mxu1 %v7384_v60 }
 0x52a   :  { %4520 = vmatpush1.bf16.msra.mxu0 %v7385_v23  ;;  %4584 = vmatpush1.bf16.msra.mxu1 %v7386_v49 }
 0x52b   :  { %4522 = vmatprep.subr.bf16.mxu0 %v7387_v53  ;;  %4586 = vmatprep.subr.bf16.mxu1 %v7388_v58  ;;  %v7394_v58 = vld [vmem:[#allocation72_spill] sm:$0xff] }
 0x52e   :  { %4524 = vmatpush1.bf16.msra.mxu0 %v7389_v20  ;;  %4588 = vmatpush1.bf16.msra.mxu1 %v7390_v57 }
 0x52f   :  { %4590 = vmatprep.subr.bf16.mxu0 %v7391_v13  ;;  %4622 = vmatprep.subr.bf16.mxu1 %v7392_v11 }
 0x5a4   :  { %v1901_v52 = vpop.f32.mrb[22].mxu0  ;;  %v1972_v36 = vpop.f32.mrb[22].mxu1 }
 0x5a5   :  { %v1902_v60 = vadd.f32 %v1901_v52, %v7393_v27  ;;  %v1903_v46 = vpop.f32.mrb[23].mxu0  ;;  %v1974_v23 = vpop.f32.mrb[23].mxu1  ;;  %v1973_v20 = vadd.f32 %v1972_v36, %v7394_v58 }
 0x5a6   :  { %v1904_v49 = vadd.f32 %v1903_v46, %v7271_v45  ;;  %v1975_v57 = vadd.f32 %v1974_v23, %v7334_v39 }
 0x5a7   :  { %v3517_v56 = vmul.f32 -1.442695, %v1902_v60  ;;  %v3519_v16 = vmul.f32 -1.442695, %v1973_v20 }
 0x5a8   :  { %v3518_v53 = vmul.f32 -1.442695, %v1904_v49 }
 0x5a9   :  { %5373 = vpow2.f32 %v3517_v56 }
 0x5aa   :  { %5375 = vpow2.f32 %v3518_v53 }
 0x5ab   :  { %5377 = vtanh.f32 %v1975_v57 }
 0x5ac   :  { %5379 = vpow2.f32 %v3519_v16 }
 0x5b3   :  { %v5374_v13 = vpop.eup %5373 }
 0x5b4   :  { %v1986_v42 = vadd.f32 1.0, %v5374_v13  ;;  %v5376_v11 = vpop.eup %5375 }
 0x5b5   :  { %v1987_v52 = vadd.f32 1.0, %v5376_v11  ;;  %v5378_v27 = vpop.eup %5377 }
 0x5b6   :  { %5381 = vrcp.f32 %v1986_v42  ;;  %v5380_v0 = vpop.eup %5379 }
 0x5b7   :  { %5383 = vrcp.f32 %v1987_v52  ;;  %v1988_v56 = vadd.f32 1.0, %v5380_v0  ;;  %v7395_v0 = vld [vmem:[#allocation70_spill] sm:$0xff] }
 0x5b9   :  { %5385 = vrcp.f32 %v1988_v56 }
 0x5c0   :  { %v5382_v46 = vpop.eup %5381 }
 0x5c1   :  { %v1997_v60 = vmul.f32 %v5382_v46, %v5378_v27  ;;  %v5384_v49 = vpop.eup %5383 }
 0x5c2   :  { %v1996_v53 = vmul.f32 %v5384_v49, %v6425_v22 }
 0x5c3   :  { %v5386_v22 = vpop.eup %5385 }
 0x5c4   :  { %v2074_v36 = vpop.f32.mrb[8].mxu0  ;;  %v2145_v58 = vpop.f32.mrb[8].mxu1  ;;  %v6539_v23 = vadd.f32 %v1997_v60, %v1996_v53 }
 0x5c5   :  { %v5197_v20 = vadd.f32 %v2074_v36, %v7274_v3  ;;  %v2076_v57 = vpop.f32.mrb[9].mxu0  ;;  %v2147_v13 = vpop.f32.mrb[9].mxu1  ;;  %v5213_v27 = vadd.f32 %v2145_v58, %v7395_v0 }
 0x5c6   :  { %v5198_v42 = vadd.f32 %v2076_v57, %v7214_v26  ;;  %5387 = vtanh.f32 %v6539_v23  ;;  %v5214_v52 = vadd.f32 %v2147_v13, %v6070_v1 }
 0x5c7   :  { %v3520_v16 = vmul.f32 -1.442695, %v5197_v20  ;;  %v3522_v60 = vmul.f32 -1.442695, %v5213_v27 }
 0x5c8   :  { %v3521_v11 = vmul.f32 -1.442695, %v5198_v42 }
 0x5c9   :  { %5389 = vpow2.f32 %v3520_v16 }
 0x5ca   :  { %5391 = vpow2.f32 %v3521_v11 }
 0x5cb   :  { %5393 = vtanh.f32 %v5214_v52 }
 0x5cc   :  { %5395 = vpow2.f32 %v3522_v60  ;;  %v7398_v60 = vld [vmem:[#allocation14_spill] sm:$0xff] }
 0x5d0   :  { %v5388_v46 = vpop.eup %5387 }
 0x5d1   :  { %v2000_v49 = vmul.f32 %v5388_v46, %v5386_v22 }
 0x5d3   :  { %v5390_v53 = vpop.eup %5389  ;;  %2242 = vmatprep.mubr.f32.mxu0 %v2000_v49  ;;  %2313 = vmatprep.mubr.f32.mxu1 %v2000_v49  ;;  %v7399_v49 = vld [vmem:[#allocation15_spill] sm:$0xff] }
 0x5d4   :  { %v2163_v36 = vadd.f32 1.0, %v5390_v53  ;;  %v5392_v56 = vpop.eup %5391  ;;  %v7400_v53 = vld [vmem:[#allocation16_spill] sm:$0xff] }
 0x5d5   :  { %v2164_v20 = vadd.f32 1.0, %v5392_v56  ;;  %v5394_v57 = vpop.eup %5393  ;;  %v7402_v56 = vld [vmem:[#allocation18_spill] sm:$0xff] }
 0x5d6   :  { %5397 = vrcp.f32 %v2163_v36  ;;  %v5396_v42 = vpop.eup %5395  ;;  %v7401_v36 = vld [vmem:[#allocation17_spill] sm:$0xff] }
 0x5d7   :  { %5399 = vrcp.f32 %v2164_v20  ;;  %v2165_v0 = vadd.f32 1.0, %v5396_v42  ;;  %v7403_v20 = vld [vmem:[#allocation19_spill] sm:$0xff]  ;;  %v7405_v42 = vld [vmem:[#allocation21_spill] sm:$0xff] }
 0x5d9   :  { %5401 = vrcp.f32 %v2165_v0  ;;  %v7397_v0 = vld [vmem:[#allocation13_spill] sm:$0xff] }
 0x5e0   :  { %v5398_v16 = vpop.eup %5397 }
 0x5e1   :  { %v2174_v58 = vmul.f32 %v5398_v16, %v5394_v57  ;;  %v5400_v11 = vpop.eup %5399  ;;  %v7404_v57 = vld [vmem:[#allocation20_spill] sm:$0xff]  ;;  %v7406_v16 = vld [vmem:[#allocation22_spill] sm:$0xff] }
 0x5e2   :  { %v2173_v13 = vmul.f32 %v5400_v11, %v6433_v50  ;;  %v7396_v50 = vld [vmem:[#allocation12_spill] sm:$0xff] }
 0x5e3   :  { %v5402_v22 = vpop.eup %5401  ;;  %v7408_v11 = vld [vmem:[#allocation24_spill] sm:$0xff] }
 0x5e4   :  { %v6547_v27 = vadd.f32 %v2174_v58, %v2173_v13  ;;  %v7407_v58 = vld [vmem:[#allocation23_spill] sm:$0xff]  ;;  %v7409_v13 = vld [vmem:[#allocation25_spill] sm:$0xff] }
 0x5e6   :  { %5403 = vtanh.f32 %v6547_v27 }
 0x5f0   :  { %v5404_v52 = vpop.eup %5403 }
 0x5f1   :  { %v2177_v46 = vmul.f32 %v5404_v52, %v5402_v22  ;;  %v7410_v22 = vld [vmem:[#allocation26_spill] sm:$0xff]  ;;  %v7411_v52 = vld [vmem:[#allocation27_spill] sm:$0xff] }
 0x5f3   :  { %2243 = vmatmul.mubr.f32.vlgmr.msra.gmra.mrb[24].mxu0 %v2177_v46  ;;  %2314 = vmatmul.mubr.f32.vlgmr.msra.gmra.mrb[24].mxu1 %v2177_v46 }
 0x5f4   :  { %4592 = vmatpush1.bf16.msra.mxu0 %v5701_v62  ;;  %4624 = vmatpush1.bf16.msra.mxu1 %v5704_v2 }
 0x5f5   :  { %4594 = vmatprep.subr.bf16.mxu0 %v5707_v5  ;;  %4626 = vmatprep.subr.bf16.mxu1 %v5710_v8 }
 0x5f6   :  { %2415 = vmatprep.mubr.f32.mxu0 %v7153_v40  ;;  %2486 = vmatprep.mubr.f32.mxu1 %v7153_v40 }
 0x5f8   :  { %4596 = vmatpush1.bf16.msra.mxu0 %v5717_v12  ;;  %4628 = vmatpush1.bf16.msra.mxu1 %v5721_v15 }
 0x5f9   :  { %4598 = vmatprep.subr.bf16.mxu0 %v5725_v18  ;;  %4630 = vmatprep.subr.bf16.mxu1 %v5729_v21 }
 0x5fc   :  { %4600 = vmatpush1.bf16.msra.mxu0 %v5736_v25  ;;  %4632 = vmatpush1.bf16.msra.mxu1 %v5740_v28 }
 0x5fd   :  { %4602 = vmatprep.subr.bf16.mxu0 %v5744_v31  ;;  %4634 = vmatprep.subr.bf16.mxu1 %v5748_v34 }
 0x600   :  { %4604 = vmatpush1.bf16.msra.mxu0 %v5755_v38  ;;  %4636 = vmatpush1.bf16.msra.mxu1 %v5759_v41 }
 0x601   :  { %4606 = vmatprep.subr.bf16.mxu0 %v5763_v44  ;;  %4638 = vmatprep.subr.bf16.mxu1 %v5767_v47 }
 0x604   :  { %4608 = vmatpush1.bf16.msra.mxu0 %v5774_v51  ;;  %4640 = vmatpush1.bf16.msra.mxu1 %v5778_v55 }
 0x605   :  { %4610 = vmatprep.subr.bf16.mxu0 %v5782_v59  ;;  %4642 = vmatprep.subr.bf16.mxu1 %v5786_v63 }
 0x608   :  { %4612 = vmatpush1.bf16.msra.mxu0 %v5793_v6  ;;  %4644 = vmatpush1.bf16.msra.mxu1 %v5797_v10 }
 0x609   :  { %4614 = vmatprep.subr.bf16.mxu0 %v5801_v14  ;;  %4646 = vmatprep.subr.bf16.mxu1 %v5805_v19 }
 0x60c   :  { %4616 = vmatpush1.bf16.msra.mxu0 %v5812_v24  ;;  %4648 = vmatpush1.bf16.msra.mxu1 %v5816_v29 }
 0x60d   :  { %4618 = vmatprep.subr.bf16.mxu0 %v5820_v33  ;;  %4650 = vmatprep.subr.bf16.mxu1 %v5824_v37 }
 0x610   :  { %4620 = vmatpush1.bf16.msra.mxu0 %v5831_v43  ;;  %4652 = vmatpush1.bf16.msra.mxu1 %v5835_v48 }
 0x611   :  { %4654 = vmatprep.subr.bf16.mxu0 %v5839_v54  ;;  %4718 = vmatprep.subr.bf16.mxu1 %v5843_v61 }
 0x613   :  { %2416 = vmatmul.mubr.f32.vlgmr.msra.gmra.mrb[10].mxu0 %v2177_v46  ;;  %2487 = vmatmul.mubr.f32.vlgmr.msra.gmra.mrb[10].mxu1 %v2177_v46  ;;  %v7412_v46 = vld [vmem:[#allocation28_spill] sm:$0xff] }
 0x614   :  { %4656 = vmatpush1.bf16.msra.mxu0 %v5847_v4  ;;  %4720 = vmatpush1.bf16.msra.mxu1 %v5851_v7 }
 0x615   :  { %4658 = vmatprep.subr.bf16.mxu0 %v5853_v9  ;;  %4722 = vmatprep.subr.bf16.mxu1 %v5857_v17 }
 0x618   :  { %4660 = vmatpush1.bf16.msra.mxu0 %v5863_v30  ;;  %4724 = vmatpush1.bf16.msra.mxu1 %v5867_v32 }
 0x619   :  { %4662 = vmatprep.subr.bf16.mxu0 %v5869_v35  ;;  %4726 = vmatprep.subr.bf16.mxu1 %v7396_v50 }
 0x61c   :  { %4664 = vmatpush1.bf16.msra.mxu0 %v7397_v0  ;;  %4728 = vmatpush1.bf16.msra.mxu1 %v7398_v60 }
 0x61d   :  { %4666 = vmatprep.subr.bf16.mxu0 %v7399_v49  ;;  %4730 = vmatprep.subr.bf16.mxu1 %v7400_v53 }
 0x620   :  { %4668 = vmatpush1.bf16.msra.mxu0 %v7401_v36  ;;  %4732 = vmatpush1.bf16.msra.mxu1 %v7402_v56  ;;  %v7413_v56 = vld [vmem:[#allocation29_spill] sm:$0xff]  ;;  %v7453_v36 = vld [vmem:[#allocation67_spill] sm:$0xff] }
 0x621   :  { %4670 = vmatprep.subr.bf16.mxu0 %v7403_v20  ;;  %4734 = vmatprep.subr.bf16.mxu1 %v7404_v57  ;;  %v7414_v20 = vld [vmem:[#allocation30_spill] sm:$0xff]  ;;  %v7415_v57 = vld [vmem:[#allocation31_spill] sm:$0xff] }
 0x624   :  { %4672 = vmatpush1.bf16.msra.mxu0 %v7405_v42  ;;  %4736 = vmatpush1.bf16.msra.mxu1 %v7406_v16  ;;  %v7416_v42 = vld [vmem:[#allocation32_spill] sm:$0xff]  ;;  %v7417_v16 = vld [vmem:[#allocation33_spill] sm:$0xff] }
 0x625   :  { %4674 = vmatprep.subr.bf16.mxu0 %v7407_v58  ;;  %4738 = vmatprep.subr.bf16.mxu1 %v7408_v11  ;;  %v7418_v58 = vld [vmem:[#allocation34_spill] sm:$0xff]  ;;  %v7419_v11 = vld [vmem:[#allocation35_spill] sm:$0xff] }
 0x628   :  { %4676 = vmatpush1.bf16.msra.mxu0 %v7409_v13  ;;  %4740 = vmatpush1.bf16.msra.mxu1 %v7410_v22  ;;  %v7420_v13 = vld [vmem:[#allocation36_spill] sm:$0xff]  ;;  %v7421_v22 = vld [vmem:[#allocation37_spill] sm:$0xff] }
 0x629   :  { %4678 = vmatprep.subr.bf16.mxu0 %v7411_v52  ;;  %4742 = vmatprep.subr.bf16.mxu1 %v7412_v46  ;;  %v7422_v52 = vld [vmem:[#allocation38_spill] sm:$0xff]  ;;  %v7423_v46 = vld [vmem:[#allocation39_spill] sm:$0xff] }
 0x62c   :  { %4680 = vmatpush1.bf16.msra.mxu0 %v7413_v56  ;;  %4744 = vmatpush1.bf16.msra.mxu1 %v7414_v20  ;;  %v7424_v56 = vld [vmem:[#allocation40_spill] sm:$0xff]  ;;  %v7425_v20 = vld [vmem:[#allocation41_spill] sm:$0xff] }
 0x62d   :  { %4682 = vmatprep.subr.bf16.mxu0 %v7415_v57  ;;  %4746 = vmatprep.subr.bf16.mxu1 %v7416_v42  ;;  %v7426_v57 = vld [vmem:[#allocation42_spill] sm:$0xff]  ;;  %v7427_v42 = vld [vmem:[#allocation43_spill] sm:$0xff] }
 0x630   :  { %4684 = vmatpush1.bf16.msra.mxu0 %v7417_v16  ;;  %4748 = vmatpush1.bf16.msra.mxu1 %v7418_v58  ;;  %v7428_v16 = vld [vmem:[#allocation44_spill] sm:$0xff]  ;;  %v7429_v58 = vld [vmem:[#allocation45_spill] sm:$0xff] }
 0x631   :  { %4686 = vmatprep.subr.bf16.mxu0 %v7419_v11  ;;  %4750 = vmatprep.subr.bf16.mxu1 %v7420_v13  ;;  %v7430_v11 = vld [vmem:[#allocation46_spill] sm:$0xff]  ;;  %v7431_v13 = vld [vmem:[#allocation47_spill] sm:$0xff] }
 0x634   :  { %4688 = vmatpush1.bf16.msra.mxu0 %v7421_v22  ;;  %4752 = vmatpush1.bf16.msra.mxu1 %v7422_v52  ;;  %v7432_v22 = vld [vmem:[#allocation48_spill] sm:$0xff]  ;;  %v7433_v52 = vld [vmem:[#allocation49_spill] sm:$0xff] }
 0x635   :  { %4690 = vmatprep.subr.bf16.mxu0 %v7423_v46  ;;  %4754 = vmatprep.subr.bf16.mxu1 %v7424_v56  ;;  %v7434_v46 = vld [vmem:[#allocation50_spill] sm:$0xff]  ;;  %v7435_v56 = vld [vmem:[#allocation51_spill] sm:$0xff] }
 0x638   :  { %4692 = vmatpush1.bf16.msra.mxu0 %v7425_v20  ;;  %4756 = vmatpush1.bf16.msra.mxu1 %v7426_v57  ;;  %v7436_v20 = vld [vmem:[#allocation52_spill] sm:$0xff]  ;;  %v7437_v57 = vld [vmem:[#allocation53_spill] sm:$0xff] }
 0x639   :  { %4694 = vmatprep.subr.bf16.mxu0 %v7427_v42  ;;  %4758 = vmatprep.subr.bf16.mxu1 %v7428_v16  ;;  %v7438_v42 = vld [vmem:[#allocation54_spill] sm:$0xff]  ;;  %v7439_v16 = vld [vmem:[#allocation55_spill] sm:$0xff] }
 0x63c   :  { %4696 = vmatpush1.bf16.msra.mxu0 %v7429_v58  ;;  %4760 = vmatpush1.bf16.msra.mxu1 %v7430_v11  ;;  %v7440_v58 = vld [vmem:[#allocation56_spill] sm:$0xff]  ;;  %v7441_v11 = vld [vmem:[#allocation57_spill] sm:$0xff] }
 0x63d   :  { %4698 = vmatprep.subr.bf16.mxu0 %v7431_v13  ;;  %4762 = vmatprep.subr.bf16.mxu1 %v7432_v22  ;;  %v7442_v13 = vld [vmem:[#allocation58_spill] sm:$0xff]  ;;  %v7443_v22 = vld [vmem:[#allocation59_spill] sm:$0xff] }
 0x640   :  { %4700 = vmatpush1.bf16.msra.mxu0 %v7433_v52  ;;  %4764 = vmatpush1.bf16.msra.mxu1 %v7434_v46  ;;  %v7444_v52 = vld [vmem:[#allocation60_spill] sm:$0xff]  ;;  %v7445_v46 = vld [vmem:[#allocation61_spill] sm:$0xff] }
 0x641   :  { %4702 = vmatprep.subr.bf16.mxu0 %v7435_v56  ;;  %4766 = vmatprep.subr.bf16.mxu1 %v7436_v20  ;;  %v7446_v56 = vld [vmem:[#allocation62_spill] sm:$0xff]  ;;  %v7447_v20 = vld [vmem:[#allocation63_spill] sm:$0xff] }
 0x644   :  { %4704 = vmatpush1.bf16.msra.mxu0 %v7437_v57  ;;  %4768 = vmatpush1.bf16.msra.mxu1 %v7438_v42  ;;  %v7448_v57 = vld [vmem:[#allocation64_spill] sm:$0xff]  ;;  %v7449_v42 = vld [vmem:[#allocation65_spill] sm:$0xff] }
 0x645   :  { %4706 = vmatprep.subr.bf16.mxu0 %v7439_v16  ;;  %4770 = vmatprep.subr.bf16.mxu1 %v7440_v58  ;;  %v7450_v16 = vld [vmem:[#allocation66_spill] sm:$0xff] }
 0x646   :  { %v7451_v58 = vld [vmem:[#allocation10_spill] sm:$0xff] }
 0x648   :  { %4708 = vmatpush1.bf16.msra.mxu0 %v7441_v11  ;;  %4772 = vmatpush1.bf16.msra.mxu1 %v7442_v13  ;;  %v7452_v11 = vld [vmem:[#allocation11_spill] sm:$0xff] }
 0x649   :  { %4710 = vmatprep.subr.bf16.mxu0 %v7443_v22  ;;  %4774 = vmatprep.subr.bf16.mxu1 %v7444_v52 }
 0x64c   :  { %4712 = vmatpush1.bf16.msra.mxu0 %v7445_v46  ;;  %4776 = vmatpush1.bf16.msra.mxu1 %v7446_v56 }
 0x64d   :  { %4714 = vmatprep.subr.bf16.mxu0 %v7447_v20  ;;  %4778 = vmatprep.subr.bf16.mxu1 %v7448_v57  ;;  %v7454_v57 = vld [vmem:[#allocation72_spill] sm:$0xff] }
 0x650   :  { %4716 = vmatpush1.bf16.msra.mxu0 %v7449_v42  ;;  %4780 = vmatpush1.bf16.msra.mxu1 %v7450_v16 }
 0x651   :  { %4782 = vmatprep.subr.bf16.mxu0 %v7451_v58  ;;  %4814 = vmatprep.subr.bf16.mxu1 %v7452_v11 }
 0x6c6   :  { %v2244_v13 = vpop.f32.mrb[24].mxu0  ;;  %v2315_v22 = vpop.f32.mrb[24].mxu1 }
 0x6c7   :  { %v2245_v52 = vadd.f32 %v2244_v13, %v7453_v36  ;;  %v2246_v53 = vpop.f32.mrb[25].mxu0  ;;  %v2317_v46 = vpop.f32.mrb[25].mxu1  ;;  %v2316_v42 = vadd.f32 %v2315_v22, %v7454_v57 }
 0x6c8   :  { %v2247_v56 = vadd.f32 %v2246_v53, %v7271_v45  ;;  %v2318_v16 = vadd.f32 %v2317_v46, %v7334_v39 }
 0x6c9   :  { %v3523_v49 = vmul.f32 -1.442695, %v2245_v52  ;;  %v3525_v60 = vmul.f32 -1.442695, %v2316_v42 }
 0x6ca   :  { %v3524_v20 = vmul.f32 -1.442695, %v2247_v56 }
 0x6cb   :  { %5405 = vpow2.f32 %v3523_v49 }
 0x6cc   :  { %5407 = vpow2.f32 %v3524_v20 }
 0x6cd   :  { %5409 = vtanh.f32 %v2318_v16 }
 0x6ce   :  { %5411 = vpow2.f32 %v3525_v60 }
 0x6d5   :  { %v5406_v58 = vpop.eup %5405 }
 0x6d6   :  { %v2329_v0 = vadd.f32 1.0, %v5406_v58  ;;  %v5408_v11 = vpop.eup %5407 }
 0x6d7   :  { %v2330_v13 = vadd.f32 1.0, %v5408_v11  ;;  %v5410_v36 = vpop.eup %5409 }
 0x6d8   :  { %5413 = vrcp.f32 %v2329_v0  ;;  %v5412_v50 = vpop.eup %5411 }
 0x6d9   :  { %5415 = vrcp.f32 %v2330_v13  ;;  %v2331_v49 = vadd.f32 1.0, %v5412_v50  ;;  %v7455_v50 = vld [vmem:[#allocation70_spill] sm:$0xff] }
 0x6db   :  { %5417 = vrcp.f32 %v2331_v49 }
 0x6e2   :  { %v5414_v53 = vpop.eup %5413 }
 0x6e3   :  { %v2340_v52 = vmul.f32 %v5414_v53, %v5410_v36  ;;  %v5416_v56 = vpop.eup %5415 }
 0x6e4   :  { %v2339_v20 = vmul.f32 %v5416_v56, %v6539_v23 }
 0x6e5   :  { %v5418_v23 = vpop.eup %5417 }
 0x6e6   :  { %v2417_v22 = vpop.f32.mrb[10].mxu0  ;;  %v2488_v57 = vpop.f32.mrb[10].mxu1  ;;  %v6653_v46 = vadd.f32 %v2340_v52, %v2339_v20 }
 0x6e7   :  { %v5199_v42 = vadd.f32 %v2417_v22, %v7274_v3  ;;  %v2419_v16 = vpop.f32.mrb[11].mxu0  ;;  %v2490_v58 = vpop.f32.mrb[11].mxu1  ;;  %v5215_v36 = vadd.f32 %v2488_v57, %v7455_v50 }
 0x6e8   :  { %v5200_v0 = vadd.f32 %v2419_v16, %v7214_v26  ;;  %5419 = vtanh.f32 %v6653_v46  ;;  %v5216_v13 = vadd.f32 %v2490_v58, %v6070_v1 }
 0x6e9   :  { %v3526_v60 = vmul.f32 -1.442695, %v5199_v42  ;;  %v3528_v52 = vmul.f32 -1.442695, %v5215_v36 }
 0x6ea   :  { %v3527_v11 = vmul.f32 -1.442695, %v5200_v0 }
 0x6eb   :  { %5421 = vpow2.f32 %v3526_v60 }
 0x6ec   :  { %5423 = vpow2.f32 %v3527_v11 }
 0x6ed   :  { %5425 = vtanh.f32 %v5216_v13 }
 0x6ee   :  { %5427 = vpow2.f32 %v3528_v52  ;;  %v7458_v52 = vld [vmem:[#allocation14_spill] sm:$0xff] }
 0x6f2   :  { %v5420_v53 = vpop.eup %5419 }
 0x6f3   :  { %v2343_v56 = vmul.f32 %v5420_v53, %v5418_v23 }
 0x6f5   :  { %v5422_v20 = vpop.eup %5421  ;;  %2585 = vmatprep.mubr.f32.mxu0 %v2343_v56  ;;  %2656 = vmatprep.mubr.f32.mxu1 %v2343_v56  ;;  %v7459_v56 = vld [vmem:[#allocation15_spill] sm:$0xff] }
 0x6f6   :  { %v2506_v22 = vadd.f32 1.0, %v5422_v20  ;;  %v5424_v49 = vpop.eup %5423  ;;  %v7460_v20 = vld [vmem:[#allocation16_spill] sm:$0xff] }
 0x6f7   :  { %v2507_v42 = vadd.f32 1.0, %v5424_v49  ;;  %v5426_v16 = vpop.eup %5425  ;;  %v7462_v49 = vld [vmem:[#allocation18_spill] sm:$0xff] }
 0x6f8   :  { %5429 = vrcp.f32 %v2506_v22  ;;  %v5428_v0 = vpop.eup %5427  ;;  %v7461_v22 = vld [vmem:[#allocation17_spill] sm:$0xff] }
 0x6f9   :  { %5431 = vrcp.f32 %v2507_v42  ;;  %v2508_v50 = vadd.f32 1.0, %v5428_v0  ;;  %v7463_v42 = vld [vmem:[#allocation19_spill] sm:$0xff]  ;;  %v7465_v0 = vld [vmem:[#allocation21_spill] sm:$0xff] }
 0x6fb   :  { %5433 = vrcp.f32 %v2508_v50  ;;  %v7457_v50 = vld [vmem:[#allocation13_spill] sm:$0xff] }
 0x702   :  { %v5430_v60 = vpop.eup %5429 }
 0x703   :  { %v2517_v57 = vmul.f32 %v5430_v60, %v5426_v16  ;;  %v5432_v11 = vpop.eup %5431  ;;  %v7464_v16 = vld [vmem:[#allocation20_spill] sm:$0xff]  ;;  %v7466_v60 = vld [vmem:[#allocation22_spill] sm:$0xff] }
 0x704   :  { %v2516_v58 = vmul.f32 %v5432_v11, %v6547_v27  ;;  %v7456_v27 = vld [vmem:[#allocation12_spill] sm:$0xff] }
 0x705   :  { %v5434_v23 = vpop.eup %5433  ;;  %v7468_v11 = vld [vmem:[#allocation24_spill] sm:$0xff] }
 0x706   :  { %v6661_v36 = vadd.f32 %v2517_v57, %v2516_v58  ;;  %v7467_v57 = vld [vmem:[#allocation23_spill] sm:$0xff]  ;;  %v7469_v58 = vld [vmem:[#allocation25_spill] sm:$0xff] }
 0x708   :  { %5435 = vtanh.f32 %v6661_v36 }
 0x712   :  { %v5436_v13 = vpop.eup %5435 }
 0x713   :  { %v2520_v53 = vmul.f32 %v5436_v13, %v5434_v23  ;;  %v7470_v23 = vld [vmem:[#allocation26_spill] sm:$0xff]  ;;  %v7471_v13 = vld [vmem:[#allocation27_spill] sm:$0xff] }
 0x715   :  { %2586 = vmatmul.mubr.f32.vlgmr.msra.gmra.mrb[26].mxu0 %v2520_v53  ;;  %2657 = vmatmul.mubr.f32.vlgmr.msra.gmra.mrb[26].mxu1 %v2520_v53 }
 0x716   :  { %4784 = vmatpush1.bf16.msra.mxu0 %v5701_v62  ;;  %4816 = vmatpush1.bf16.msra.mxu1 %v5704_v2 }
 0x717   :  { %4786 = vmatprep.subr.bf16.mxu0 %v5707_v5  ;;  %4818 = vmatprep.subr.bf16.mxu1 %v5710_v8 }
 0x718   :  { %2758 = vmatprep.mubr.f32.mxu0 %v7153_v40  ;;  %2829 = vmatprep.mubr.f32.mxu1 %v7153_v40 }
 0x71a   :  { %4788 = vmatpush1.bf16.msra.mxu0 %v5717_v12  ;;  %4820 = vmatpush1.bf16.msra.mxu1 %v5721_v15 }
 0x71b   :  { %4790 = vmatprep.subr.bf16.mxu0 %v5725_v18  ;;  %4822 = vmatprep.subr.bf16.mxu1 %v5729_v21 }
 0x71e   :  { %4792 = vmatpush1.bf16.msra.mxu0 %v5736_v25  ;;  %4824 = vmatpush1.bf16.msra.mxu1 %v5740_v28 }
 0x71f   :  { %4794 = vmatprep.subr.bf16.mxu0 %v5744_v31  ;;  %4826 = vmatprep.subr.bf16.mxu1 %v5748_v34 }
 0x722   :  { %4796 = vmatpush1.bf16.msra.mxu0 %v5755_v38  ;;  %4828 = vmatpush1.bf16.msra.mxu1 %v5759_v41 }
 0x723   :  { %4798 = vmatprep.subr.bf16.mxu0 %v5763_v44  ;;  %4830 = vmatprep.subr.bf16.mxu1 %v5767_v47 }
 0x726   :  { %4800 = vmatpush1.bf16.msra.mxu0 %v5774_v51  ;;  %4832 = vmatpush1.bf16.msra.mxu1 %v5778_v55 }
 0x727   :  { %4802 = vmatprep.subr.bf16.mxu0 %v5782_v59  ;;  %4834 = vmatprep.subr.bf16.mxu1 %v5786_v63 }
 0x72a   :  { %4804 = vmatpush1.bf16.msra.mxu0 %v5793_v6  ;;  %4836 = vmatpush1.bf16.msra.mxu1 %v5797_v10 }
 0x72b   :  { %4806 = vmatprep.subr.bf16.mxu0 %v5801_v14  ;;  %4838 = vmatprep.subr.bf16.mxu1 %v5805_v19 }
 0x72e   :  { %4808 = vmatpush1.bf16.msra.mxu0 %v5812_v24  ;;  %4840 = vmatpush1.bf16.msra.mxu1 %v5816_v29 }
 0x72f   :  { %4810 = vmatprep.subr.bf16.mxu0 %v5820_v33  ;;  %4842 = vmatprep.subr.bf16.mxu1 %v5824_v37 }
 0x732   :  { %4812 = vmatpush1.bf16.msra.mxu0 %v5831_v43  ;;  %4844 = vmatpush1.bf16.msra.mxu1 %v5835_v48 }
 0x733   :  { %4846 = vmatprep.subr.bf16.mxu0 %v5839_v54  ;;  %4910 = vmatprep.subr.bf16.mxu1 %v5843_v61 }
 0x735   :  { %2759 = vmatmul.mubr.f32.vlgmr.msra.gmra.mrb[12].mxu0 %v2520_v53  ;;  %2830 = vmatmul.mubr.f32.vlgmr.msra.gmra.mrb[12].mxu1 %v2520_v53  ;;  %v7472_v53 = vld [vmem:[#allocation28_spill] sm:$0xff] }
 0x736   :  { %4848 = vmatpush1.bf16.msra.mxu0 %v5847_v4  ;;  %4912 = vmatpush1.bf16.msra.mxu1 %v5851_v7 }
 0x737   :  { %4850 = vmatprep.subr.bf16.mxu0 %v5853_v9  ;;  %4914 = vmatprep.subr.bf16.mxu1 %v5857_v17 }
 0x73a   :  { %4852 = vmatpush1.bf16.msra.mxu0 %v5863_v30  ;;  %4916 = vmatpush1.bf16.msra.mxu1 %v5867_v32 }
 0x73b   :  { %4854 = vmatprep.subr.bf16.mxu0 %v5869_v35  ;;  %4918 = vmatprep.subr.bf16.mxu1 %v7456_v27 }
 0x73e   :  { %4856 = vmatpush1.bf16.msra.mxu0 %v7457_v50  ;;  %4920 = vmatpush1.bf16.msra.mxu1 %v7458_v52 }
 0x73f   :  { %4858 = vmatprep.subr.bf16.mxu0 %v7459_v56  ;;  %4922 = vmatprep.subr.bf16.mxu1 %v7460_v20 }
 0x742   :  { %4860 = vmatpush1.bf16.msra.mxu0 %v7461_v22  ;;  %4924 = vmatpush1.bf16.msra.mxu1 %v7462_v49  ;;  %v7473_v49 = vld [vmem:[#allocation29_spill] sm:$0xff]  ;;  %v7513_v22 = vld [vmem:[#allocation67_spill] sm:$0xff] }
 0x743   :  { %4862 = vmatprep.subr.bf16.mxu0 %v7463_v42  ;;  %4926 = vmatprep.subr.bf16.mxu1 %v7464_v16  ;;  %v7474_v42 = vld [vmem:[#allocation30_spill] sm:$0xff]  ;;  %v7475_v16 = vld [vmem:[#allocation31_spill] sm:$0xff] }
 0x746   :  { %4864 = vmatpush1.bf16.msra.mxu0 %v7465_v0  ;;  %4928 = vmatpush1.bf16.msra.mxu1 %v7466_v60  ;;  %v7476_v0 = vld [vmem:[#allocation32_spill] sm:$0xff]  ;;  %v7477_v60 = vld [vmem:[#allocation33_spill] sm:$0xff] }
 0x747   :  { %4866 = vmatprep.subr.bf16.mxu0 %v7467_v57  ;;  %4930 = vmatprep.subr.bf16.mxu1 %v7468_v11  ;;  %v7478_v57 = vld [vmem:[#allocation34_spill] sm:$0xff]  ;;  %v7479_v11 = vld [vmem:[#allocation35_spill] sm:$0xff] }
 0x74a   :  { %4868 = vmatpush1.bf16.msra.mxu0 %v7469_v58  ;;  %4932 = vmatpush1.bf16.msra.mxu1 %v7470_v23  ;;  %v7480_v58 = vld [vmem:[#allocation36_spill] sm:$0xff]  ;;  %v7481_v23 = vld [vmem:[#allocation37_spill] sm:$0xff] }
 0x74b   :  { %4870 = vmatprep.subr.bf16.mxu0 %v7471_v13  ;;  %4934 = vmatprep.subr.bf16.mxu1 %v7472_v53  ;;  %v7482_v13 = vld [vmem:[#allocation38_spill] sm:$0xff]  ;;  %v7483_v53 = vld [vmem:[#allocation39_spill] sm:$0xff] }
 0x74e   :  { %4872 = vmatpush1.bf16.msra.mxu0 %v7473_v49  ;;  %4936 = vmatpush1.bf16.msra.mxu1 %v7474_v42  ;;  %v7484_v49 = vld [vmem:[#allocation40_spill] sm:$0xff]  ;;  %v7485_v42 = vld [vmem:[#allocation41_spill] sm:$0xff] }
 0x74f   :  { %4874 = vmatprep.subr.bf16.mxu0 %v7475_v16  ;;  %4938 = vmatprep.subr.bf16.mxu1 %v7476_v0  ;;  %v7486_v16 = vld [vmem:[#allocation42_spill] sm:$0xff]  ;;  %v7487_v0 = vld [vmem:[#allocation43_spill] sm:$0xff] }
 0x752   :  { %4876 = vmatpush1.bf16.msra.mxu0 %v7477_v60  ;;  %4940 = vmatpush1.bf16.msra.mxu1 %v7478_v57  ;;  %v7488_v60 = vld [vmem:[#allocation44_spill] sm:$0xff]  ;;  %v7489_v57 = vld [vmem:[#allocation45_spill] sm:$0xff] }
 0x753   :  { %4878 = vmatprep.subr.bf16.mxu0 %v7479_v11  ;;  %4942 = vmatprep.subr.bf16.mxu1 %v7480_v58  ;;  %v7490_v11 = vld [vmem:[#allocation46_spill] sm:$0xff]  ;;  %v7491_v58 = vld [vmem:[#allocation47_spill] sm:$0xff] }
 0x756   :  { %4880 = vmatpush1.bf16.msra.mxu0 %v7481_v23  ;;  %4944 = vmatpush1.bf16.msra.mxu1 %v7482_v13  ;;  %v7492_v23 = vld [vmem:[#allocation48_spill] sm:$0xff]  ;;  %v7493_v13 = vld [vmem:[#allocation49_spill] sm:$0xff] }
 0x757   :  { %4882 = vmatprep.subr.bf16.mxu0 %v7483_v53  ;;  %4946 = vmatprep.subr.bf16.mxu1 %v7484_v49  ;;  %v7494_v53 = vld [vmem:[#allocation50_spill] sm:$0xff]  ;;  %v7495_v49 = vld [vmem:[#allocation51_spill] sm:$0xff] }
 0x75a   :  { %4884 = vmatpush1.bf16.msra.mxu0 %v7485_v42  ;;  %4948 = vmatpush1.bf16.msra.mxu1 %v7486_v16  ;;  %v7496_v42 = vld [vmem:[#allocation52_spill] sm:$0xff]  ;;  %v7497_v16 = vld [vmem:[#allocation53_spill] sm:$0xff] }
 0x75b   :  { %4886 = vmatprep.subr.bf16.mxu0 %v7487_v0  ;;  %4950 = vmatprep.subr.bf16.mxu1 %v7488_v60  ;;  %v7498_v0 = vld [vmem:[#allocation54_spill] sm:$0xff]  ;;  %v7499_v60 = vld [vmem:[#allocation55_spill] sm:$0xff] }
 0x75e   :  { %4888 = vmatpush1.bf16.msra.mxu0 %v7489_v57  ;;  %4952 = vmatpush1.bf16.msra.mxu1 %v7490_v11  ;;  %v7500_v57 = vld [vmem:[#allocation56_spill] sm:$0xff]  ;;  %v7501_v11 = vld [vmem:[#allocation57_spill] sm:$0xff] }
 0x75f   :  { %4890 = vmatprep.subr.bf16.mxu0 %v7491_v58  ;;  %4954 = vmatprep.subr.bf16.mxu1 %v7492_v23  ;;  %v7502_v58 = vld [vmem:[#allocation58_spill] sm:$0xff]  ;;  %v7503_v23 = vld [vmem:[#allocation59_spill] sm:$0xff] }
 0x762   :  { %4892 = vmatpush1.bf16.msra.mxu0 %v7493_v13  ;;  %4956 = vmatpush1.bf16.msra.mxu1 %v7494_v53  ;;  %v7504_v13 = vld [vmem:[#allocation60_spill] sm:$0xff]  ;;  %v7505_v53 = vld [vmem:[#allocation61_spill] sm:$0xff] }
 0x763   :  { %4894 = vmatprep.subr.bf16.mxu0 %v7495_v49  ;;  %4958 = vmatprep.subr.bf16.mxu1 %v7496_v42  ;;  %v7506_v49 = vld [vmem:[#allocation62_spill] sm:$0xff]  ;;  %v7507_v42 = vld [vmem:[#allocation63_spill] sm:$0xff] }
 0x766   :  { %4896 = vmatpush1.bf16.msra.mxu0 %v7497_v16  ;;  %4960 = vmatpush1.bf16.msra.mxu1 %v7498_v0  ;;  %v7508_v16 = vld [vmem:[#allocation64_spill] sm:$0xff]  ;;  %v7509_v0 = vld [vmem:[#allocation65_spill] sm:$0xff] }
 0x767   :  { %4898 = vmatprep.subr.bf16.mxu0 %v7499_v60  ;;  %4962 = vmatprep.subr.bf16.mxu1 %v7500_v57  ;;  %v7510_v60 = vld [vmem:[#allocation66_spill] sm:$0xff] }
 0x768   :  { %v7511_v57 = vld [vmem:[#allocation10_spill] sm:$0xff] }
 0x76a   :  { %4900 = vmatpush1.bf16.msra.mxu0 %v7501_v11  ;;  %4964 = vmatpush1.bf16.msra.mxu1 %v7502_v58  ;;  %v7512_v11 = vld [vmem:[#allocation11_spill] sm:$0xff] }
 0x76b   :  { %4902 = vmatprep.subr.bf16.mxu0 %v7503_v23  ;;  %4966 = vmatprep.subr.bf16.mxu1 %v7504_v13 }
 0x76e   :  { %4904 = vmatpush1.bf16.msra.mxu0 %v7505_v53  ;;  %4968 = vmatpush1.bf16.msra.mxu1 %v7506_v49 }
 0x76f   :  { %4906 = vmatprep.subr.bf16.mxu0 %v7507_v42  ;;  %4970 = vmatprep.subr.bf16.mxu1 %v7508_v16  ;;  %v7514_v16 = vld [vmem:[#allocation72_spill] sm:$0xff] }
 0x772   :  { %4908 = vmatpush1.bf16.msra.mxu0 %v7509_v0  ;;  %4972 = vmatpush1.bf16.msra.mxu1 %v7510_v60 }
 0x773   :  { %4974 = vmatprep.subr.bf16.mxu0 %v7511_v57  ;;  %5006 = vmatprep.subr.bf16.mxu1 %v7512_v11 }
 0x7e8   :  { %v2587_v58 = vpop.f32.mrb[26].mxu0  ;;  %v2658_v23 = vpop.f32.mrb[26].mxu1 }
 0x7e9   :  { %v2588_v13 = vadd.f32 %v2587_v58, %v7513_v22  ;;  %v2589_v20 = vpop.f32.mrb[27].mxu0  ;;  %v2660_v53 = vpop.f32.mrb[27].mxu1  ;;  %v2659_v0 = vadd.f32 %v2658_v23, %v7514_v16 }
 0x7ea   :  { %v2590_v49 = vadd.f32 %v2589_v20, %v7271_v45  ;;  %v2661_v60 = vadd.f32 %v2660_v53, %v7334_v39 }
 0x7eb   :  { %v3529_v56 = vmul.f32 -1.442695, %v2588_v13  ;;  %v3531_v52 = vmul.f32 -1.442695, %v2659_v0 }
 0x7ec   :  { %v3530_v42 = vmul.f32 -1.442695, %v2590_v49 }
 0x7ed   :  { %5437 = vpow2.f32 %v3529_v56 }
 0x7ee   :  { %5439 = vpow2.f32 %v3530_v42 }
 0x7ef   :  { %5441 = vtanh.f32 %v2661_v60 }
 0x7f0   :  { %5443 = vpow2.f32 %v3531_v52 }
 0x7f7   :  { %v5438_v57 = vpop.eup %5437 }
 0x7f8   :  { %v2672_v50 = vadd.f32 1.0, %v5438_v57  ;;  %v5440_v11 = vpop.eup %5439 }
 0x7f9   :  { %v2673_v58 = vadd.f32 1.0, %v5440_v11  ;;  %v5442_v22 = vpop.eup %5441 }
 0x7fa   :  { %5445 = vrcp.f32 %v2672_v50  ;;  %v5444_v27 = vpop.eup %5443 }
 0x7fb   :  { %5447 = vrcp.f32 %v2673_v58  ;;  %v2674_v56 = vadd.f32 1.0, %v5444_v27  ;;  %v7515_v27 = vld [vmem:[#allocation70_spill] sm:$0xff] }
 0x7fd   :  { %5449 = vrcp.f32 %v2674_v56 }
 0x804   :  { %v5446_v20 = vpop.eup %5445 }
 0x805   :  { %v2683_v13 = vmul.f32 %v5446_v20, %v5442_v22  ;;  %v5448_v49 = vpop.eup %5447 }
 0x806   :  { %v2682_v42 = vmul.f32 %v5448_v49, %v6653_v46 }
 0x807   :  { %v5450_v46 = vpop.eup %5449 }
 0x808   :  { %v2760_v23 = vpop.f32.mrb[12].mxu0  ;;  %v2831_v16 = vpop.f32.mrb[12].mxu1  ;;  %v6767_v53 = vadd.f32 %v2683_v13, %v2682_v42 }
 0x809   :  { %v5201_v0 = vadd.f32 %v2760_v23, %v7274_v3  ;;  %v2762_v60 = vpop.f32.mrb[13].mxu0  ;;  %v2833_v57 = vpop.f32.mrb[13].mxu1  ;;  %v5217_v22 = vadd.f32 %v2831_v16, %v7515_v27 }
 0x80a   :  { %v5202_v50 = vadd.f32 %v2762_v60, %v7214_v26  ;;  %5451 = vtanh.f32 %v6767_v53  ;;  %v5218_v58 = vadd.f32 %v2833_v57, %v6070_v1 }
 0x80b   :  { %v3532_v52 = vmul.f32 -1.442695, %v5201_v0  ;;  %v3534_v13 = vmul.f32 -1.442695, %v5217_v22 }
 0x80c   :  { %v3533_v11 = vmul.f32 -1.442695, %v5202_v50 }
 0x80d   :  { %5453 = vpow2.f32 %v3532_v52 }
 0x80e   :  { %5455 = vpow2.f32 %v3533_v11 }
 0x80f   :  { %5457 = vtanh.f32 %v5218_v58 }
 0x810   :  { %5459 = vpow2.f32 %v3534_v13  ;;  %v7557_v13 = vld [vmem:[#allocation53_spill] sm:$0xff] }
 0x814   :  { %v5452_v20 = vpop.eup %5451 }
 0x815   :  { %v2686_v49 = vmul.f32 %v5452_v20, %v5450_v46 }
 0x817   :  { %v5454_v42 = vpop.eup %5453  ;;  %2928 = vmatprep.mubr.f32.mxu0 %v2686_v49  ;;  %2999 = vmatprep.mubr.f32.mxu1 %v2686_v49  ;;  %v7558_v49 = vld [vmem:[#allocation54_spill] sm:$0xff] }
 0x818   :  { %v2849_v23 = vadd.f32 1.0, %v5454_v42  ;;  %v5456_v56 = vpop.eup %5455  ;;  %v7559_v42 = vld [vmem:[#allocation55_spill] sm:$0xff] }
 0x819   :  { %v2850_v0 = vadd.f32 1.0, %v5456_v56  ;;  %v5458_v60 = vpop.eup %5457  ;;  %v7561_v56 = vld [vmem:[#allocation57_spill] sm:$0xff] }
 0x81a   :  { %5461 = vrcp.f32 %v2849_v23  ;;  %v5460_v50 = vpop.eup %5459  ;;  %v7560_v23 = vld [vmem:[#allocation56_spill] sm:$0xff] }
 0x81b   :  { %5463 = vrcp.f32 %v2850_v0  ;;  %v2851_v27 = vadd.f32 1.0, %v5460_v50  ;;  %v7562_v0 = vld [vmem:[#allocation58_spill] sm:$0xff]  ;;  %v7564_v50 = vld [vmem:[#allocation60_spill] sm:$0xff] }
 0x81d   :  { %5465 = vrcp.f32 %v2851_v27  ;;  %v7556_v27 = vld [vmem:[#allocation52_spill] sm:$0xff] }
 0x824   :  { %v5462_v52 = vpop.eup %5461 }
 0x825   :  { %v2860_v16 = vmul.f32 %v5462_v52, %v5458_v60  ;;  %v5464_v11 = vpop.eup %5463  ;;  %v7563_v60 = vld [vmem:[#allocation59_spill] sm:$0xff]  ;;  %v7565_v52 = vld [vmem:[#allocation61_spill] sm:$0xff] }
 0x826   :  { %v2859_v57 = vmul.f32 %v5464_v11, %v6661_v36  ;;  %v7555_v36 = vld [vmem:[#allocation51_spill] sm:$0xff] }
 0x827   :  { %v5466_v46 = vpop.eup %5465  ;;  %v7567_v11 = vld [vmem:[#allocation63_spill] sm:$0xff] }
 0x828   :  { %v6775_v22 = vadd.f32 %v2860_v16, %v2859_v57  ;;  %v7566_v16 = vld [vmem:[#allocation62_spill] sm:$0xff]  ;;  %v7568_v57 = vld [vmem:[#allocation64_spill] sm:$0xff] }
 0x82a   :  { %5467 = vtanh.f32 %v6775_v22 }
 0x834   :  { %v5468_v58 = vpop.eup %5467 }
 0x835   :  { %v2863_v20 = vmul.f32 %v5468_v58, %v5466_v46  ;;  %v7569_v46 = vld [vmem:[#allocation65_spill] sm:$0xff]  ;;  %v7570_v58 = vld [vmem:[#allocation66_spill] sm:$0xff] }
 0x837   :  { %2929 = vmatmul.mubr.f32.vlgmr.msra.gmra.mrb[28].mxu0 %v2863_v20  ;;  %3000 = vmatmul.mubr.f32.vlgmr.msra.gmra.mrb[28].mxu1 %v2863_v20 }
 0x838   :  { %4976 = vmatpush1.bf16.msra.mxu0 %v5701_v62  ;;  %5008 = vmatpush1.bf16.msra.mxu1 %v5704_v2  ;;  %v7516_v62 = vld [vmem:[#allocation12_spill] sm:$0xff]  ;;  %v7517_v2 = vld [vmem:[#allocation13_spill] sm:$0xff] }
 0x839   :  { %4978 = vmatprep.subr.bf16.mxu0 %v5707_v5  ;;  %5010 = vmatprep.subr.bf16.mxu1 %v5710_v8  ;;  %v7518_v5 = vld [vmem:[#allocation14_spill] sm:$0xff]  ;;  %v7519_v8 = vld [vmem:[#allocation15_spill] sm:$0xff] }
 0x83a   :  { %3101 = vmatprep.mubr.f32.mxu0 %v7153_v40  ;;  %3172 = vmatprep.mubr.f32.mxu1 %v7153_v40 }
 0x83c   :  { %4980 = vmatpush1.bf16.msra.mxu0 %v5717_v12  ;;  %5012 = vmatpush1.bf16.msra.mxu1 %v5721_v15  ;;  %v7520_v12 = vld [vmem:[#allocation16_spill] sm:$0xff]  ;;  %v7521_v15 = vld [vmem:[#allocation17_spill] sm:$0xff] }
 0x83d   :  { %4982 = vmatprep.subr.bf16.mxu0 %v5725_v18  ;;  %5014 = vmatprep.subr.bf16.mxu1 %v5729_v21  ;;  %v7522_v18 = vld [vmem:[#allocation18_spill] sm:$0xff]  ;;  %v7523_v21 = vld [vmem:[#allocation19_spill] sm:$0xff] }
 0x840   :  { %4984 = vmatpush1.bf16.msra.mxu0 %v5736_v25  ;;  %5016 = vmatpush1.bf16.msra.mxu1 %v5740_v28  ;;  %v7524_v25 = vld [vmem:[#allocation20_spill] sm:$0xff]  ;;  %v7525_v28 = vld [vmem:[#allocation21_spill] sm:$0xff] }
 0x841   :  { %4986 = vmatprep.subr.bf16.mxu0 %v5744_v31  ;;  %5018 = vmatprep.subr.bf16.mxu1 %v5748_v34  ;;  %v7526_v31 = vld [vmem:[#allocation22_spill] sm:$0xff]  ;;  %v7527_v34 = vld [vmem:[#allocation23_spill] sm:$0xff] }
 0x844   :  { %4988 = vmatpush1.bf16.msra.mxu0 %v5755_v38  ;;  %5020 = vmatpush1.bf16.msra.mxu1 %v5759_v41  ;;  %v7528_v38 = vld [vmem:[#allocation24_spill] sm:$0xff]  ;;  %v7529_v41 = vld [vmem:[#allocation25_spill] sm:$0xff] }
 0x845   :  { %4990 = vmatprep.subr.bf16.mxu0 %v5763_v44  ;;  %5022 = vmatprep.subr.bf16.mxu1 %v5767_v47  ;;  %v7530_v44 = vld [vmem:[#allocation26_spill] sm:$0xff]  ;;  %v7531_v47 = vld [vmem:[#allocation27_spill] sm:$0xff] }
 0x848   :  { %4992 = vmatpush1.bf16.msra.mxu0 %v5774_v51  ;;  %5024 = vmatpush1.bf16.msra.mxu1 %v5778_v55  ;;  %v7532_v51 = vld [vmem:[#allocation28_spill] sm:$0xff]  ;;  %v7533_v55 = vld [vmem:[#allocation29_spill] sm:$0xff] }
 0x849   :  { %4994 = vmatprep.subr.bf16.mxu0 %v5782_v59  ;;  %5026 = vmatprep.subr.bf16.mxu1 %v5786_v63  ;;  %v7534_v59 = vld [vmem:[#allocation30_spill] sm:$0xff]  ;;  %v7535_v63 = vld [vmem:[#allocation31_spill] sm:$0xff] }
 0x84c   :  { %4996 = vmatpush1.bf16.msra.mxu0 %v5793_v6  ;;  %5028 = vmatpush1.bf16.msra.mxu1 %v5797_v10  ;;  %v7536_v6 = vld [vmem:[#allocation32_spill] sm:$0xff]  ;;  %v7537_v10 = vld [vmem:[#allocation33_spill] sm:$0xff] }
 0x84d   :  { %4998 = vmatprep.subr.bf16.mxu0 %v5801_v14  ;;  %5030 = vmatprep.subr.bf16.mxu1 %v5805_v19  ;;  %v7538_v14 = vld [vmem:[#allocation34_spill] sm:$0xff]  ;;  %v7539_v19 = vld [vmem:[#allocation35_spill] sm:$0xff] }
 0x850   :  { %5000 = vmatpush1.bf16.msra.mxu0 %v5812_v24  ;;  %5032 = vmatpush1.bf16.msra.mxu1 %v5816_v29  ;;  %v7540_v24 = vld [vmem:[#allocation36_spill] sm:$0xff]  ;;  %v7541_v29 = vld [vmem:[#allocation37_spill] sm:$0xff] }
 0x851   :  { %5002 = vmatprep.subr.bf16.mxu0 %v5820_v33  ;;  %5034 = vmatprep.subr.bf16.mxu1 %v5824_v37  ;;  %v7542_v33 = vld [vmem:[#allocation38_spill] sm:$0xff]  ;;  %v7543_v37 = vld [vmem:[#allocation39_spill] sm:$0xff] }
 0x854   :  { %5004 = vmatpush1.bf16.msra.mxu0 %v5831_v43  ;;  %5036 = vmatpush1.bf16.msra.mxu1 %v5835_v48  ;;  %v7544_v43 = vld [vmem:[#allocation40_spill] sm:$0xff]  ;;  %v7545_v48 = vld [vmem:[#allocation41_spill] sm:$0xff] }
 0x855   :  { %5038 = vmatprep.subr.bf16.mxu0 %v5839_v54  ;;  %5102 = vmatprep.subr.bf16.mxu1 %v5843_v61  ;;  %v7546_v54 = vld [vmem:[#allocation42_spill] sm:$0xff]  ;;  %v7547_v61 = vld [vmem:[#allocation43_spill] sm:$0xff] }
 0x857   :  { %3102 = vmatmul.mubr.f32.vlgmr.msra.gmra.mrb[14].mxu0 %v2863_v20  ;;  %3173 = vmatmul.mubr.f32.vlgmr.msra.gmra.mrb[14].mxu1 %v2863_v20 }
 0x858   :  { %5040 = vmatpush1.bf16.msra.mxu0 %v5847_v4  ;;  %5104 = vmatpush1.bf16.msra.mxu1 %v5851_v7  ;;  %v7548_v4 = vld [vmem:[#allocation44_spill] sm:$0xff]  ;;  %v7549_v7 = vld [vmem:[#allocation45_spill] sm:$0xff] }
 0x859   :  { %5042 = vmatprep.subr.bf16.mxu0 %v5853_v9  ;;  %5106 = vmatprep.subr.bf16.mxu1 %v5857_v17  ;;  %v7550_v9 = vld [vmem:[#allocation46_spill] sm:$0xff]  ;;  %v7551_v17 = vld [vmem:[#allocation47_spill] sm:$0xff] }
 0x85c   :  { %5044 = vmatpush1.bf16.msra.mxu0 %v5863_v30  ;;  %5108 = vmatpush1.bf16.msra.mxu1 %v5867_v32  ;;  %v7552_v30 = vld [vmem:[#allocation48_spill] sm:$0xff]  ;;  %v7553_v32 = vld [vmem:[#allocation49_spill] sm:$0xff] }
 0x85d   :  { %5046 = vmatprep.subr.bf16.mxu0 %v5869_v35  ;;  %5110 = vmatprep.subr.bf16.mxu1 %v7516_v62  ;;  %v7554_v35 = vld [vmem:[#allocation50_spill] sm:$0xff] }
 0x860   :  { %5048 = vmatpush1.bf16.msra.mxu0 %v7517_v2  ;;  %5112 = vmatpush1.bf16.msra.mxu1 %v7518_v5  ;;  %v7571_v2 = vld [vmem:[#allocation67_spill] sm:$0xff] }
 0x861   :  { %5050 = vmatprep.subr.bf16.mxu0 %v7519_v8  ;;  %5114 = vmatprep.subr.bf16.mxu1 %v7520_v12 }
 0x864   :  { %5052 = vmatpush1.bf16.msra.mxu0 %v7521_v15  ;;  %5116 = vmatpush1.bf16.msra.mxu1 %v7522_v18 }
 0x865   :  { %5054 = vmatprep.subr.bf16.mxu0 %v7523_v21  ;;  %5118 = vmatprep.subr.bf16.mxu1 %v7524_v25  ;;  %v7572_v25 = vld [vmem:[#allocation72_spill] sm:$0xff] }
 0x868   :  { %5056 = vmatpush1.bf16.msra.mxu0 %v7525_v28  ;;  %5120 = vmatpush1.bf16.msra.mxu1 %v7526_v31 }
 0x869   :  { %5058 = vmatprep.subr.bf16.mxu0 %v7527_v34  ;;  %5122 = vmatprep.subr.bf16.mxu1 %v7528_v38 }
 0x86c   :  { %5060 = vmatpush1.bf16.msra.mxu0 %v7529_v41  ;;  %5124 = vmatpush1.bf16.msra.mxu1 %v7530_v44 }
 0x86d   :  { %5062 = vmatprep.subr.bf16.mxu0 %v7531_v47  ;;  %5126 = vmatprep.subr.bf16.mxu1 %v7532_v51 }
 0x870   :  { %5064 = vmatpush1.bf16.msra.mxu0 %v7533_v55  ;;  %5128 = vmatpush1.bf16.msra.mxu1 %v7534_v59 }
 0x871   :  { %5066 = vmatprep.subr.bf16.mxu0 %v7535_v63  ;;  %5130 = vmatprep.subr.bf16.mxu1 %v7536_v6 }
 0x874   :  { %5068 = vmatpush1.bf16.msra.mxu0 %v7537_v10  ;;  %5132 = vmatpush1.bf16.msra.mxu1 %v7538_v14 }
 0x875   :  { %5070 = vmatprep.subr.bf16.mxu0 %v7539_v19  ;;  %5134 = vmatprep.subr.bf16.mxu1 %v7540_v24 }
 0x878   :  { %5072 = vmatpush1.bf16.msra.mxu0 %v7541_v29  ;;  %5136 = vmatpush1.bf16.msra.mxu1 %v7542_v33 }
 0x879   :  { %5074 = vmatprep.subr.bf16.mxu0 %v7543_v37  ;;  %5138 = vmatprep.subr.bf16.mxu1 %v7544_v43 }
 0x87c   :  { %5076 = vmatpush1.bf16.msra.mxu0 %v7545_v48  ;;  %5140 = vmatpush1.bf16.msra.mxu1 %v7546_v54 }
 0x87d   :  { %5078 = vmatprep.subr.bf16.mxu0 %v7547_v61  ;;  %5142 = vmatprep.subr.bf16.mxu1 %v7548_v4  ;;  %v7573_v4 = vld [vmem:[#allocation70_spill] sm:$0xff] }
 0x880   :  { %5080 = vmatpush1.bf16.msra.mxu0 %v7549_v7  ;;  %5144 = vmatpush1.bf16.msra.mxu1 %v7550_v9 }
 0x881   :  { %5082 = vmatprep.subr.bf16.mxu0 %v7551_v17  ;;  %5146 = vmatprep.subr.bf16.mxu1 %v7552_v30 }
 0x884   :  { %5084 = vmatpush1.bf16.msra.mxu0 %v7553_v32  ;;  %5148 = vmatpush1.bf16.msra.mxu1 %v7554_v35 }
 0x885   :  { %5086 = vmatprep.subr.bf16.mxu0 %v7555_v36  ;;  %5150 = vmatprep.subr.bf16.mxu1 %v7556_v27 }
 0x888   :  { %5088 = vmatpush1.bf16.msra.mxu0 %v7557_v13  ;;  %5152 = vmatpush1.bf16.msra.mxu1 %v7558_v49 }
 0x889   :  { %5090 = vmatprep.subr.bf16.mxu0 %v7559_v42  ;;  %5154 = vmatprep.subr.bf16.mxu1 %v7560_v23 }
 0x88c   :  { %5092 = vmatpush1.bf16.msra.mxu0 %v7561_v56  ;;  %5156 = vmatpush1.bf16.msra.mxu1 %v7562_v0 }
 0x88d   :  { %5094 = vmatprep.subr.bf16.mxu0 %v7563_v60  ;;  %5158 = vmatprep.subr.bf16.mxu1 %v7564_v50 }
 0x890   :  { %5096 = vmatpush1.bf16.msra.mxu0 %v7565_v52  ;;  %5160 = vmatpush1.bf16.msra.mxu1 %v7566_v16  ;;  %v3373_v16 = vld [vmem:[%s6953_s6] sm:$0xff] }
 0x891   :  { %5098 = vmatprep.subr.bf16.mxu0 %v7567_v11  ;;  %5162 = vmatprep.subr.bf16.mxu1 %v7568_v57  ;;  %v3374_v11 = vld [vmem:[%s6953_s6 + $0x8] sm:$0xff] }
 0x892   :  { %v5166_v57 = vpack.c.bf16 %v3374_v11, %v3373_v16 }
 0x894   :  { %5100 = vmatpush1.bf16.msra.mxu0 %v7569_v46  ;;  %5164 = vmatpush1.bf16.msra.mxu1 %v7570_v58  ;;  %v5593_v46 = vmov 0.0|0.0   ;;  %v3376_v58 = vld [vmem:[%s6953_s6 + $0x18] sm:$0xff] }
 0x895   :  { %5165 = vmatprep.subr.bf16.mxu0 %v5593_v46 }
 0x90a   :  { %v2930_v20 = vpop.f32.mrb[28].mxu0  ;;  %v3001_v62 = vpop.f32.mrb[28].mxu1 }
 0x90b   :  { %v2931_v5 = vadd.f32 %v2930_v20, %v7571_v2  ;;  %v2932_v8 = vpop.f32.mrb[29].mxu0  ;;  %v3003_v12 = vpop.f32.mrb[29].mxu1  ;;  %v3002_v28 = vadd.f32 %v3001_v62, %v7572_v25  ;;  %v3377_v62 = vld [vmem:[%s6953_s6 + $0x20] sm:$0xff] }
 0x90c   :  { %v2933_v15 = vadd.f32 %v2932_v8, %v7271_v45  ;;  %v3004_v31 = vadd.f32 %v3003_v12, %v7334_v39  ;;  %v3379_v12 = vld [vmem:[%s6953_s6 + $0x30] sm:$0xff] }
 0x90d   :  { %v3535_v18 = vmul.f32 -1.442695, %v2931_v5  ;;  %v3537_v34 = vmul.f32 -1.442695, %v3002_v28  ;;  %v3378_v5 = vld [vmem:[%s6953_s6 + $0x28] sm:$0xff] }
 0x90e   :  { %v3536_v21 = vmul.f32 -1.442695, %v2933_v15  ;;  %v5172_v8 = vpack.c.bf16 %v3378_v5, %v3377_v62  ;;  %v3380_v15 = vld [vmem:[%s6953_s6 + $0x38] sm:$0xff]  ;;  %v3382_v28 = vld [vmem:[%s6953_s6 + $0x48] sm:$0xff] }
 0x90f   :  { %5469 = vpow2.f32 %v3535_v18  ;;  %v5175_v18 = vpack.c.bf16 %v3380_v15, %v3379_v12 }
 0x910   :  { %5471 = vpow2.f32 %v3536_v21  ;;  %v3381_v21 = vld [vmem:[%s6953_s6 + $0x40] sm:$0xff] }
 0x911   :  { %5473 = vtanh.f32 %v3004_v31  ;;  %v5178_v31 = vpack.c.bf16 %v3382_v28, %v3381_v21 }
 0x912   :  { %5475 = vpow2.f32 %v3537_v34  ;;  %v3383_v34 = vld [vmem:[%s6953_s6 + $0x50] sm:$0xff] }
 0x919   :  { %v5470_v38 = vpop.eup %5469 }
 0x91a   :  { %v3015_v41 = vadd.f32 1.0, %v5470_v38  ;;  %v5472_v44 = vpop.eup %5471  ;;  %v3384_v38 = vld [vmem:[%s6953_s6 + $0x58] sm:$0xff] }
 0x91b   :  { %v3016_v47 = vadd.f32 1.0, %v5472_v44  ;;  %v5474_v51 = vpop.eup %5473  ;;  %v3385_v44 = vld [vmem:[%s6953_s6 + $0x60] sm:$0xff] }
 0x91c   :  { %5477 = vrcp.f32 %v3015_v41  ;;  %v5476_v55 = vpop.eup %5475  ;;  %v5181_v41 = vpack.c.bf16 %v3384_v38, %v3383_v34 }
 0x91d   :  { %5479 = vrcp.f32 %v3016_v47  ;;  %v3017_v10 = vadd.f32 1.0, %v5476_v55  ;;  %v3386_v47 = vld [vmem:[%s6953_s6 + $0x68] sm:$0xff]  ;;  %v3387_v55 = vld [vmem:[%s6953_s6 + $0x70] sm:$0xff] }
 0x91f   :  { %5481 = vrcp.f32 %v3017_v10 }
 0x926   :  { %v5478_v59 = vpop.eup %5477 }
 0x927   :  { %v3026_v63 = vmul.f32 %v5478_v59, %v5474_v51  ;;  %v5480_v6 = vpop.eup %5479  ;;  %v5184_v51 = vpack.c.bf16 %v3386_v47, %v3385_v44  ;;  %v3388_v59 = vld [vmem:[%s6953_s6 + $0x78] sm:$0xff] }
 0x928   :  { %v3025_v14 = vmul.f32 %v5480_v6, %v6767_v53 }
 0x929   :  { %v5482_v53 = vpop.eup %5481 }
 0x92a   :  { %v3103_v19 = vpop.f32.mrb[14].mxu0  ;;  %v3174_v24 = vpop.f32.mrb[14].mxu1  ;;  %v6879_v29 = vadd.f32 %v3026_v63, %v3025_v14  ;;  %v5187_v63 = vpack.c.bf16 %v3388_v59, %v3387_v55 }
 0x92b   :  { %v5203_v33 = vadd.f32 %v3103_v19, %v7274_v3  ;;  %v3105_v37 = vpop.f32.mrb[15].mxu0  ;;  %v3176_v43 = vpop.f32.mrb[15].mxu1  ;;  %v5219_v7 = vadd.f32 %v3174_v24, %v7573_v4 }
 0x92c   :  { %v5204_v48 = vadd.f32 %v3105_v37, %v7214_v26  ;;  %5483 = vtanh.f32 %v6879_v29  ;;  %v5220_v9 = vadd.f32 %v3176_v43, %v6070_v1 }
 0x92d   :  { %v3538_v54 = vmul.f32 -1.442695, %v5203_v33  ;;  %v3540_v30 = vmul.f32 -1.442695, %v5219_v7 }
 0x92e   :  { %v3539_v61 = vmul.f32 -1.442695, %v5204_v48 }
 0x92f   :  { %5485 = vpow2.f32 %v3538_v54 }
 0x930   :  { %5487 = vpow2.f32 %v3539_v61 }
 0x931   :  { %5489 = vtanh.f32 %v5220_v9 }
 0x932   :  { %5491 = vpow2.f32 %v3540_v30 }
 0x936   :  { %v5484_v17 = vpop.eup %5483 }
 0x937   :  { %v3029_v32 = vmul.f32 %v5484_v17, %v5482_v53 }
 0x939   :  { %v5486_v3 = vpop.eup %5485  ;;  %3271 = vmatprep.mubr.f32.mxu0 %v3029_v32  ;;  %3342 = vmatprep.mubr.f32.mxu1 %v3029_v32 }
 0x93a   :  { %v3192_v35 = vadd.f32 1.0, %v5486_v3  ;;  %v5488_v26 = vpop.eup %5487 }
 0x93b   :  { %v3193_v36 = vadd.f32 1.0, %v5488_v26  ;;  %v5490_v27 = vpop.eup %5489 }
 0x93c   :  { %5493 = vrcp.f32 %v3192_v35  ;;  %v5492_v13 = vpop.eup %5491 }
 0x93d   :  { %5495 = vrcp.f32 %v3193_v36  ;;  %v3194_v56 = vadd.f32 1.0, %v5492_v13  ;;  %v3544_v36 = vld [vmem:[%s6954_s7] ss:$0 sm:$0xff] }
 0x93f   :  { %5497 = vrcp.f32 %v3194_v56 }
 0x946   :  { %v5494_v49 = vpop.eup %5493 }
 0x947   :  { %v3203_v42 = vmul.f32 %v5494_v49, %v5490_v27  ;;  %v5496_v23 = vpop.eup %5495 }
 0x948   :  { %v3202_v1 = vmul.f32 %v5496_v23, %v6775_v22  ;;  %v3375_v22 = vld [vmem:[%s6953_s6 + $0x10] sm:$0xff] }
 0x949   :  { %v5498_v60 = vpop.eup %5497  ;;  %v5169_v20 = vpack.c.bf16 %v3376_v58, %v3375_v22 }
 0x94a   :  { %v3204_v0 = vadd.f32 %v3203_v42, %v3202_v1 }
 0x94c   :  { %5499 = vtanh.f32 %v3204_v0 }
 0x956   :  { %v5500_v50 = vpop.eup %5499 }
 0x957   :  { %v3206_v52 = vmul.f32 %v5500_v50, %v5498_v60 }
 0x959   :  { %3272 = vmatmul.mubr.f32.vlgmr.msra.gmra.mrb[30].mxu0 %v3206_v52  ;;  %3343 = vmatmul.mubr.f32.vlgmr.msra.gmra.mrb[30].mxu1 %v3206_v52 }
 0x95a   :  { %5167 = vmatpush3.bf16.msra.mxu0 %v5166_v57  ;;  %3594 = vmatprep.mubr.msk.f32.mxu0 %vm5594_vm1, %v7153_v40 }
 0x95b   :  { %5168 = vmatprep.subr.bf16.mxu0 %v5593_v46 }
 0x95e   :  { %5170 = vmatpush3.bf16.msra.mxu0 %v5169_v20 }
 0x95f   :  { %5171 = vmatprep.subr.bf16.mxu0 %v5593_v46 }
 0x962   :  { %5173 = vmatpush3.bf16.msra.mxu0 %v5172_v8 }
 0x963   :  { %5174 = vmatprep.subr.bf16.mxu0 %v5593_v46 }
 0x966   :  { %5176 = vmatpush3.bf16.msra.mxu0 %v5175_v18 }
 0x967   :  { %5177 = vmatprep.subr.bf16.mxu0 %v5593_v46 }
 0x96a   :  { %5179 = vmatpush3.bf16.msra.mxu0 %v5178_v31 }
 0x96b   :  { %5180 = vmatprep.subr.bf16.mxu0 %v5593_v46 }
 0x96e   :  { %5182 = vmatpush3.bf16.msra.mxu0 %v5181_v41 }
 0x96f   :  { %5183 = vmatprep.subr.bf16.mxu0 %v5593_v46 }
 0x972   :  { %5185 = vmatpush3.bf16.msra.mxu0 %v5184_v51 }
 0x973   :  { %5186 = vmatprep.subr.bf16.mxu0 %v5593_v46 }
 0x976   :  { %5188 = vmatpush3.bf16.msra.mxu0 %v5187_v63 }
 0xa2c   :  { %v3273_v6 = vpop.f32.mrb[30].mxu0  ;;  %v3344_v10 = vpop.f32.mrb[30].mxu1 }
 0xa2d   :  { %v3274_v14 = vadd.f32 %v3273_v6, %v7571_v2  ;;  %v3275_v40 = vpop.f32.mrb[31].mxu0  ;;  %v3346_v19 = vpop.f32.mrb[31].mxu1  ;;  %v3345_v43 = vadd.f32 %v3344_v10, %v7572_v25 }
 0xa2e   :  { %v3276_v24 = vadd.f32 %v3275_v40, %v7271_v45  ;;  %v3347_v48 = vadd.f32 %v3346_v19, %v7334_v39 }
 0xa2f   :  { %v3541_v33 = vmul.f32 -1.442695, %v3274_v14  ;;  %v3543_v54 = vmul.f32 -1.442695, %v3345_v43 }
 0xa30   :  { %v3542_v37 = vmul.f32 -1.442695, %v3276_v24 }
 0xa31   :  { %5501 = vpow2.f32 %v3541_v33 }
 0xa32   :  { %5503 = vpow2.f32 %v3542_v37 }
 0xa33   :  { %5505 = vtanh.f32 %v3347_v48 }
 0xa34   :  { %5507 = vpow2.f32 %v3543_v54 }
 0xa3b   :  { %v5502_v61 = vpop.eup %5501 }
 0xa3c   :  { %v3358_v4 = vadd.f32 1.0, %v5502_v61  ;;  %v5504_v7 = vpop.eup %5503 }
 0xa3d   :  { %v3359_v2 = vadd.f32 1.0, %v5504_v7  ;;  %v5506_v53 = vpop.eup %5505 }
 0xa3e   :  { %5509 = vrcp.f32 %v3358_v4  ;;  %v5508_v9 = vpop.eup %5507 }
 0xa3f   :  { %5511 = vrcp.f32 %v3359_v2  ;;  %v3360_v32 = vadd.f32 1.0, %v5508_v9 }
 0xa41   :  { %5513 = vrcp.f32 %v3360_v32 }
 0xa48   :  { %v5510_v45 = vpop.eup %5509 }
 0xa49   :  { %v3369_v17 = vmul.f32 %v5510_v45, %v5506_v53  ;;  %v5512_v30 = vpop.eup %5511 }
 0xa4a   :  { %v3368_v3 = vmul.f32 %v5512_v30, %v6879_v29 }
 0xa4b   :  { %v5514_v39 = vpop.eup %5513 }
 0xa4c   :  { %v3370_v25 = vadd.f32 %v3369_v17, %v3368_v3 }
 0xa4e   :  { %5515 = vtanh.f32 %v3370_v25 }
 0xa58   :  { %v5516_v35 = vpop.eup %5515 }
 0xa59   :  { %v3372_v26 = vmul.f32 %v5516_v35, %v5514_v39 }
 0xa5b   :  { %3595 = vmatmul.mubr.f32.vlgmr.msra.gmra.mrb[32].mxu0 %v3372_v26 }
 0xb2e   :  { %v3462_v27 = vpop.f32.mrb[32].mxu0 }
 0xb2f   :  { %v3463_v13 = vadd.f32 %v3544_v36, %v3462_v27  ;;  %v3596_v49 = vpop.f32.mrb[33].mxu0 }
 0xb31   :  { %3466 = vst [vmem:[%s6955_s8] sm:$0xff] %v3463_v13 }
 0xb32   :  { %3471 = vsyncpa [#allocation4], 1 }
 0xb33   :  { %3472 = vsyncpa [#allocation6], 1 }

</bundles_post_ra>
